<compile_context>
chip_gen: v7x
topology: tpu7x:2x2x1
jax: 0.10.0
libtpu: 0.0.40
codegen_flags: <defaults>
</compile_context>

<pallas_src>
import functools
import math

import jax
import jax.numpy as jnp
import numpy as np
from jax.experimental import pallas as pl
from jax.experimental.pallas import tpu as pltpu

EPS = 1e-8


def _cdiv(a, b):
    return -(-a // b)


def _fft_loss_kernel(x_ref, af_ref, bf_ref, phase_ref, mag_ref):
    tm, h, kw2 = x_ref.shape          # x block = [o | t] along lanes, KW each
    kw = kw2 // 2
    gh = af_ref.shape[1]              # af: (2*GH, GH) = [Re(kron(I_G,Fh)); Im(...)]
    g = gh // h
    tmg = tm // g
    tmh = tm * h

    af = af_ref[...]
    bf = bf_ref[...]
    # (tm, h, 2kw) -> (tmg, g*h, 2kw); layout-trivial when (g*h) % 8 == 0.
    x = x_ref[...].reshape(tmg, gh, kw2)

    # ---- row DFT: kron(I_G, Fh) applied to G*H-row blocks (contraction ~lanes)
    rr_parts, ri_parts = [], []
    for b in range(tmg):              # static, short; one (2GH,GH)x(GH,2KW) dot each
        res = jnp.dot(af, x[b], preferred_element_type=jnp.float32)  # (2gh, 2kw)
        rr_parts.append(res[:gh, :])
        ri_parts.append(res[gh:, :])
    rr = jnp.concatenate(rr_parts, axis=0)      # (tmh, 2kw)  real, [o | t] lanes
    ri = jnp.concatenate(ri_parts, axis=0)      # (tmh, 2kw)  imag, [o | t] lanes

    # ---- column DFT: one fused complex matmul -------------------------------
    #   LHS rows = [o-block ; t-block], lanes = [real | imag]
    #   RHS      = [[Br, Bi], [-Bi, Br]]   with Br/Bi = kron(I_K, Re/Im Fw)
    lo = jnp.concatenate([rr[:, :kw], ri[:, :kw]], axis=1)   # (tmh, 2kw)
    lt = jnp.concatenate([rr[:, kw:], ri[:, kw:]], axis=1)   # (tmh, 2kw)
    lhs = jnp.concatenate([lo, lt], axis=0)                  # (2*tmh, 2kw)
    if bf.dtype != jnp.float32:
        lhs = lhs.astype(bf.dtype)
    out = jnp.dot(lhs, bf, preferred_element_type=jnp.float32)   # (2*tmh, 2kw)

    o_re, o_im = out[:tmh, :kw], out[:tmh, kw:]
    t_re, t_im = out[tmh:, :kw], out[tmh:, kw:]

    # phase: |wrap(angle(O)-angle(T))| == |atan2(Im(O*conj(T)), Re(O*conj(T)))|
    cr = o_re * t_re + o_im * t_im
    ci = o_im * t_re - o_re * t_im
    phase = jnp.abs(jnp.arctan2(ci, cr))

    # log-magnitude: |log(1+|O|+eps) - log(1+|T|+eps)| with a single log
    abs_o = jnp.sqrt(o_re * o_re + o_im * o_im)
    abs_t = jnp.sqrt(t_re * t_re + t_im * t_im)
    ratio = (1.0 + abs_o + EPS) * pl.reciprocal(1.0 + abs_t + EPS, approx=True)
    mag = jnp.abs(jnp.log(ratio))

    # lane-dense (8, kw) partial sums; the tiny final reduction stays in XLA
    grp = tmh // 8
    phase_ref[...] = jnp.sum(phase.reshape(grp, 8, kw), axis=0)
    mag_ref[...] = jnp.sum(mag.reshape(grp, 8, kw), axis=0)


def _tpu_config():
    """Generation-dependent knobs: (lanes, num_cores, vmem_limit, tm_budget, dtype)."""
    kind = ""
    try:
        dev = jax.devices()[0]
        if dev.platform == "tpu":
            kind = dev.device_kind.lower()
    except Exception:
        pass
    is_v7 = ("v7" in kind) or ("tpu7" in kind)
    is_v6 = "v6" in kind
    if is_v7:
        # 64 MiB VMEM per TC, 2 TensorCores, 256-wide MXU, fast bf16
        return 256, 2, 30 * 1024 * 1024, 10 * 1024 * 1024, jnp.bfloat16
    if is_v6:
        # 128 MiB VMEM, 1 TC, 256-wide MXU, fast bf16
        return 256, 1, 48 * 1024 * 1024, 18 * 1024 * 1024, jnp.bfloat16
    # v5e and older (or unknown backend): 128-wide MXU, keep f32 for exact parity
    return 128, 1, 48 * 1024 * 1024, 18 * 1024 * 1024, jnp.float32


@functools.partial(
    jax.jit,
    static_argnames=("matmul_dtype", "lanes", "num_cores",
                     "vmem_limit_bytes", "tm_budget_bytes"))
def _fft_loss_impl(output, target, alpha, beta, *, matmul_dtype, lanes,
                   num_cores, vmem_limit_bytes, tm_budget_bytes):
    B, C, H, W = output.shape
    M = B * C

    # ---- static tiling choices ------------------------------------------
    K = max(1, lanes // W)            # slices packed along the lane axis
    KW = K * W
    G = 1                             # slices packed along the row-DFT axis
    for g in range(max(1, lanes // H), 0, -1):
        if (g * H) % 8 == 0:          # keep in-kernel reshapes layout-trivial
            G = g
            break
    GH = G * H
    r = 8 // math.gcd(H, 8)           # TM*H must stay a multiple of 8
    step = G * r // math.gcd(G, r)    # lcm(G, r)

    mm_bytes = 2 if matmul_dtype == jnp.bfloat16 else 4
    # rough per-slice-group VMEM: double-buffered [o|t] input + f32 intermediates
    per_tm = H * KW * (4 * mm_bytes + 112)
    TM = max(step, min(256, tm_budget_bytes // per_tm))
    TM = max(step, (TM // step) * step)           # clamp AFTER the budget/cap
    NG = _cdiv(M, K)                              # slice-groups that actually exist
    TM = min(TM, _cdiv(NG, step) * step)
    if num_cores >= 2 and NG > step:              # >=2 grid steps for dual-TC parts
        TM = min(TM, max(step, _cdiv(NG, 2 * step) * step))
    TM = max(TM, step)
    n = _cdiv(NG, TM)                             # grid size
    Mp = n * TM * K                               # padded slice count (zeros add ~0)

    # ---- DFT matrices with fftshift folded in (numpy consts, trace time) ----
    idx_h = np.arange(H)
    idx_w = np.arange(W)
    Fh = np.exp(-2j * np.pi * np.outer(idx_h, idx_h) / H)
    Fw = np.exp(-2j * np.pi * np.outer(idx_w, idx_w) / W)
    Fh = np.roll(Fh, H // 2, axis=0)              # fftshift along axis -2
    Fw = np.roll(Fw, W // 2, axis=1)              # fftshift along axis -1
    Ah = np.kron(np.eye(G), Fh)                   # (GH, GH)
    Bw = np.kron(np.eye(K), Fw)                   # (KW, KW)
    af = jnp.asarray(np.concatenate([Ah.real, Ah.imag], axis=0),
                     dtype=matmul_dtype)          # (2*GH, GH)
    bf = jnp.asarray(np.block([[Bw.real, Bw.imag],
                               [-Bw.imag, Bw.real]]),
                     dtype=matmul_dtype)          # (2*KW, 2*KW)

    # ---- pack o|t into one lane-dense slab (n*TM, H, 2*KW) -------------------
    # TODO(synk): the pad+transpose prepass costs one extra HBM pass over the
    # inputs; folding the K-interleave permutation into the column-DFT matrix
    # would let the kernel read (TM*K, H, W) tiles directly.
    def _pack(a):
        a = a.reshape(M, H, W).astype(jnp.float32)
        if Mp != M:
            a = jnp.concatenate(
                [a, jnp.zeros((Mp - M, H, W), jnp.float32)], axis=0)
        a = a.reshape(n * TM, K, H, W).transpose(0, 2, 1, 3)
        return a.reshape(n * TM, H, KW)

    x_slab = jnp.concatenate([_pack(output), _pack(target)], axis=-1)
    x_slab = x_slab.astype(matmul_dtype)

    phase_tiles, mag_tiles = pl.pallas_call(
        _fft_loss_kernel,
        out_shape=(jax.ShapeDtypeStruct((n * 8, KW), jnp.float32),
                   jax.ShapeDtypeStruct((n * 8, KW), jnp.float32)),
        grid_spec=pltpu.PrefetchScalarGridSpec(
            num_scalar_prefetch=0,
            grid=(n,),
            in_specs=[
                pl.BlockSpec((TM, H, 2 * KW), lambda i: (i, 0, 0)),  # [o|t] slab
                pl.BlockSpec((2 * GH, GH), lambda i: (0, 0)),        # row-DFT re;im
                pl.BlockSpec((2 * KW, 2 * KW), lambda i: (0, 0)),    # col-DFT fused
            ],
            out_specs=[
                pl.BlockSpec((8, KW), lambda i: (i, 0)),
                pl.BlockSpec((8, KW), lambda i: (i, 0)),
            ],
        ),
        compiler_params=pltpu.CompilerParams(
            dimension_semantics=("parallel",),
            vmem_limit_bytes=vmem_limit_bytes),
    )(x_slab, af, bf)

    # TODO(synk): real-input conjugate symmetry (rfft-style half spectrum) would
    # halve MXU/EUP work but complicates the shifted-column weighting; left out.
    inv_total = 1.0 / float(M * H * W)
    return (alpha * jnp.sum(phase_tiles) + beta * jnp.sum(mag_tiles)) * inv_total


def frequency_domain_loss(output, target, alpha=0.5, beta=0.5,
                          matmul_dtype=None, lanes=None):
    """Pallas implementation of FrequencyDomainLoss.forward (NCHW inputs)."""
    d_lanes, cores, vmem_limit, budget, d_dtype = _tpu_config()
    if lanes is None:
        lanes = d_lanes
    if matmul_dtype is None:
        matmul_dtype = d_dtype
    return _fft_loss_impl(output, target, alpha, beta,
                          matmul_dtype=matmul_dtype, lanes=lanes,
                          num_cores=cores, vmem_limit_bytes=vmem_limit,
                          tm_budget_bytes=budget)


def _reference_loss(output, target, alpha=0.5, beta=0.5):
    of = jnp.fft.fftshift(jnp.fft.fft2(output), axes=(-2, -1))
    tf = jnp.fft.fftshift(jnp.fft.fft2(target), axes=(-2, -1))
    oa, ta = jnp.angle(of), jnp.angle(tf)
    pd = jnp.arctan2(jnp.sin(oa - ta), jnp.cos(oa - ta))
    loss_angle = jnp.mean(jnp.abs(pd))
    ol = jnp.log(1.0 + jnp.abs(of) + EPS)
    tl = jnp.log(1.0 + jnp.abs(tf) + EPS)
    loss_abs = jnp.mean(jnp.abs(ol - tl))
    return alpha * loss_angle + beta * loss_abs


if __name__ == "__main__":
    key = jax.random.PRNGKey(0)
    k1, k2 = jax.random.split(key)
    B, C, H, W = 2, 4, 16, 16
    output = jax.random.normal(k1, (B, C, H, W), dtype=jnp.float32)
    target = jax.random.normal(k2, (B, C, H, W), dtype=jnp.float32)

    loss = frequency_domain_loss(output, target, alpha=0.5, beta=0.5)
    loss = jax.block_until_ready(loss)

    ref = _reference_loss(output, target, alpha=0.5, beta=0.5)
    # 2e-2 tolerance covers the bf16-MXU default path on v6e/v7x; f32 path
    # (v5e / unknown) agrees to ~1e-5.
    np.testing.assert_allclose(np.asarray(loss), np.asarray(ref),
                               rtol=2e-2, atol=2e-2)
    print("KERNEL_OK")
</pallas_src>

<mosaic_0001>
module attributes {stable_mosaic.version = 11 : i64} {
  func.func @_fft_loss_kernel(%arg0: i32, %arg1: memref<8x16x256xf32, #tpu.memory_space<vmem>>, %arg2: memref<256x128xf32, #tpu.memory_space<vmem>>, %arg3: memref<256x256xf32, #tpu.memory_space<vmem>>, %arg4: memref<8x128xf32, #tpu.memory_space<vmem>>, %arg5: memref<8x128xf32, #tpu.memory_space<vmem>>) attributes {dimension_semantics = [#tpu.dimension_semantics<parallel>], iteration_bounds = array<i64: 1>, scalar_prefetch = 0 : i64, scratch_operands = 0 : i64, tpu.core_type = #tpu.core_type<tc>, window_params = [{transform_indices = @transform_0, window_bounds = array<i64: 8, 16, 256>}, {pipeline_mode = #tpu.pipeline_mode<synchronous>, transform_indices = @transform_1, window_bounds = array<i64: 256, 128>}, {pipeline_mode = #tpu.pipeline_mode<synchronous>, transform_indices = @transform_2, window_bounds = array<i64: 256, 256>}, {transform_indices = @transform_3, window_bounds = array<i64: 8, 128>}, {transform_indices = @transform_4, window_bounds = array<i64: 8, 128>}]} {
    %c0 = arith.constant 0 : index
    %c0_0 = arith.constant 0 : index
    %0 = vector.load %arg2[%c0, %c0_0] : memref<256x128xf32, #tpu.memory_space<vmem>>, vector<256x128xf32>
    %c0_1 = arith.constant 0 : index
    %c0_2 = arith.constant 0 : index
    %1 = vector.load %arg3[%c0_1, %c0_2] : memref<256x256xf32, #tpu.memory_space<vmem>>, vector<256x256xf32>
    %c0_3 = arith.constant 0 : index
    %c0_4 = arith.constant 0 : index
    %c0_5 = arith.constant 0 : index
    %2 = vector.load %arg1[%c0_3, %c0_4, %c0_5] : memref<8x16x256xf32, #tpu.memory_space<vmem>>, vector<8x16x256xf32>
    %3 = vector.shape_cast %2 : vector<8x16x256xf32> to vector<1x128x256xf32>
    %4 = vector.shape_cast %3 : vector<1x128x256xf32> to vector<128x256xf32>
    %cst = arith.constant dense<0.000000e+00> : vector<256x256xf32>
    %5 = tpu.matmul %0, %4, %cst {dimension_numbers = #tpu.dot_dimension_numbers<[1], [0], [0], [1], [0, 0, 1, 1], [], []>} : vector<256x128xf32>, vector<128x256xf32>, vector<256x256xf32> -> vector<256x256xf32>
    %6 = vector.extract_strided_slice %5 {offsets = [0, 0], sizes = [128, 256], strides = [1, 1]} : vector<256x256xf32> to vector<128x256xf32>
    %7 = vector.extract_strided_slice %5 {offsets = [128, 0], sizes = [128, 256], strides = [1, 1]} : vector<256x256xf32> to vector<128x256xf32>
    %8 = vector.extract_strided_slice %6 {offsets = [0, 0], sizes = [128, 128], strides = [1, 1]} : vector<128x256xf32> to vector<128x128xf32>
    %9 = vector.extract_strided_slice %7 {offsets = [0, 0], sizes = [128, 128], strides = [1, 1]} : vector<128x256xf32> to vector<128x128xf32>
    %10 = tpu.concatenate %8, %9 in 1 : vector<128x128xf32>, vector<128x128xf32> -> vector<128x256xf32>
    %11 = vector.extract_strided_slice %6 {offsets = [0, 128], sizes = [128, 128], strides = [1, 1]} : vector<128x256xf32> to vector<128x128xf32>
    %12 = vector.extract_strided_slice %7 {offsets = [0, 128], sizes = [128, 128], strides = [1, 1]} : vector<128x256xf32> to vector<128x128xf32>
    %13 = tpu.concatenate %11, %12 in 1 : vector<128x128xf32>, vector<128x128xf32> -> vector<128x256xf32>
    %14 = tpu.concatenate %10, %13 in 0 : vector<128x256xf32>, vector<128x256xf32> -> vector<256x256xf32>
    %cst_6 = arith.constant dense<0.000000e+00> : vector<256x256xf32>
    %15 = tpu.matmul %14, %1, %cst_6 {dimension_numbers = #tpu.dot_dimension_numbers<[1], [0], [0], [1], [0, 0, 1, 1], [], []>} : vector<256x256xf32>, vector<256x256xf32>, vector<256x256xf32> -> vector<256x256xf32>
    %16 = vector.extract_strided_slice %15 {offsets = [0, 0], sizes = [128, 128], strides = [1, 1]} : vector<256x256xf32> to vector<128x128xf32>
    %17 = vector.extract_strided_slice %15 {offsets = [0, 128], sizes = [128, 128], strides = [1, 1]} : vector<256x256xf32> to vector<128x128xf32>
    %18 = vector.extract_strided_slice %15 {offsets = [128, 0], sizes = [128, 128], strides = [1, 1]} : vector<256x256xf32> to vector<128x128xf32>
    %19 = vector.extract_strided_slice %15 {offsets = [128, 128], sizes = [128, 128], strides = [1, 1]} : vector<256x256xf32> to vector<128x128xf32>
    %20 = arith.mulf %16, %18 : vector<128x128xf32>
    %21 = arith.mulf %17, %19 : vector<128x128xf32>
    %22 = arith.addf %20, %21 : vector<128x128xf32>
    %23 = arith.mulf %17, %18 : vector<128x128xf32>
    %24 = arith.mulf %16, %19 : vector<128x128xf32>
    %25 = arith.subf %23, %24 : vector<128x128xf32>
    %26 = math.atan2 %25, %22 : vector<128x128xf32>
    %27 = math.absf %26 : vector<128x128xf32>
    %28 = arith.mulf %16, %16 : vector<128x128xf32>
    %29 = arith.mulf %17, %17 : vector<128x128xf32>
    %30 = arith.addf %28, %29 : vector<128x128xf32>
    %31 = math.sqrt %30 : vector<128x128xf32>
    %32 = arith.mulf %18, %18 : vector<128x128xf32>
    %33 = arith.mulf %19, %19 : vector<128x128xf32>
    %34 = arith.addf %32, %33 : vector<128x128xf32>
    %35 = math.sqrt %34 : vector<128x128xf32>
    %cst_7 = arith.constant 1.000000e+00 : f32
    %36 = vector.broadcast %cst_7 : f32 to vector<128x128xf32>
    %37 = arith.addf %36, %31 : vector<128x128xf32>
    %cst_8 = arith.constant 9.99999993E-9 : f32
    %38 = vector.broadcast %cst_8 : f32 to vector<128x128xf32>
    %39 = arith.addf %37, %38 : vector<128x128xf32>
    %cst_9 = arith.constant 1.000000e+00 : f32
    %40 = vector.broadcast %cst_9 : f32 to vector<128x128xf32>
    %41 = arith.addf %40, %35 : vector<128x128xf32>
    %cst_10 = arith.constant 9.99999993E-9 : f32
    %42 = vector.broadcast %cst_10 : f32 to vector<128x128xf32>
    %43 = arith.addf %41, %42 : vector<128x128xf32>
    %44 = tpu.reciprocal %43 {approx = true} : vector<128x128xf32> -> vector<128x128xf32>
    %45 = arith.mulf %39, %44 : vector<128x128xf32>
    %46 = math.log %45 : vector<128x128xf32>
    %47 = math.absf %46 : vector<128x128xf32>
    %48 = vector.shape_cast %27 : vector<128x128xf32> to vector<16x8x128xf32>
    %cst_11 = arith.constant dense<0.000000e+00> : vector<8x128xf32>
    %49 = vector.multi_reduction <add>, %48, %cst_11 [0] : vector<16x8x128xf32> to vector<8x128xf32>
    %c0_12 = arith.constant 0 : index
    %c0_13 = arith.constant 0 : index
    %50 = vector.load %arg4[%c0_12, %c0_13] : memref<8x128xf32, #tpu.memory_space<vmem>>, vector<8x128xf32>
    tpu.vector_store %arg4[%c0_12, %c0_13], %49 {strides = array<i32>} : memref<8x128xf32, #tpu.memory_space<vmem>>, vector<8x128xf32>,
    %51 = vector.shape_cast %47 : vector<128x128xf32> to vector<16x8x128xf32>
    %cst_14 = arith.constant dense<0.000000e+00> : vector<8x128xf32>
    %52 = vector.multi_reduction <add>, %51, %cst_14 [0] : vector<16x8x128xf32> to vector<8x128xf32>
    %c0_15 = arith.constant 0 : index
    %c0_16 = arith.constant 0 : index
    %53 = vector.load %arg5[%c0_15, %c0_16] : memref<8x128xf32, #tpu.memory_space<vmem>>, vector<8x128xf32>
    tpu.vector_store %arg5[%c0_15, %c0_16], %52 {strides = array<i32>} : memref<8x128xf32, #tpu.memory_space<vmem>>, vector<8x128xf32>,
    return
  }
  func.func @transform_0(%arg0: i32) -> (i32, i32, i32) {
    %c0_i32 = arith.constant 0 : i32
    %c0_i32_0 = arith.constant 0 : i32
    %c0_i32_1 = arith.constant 0 : i32
    return %arg0, %c0_i32, %c0_i32_0 : i32, i32, i32
  }
  func.func @transform_1(%arg0: i32) -> (i32, i32) {
    %c0_i32 = arith.constant 0 : i32
    %c0_i32_0 = arith.constant 0 : i32
    %c0_i32_1 = arith.constant 0 : i32
    return %c0_i32, %c0_i32_0 : i32, i32
  }
  func.func @transform_2(%arg0: i32) -> (i32, i32) {
    %c0_i32 = arith.constant 0 : i32
    %c0_i32_0 = arith.constant 0 : i32
    %c0_i32_1 = arith.constant 0 : i32
    return %c0_i32, %c0_i32_0 : i32, i32
  }
  func.func @transform_3(%arg0: i32) -> (i32, i32) {
    %c0_i32 = arith.constant 0 : i32
    %c0_i32_0 = arith.constant 0 : i32
    return %arg0, %c0_i32 : i32, i32
  }
  func.func @transform_4(%arg0: i32) -> (i32, i32) {
    %c0_i32 = arith.constant 0 : i32
    %c0_i32_0 = arith.constant 0 : i32
    return %arg0, %c0_i32 : i32, i32
  }
}

</mosaic_0001>

<bundles_post_ra>
// kernel: _fft_loss_impl.1
= control target key start
LH: loop header
LB: loop body
LE: loop exit
PB: predicated region body
PF: predicated region fallthrough
CT: control target
= control target key end

     0   :  { %v4769_v3 = vmov 0.0   ;;  %s4764_s0 = inlined_call_operand.vmem [shape: f32[8,16,256], index: 0, kind: input, shape index: {}]   ;;  %s4765_s1 = inlined_call_operand.vmem [shape: f32[256,128], index: 1, kind: input, shape index: {}]   ;;  %s4766_s2 = inlined_call_operand.vmem [shape: f32[256,256], index: 2, kind: input, shape index: {}]   ;;  %s4767_s4 = inlined_call_operand.vmem [shape: f32[8,128], index: 4, kind: output, shape index: {1}]   ;;  %s4768_s3 = inlined_call_operand.vmem [shape: f32[8,128], index: 3, kind: output, shape index: {0}]  }
   0x1   :  { %v113_v0 = vld [vmem:[%s4764_s0 + $0x8] sm:$0xff]  ;;  %v115_v1 = vld [vmem:[%s4764_s0 + $0x18] sm:$0xff]  ;;  %v112_v2 = vld [vmem:[%s4764_s0] sm:$0xff]  ;;  %208 = vmatprep.mubr.f32.mxu0 %v4769_v3 }
   0x2   :  { %v2026_v4 = vpack.c.bf16 %v115_v1, %v113_v0  ;;  %v114_v5 = vld [vmem:[%s4764_s0 + $0x10] sm:$0xff]  ;;  %v117_v6 = vld [vmem:[%s4764_s0 + $0x28] sm:$0xff]  ;;  %v119_v7 = vld [vmem:[%s4764_s0 + $0x38] sm:$0xff] }
   0x3   :  { %v2028_v8 = vpack.c.bf16 %v114_v5, %v112_v2  ;;  %v2030_v9 = vpack.c.bf16 %v119_v7, %v117_v6  ;;  %v116_v10 = vld [vmem:[%s4764_s0 + $0x20] sm:$0xff]  ;;  %v118_v11 = vld [vmem:[%s4764_s0 + $0x30] sm:$0xff]  ;;  %v121_v12 = vld [vmem:[%s4764_s0 + $0x48] sm:$0xff] }
   0x4   :  { %2027 = vmatprep.subr.bf16.mxu0 %v2026_v4  ;;  %v123_v13 = vld [vmem:[%s4764_s0 + $0x58] sm:$0xff]  ;;  %v2032_v14 = vpack.c.bf16 %v118_v11, %v116_v10  ;;  %v120_v16 = vld [vmem:[%s4764_s0 + $0x40] sm:$0xff]  ;;  %v122_v17 = vld [vmem:[%s4764_s0 + $0x50] sm:$0xff] }
   0x5   :  { %2029 = vmatpush1.bf16.msra.mxu0 %v2028_v8  ;;  %v2034_v15 = vpack.c.bf16 %v123_v13, %v121_v12  ;;  %v125_v18 = vld [vmem:[%s4764_s0 + $0x68] sm:$0xff]  ;;  %v127_v19 = vld [vmem:[%s4764_s0 + $0x78] sm:$0xff]  ;;  %v2036_v20 = vpack.c.bf16 %v122_v17, %v120_v16  ;;  %v124_v22 = vld [vmem:[%s4764_s0 + $0x60] sm:$0xff] }
   0x6   :  { %2031 = vmatprep.subr.bf16.mxu0 %v2030_v9  ;;  %v2038_v21 = vpack.c.bf16 %v127_v19, %v125_v18  ;;  %v126_v23 = vld [vmem:[%s4764_s0 + $0x70] sm:$0xff]  ;;  %v129_v24 = vld [vmem:[%s4764_s0 + $0x88] sm:$0xff]  ;;  %v131_v25 = vld [vmem:[%s4764_s0 + $0x98] sm:$0xff] }
   0x7   :  { %v2040_v26 = vpack.c.bf16 %v126_v23, %v124_v22  ;;  %v2042_v27 = vpack.c.bf16 %v131_v25, %v129_v24  ;;  %v128_v28 = vld [vmem:[%s4764_s0 + $0x80] sm:$0xff]  ;;  %v130_v29 = vld [vmem:[%s4764_s0 + $0x90] sm:$0xff]  ;;  %v133_v30 = vld [vmem:[%s4764_s0 + $0xa8] sm:$0xff] }
   0x8   :  { %v135_v31 = vld [vmem:[%s4764_s0 + $0xb8] sm:$0xff]  ;;  %v2044_v32 = vpack.c.bf16 %v130_v29, %v128_v28  ;;  %v132_v34 = vld [vmem:[%s4764_s0 + $0xa0] sm:$0xff]  ;;  %v134_v35 = vld [vmem:[%s4764_s0 + $0xb0] sm:$0xff] }
   0x9   :  { %2033 = vmatpush1.bf16.msra.mxu0 %v2032_v14  ;;  %v2046_v33 = vpack.c.bf16 %v135_v31, %v133_v30  ;;  %v137_v36 = vld [vmem:[%s4764_s0 + $0xc8] sm:$0xff]  ;;  %v139_v37 = vld [vmem:[%s4764_s0 + $0xd8] sm:$0xff]  ;;  %v2048_v38 = vpack.c.bf16 %v134_v35, %v132_v34  ;;  %v136_v40 = vld [vmem:[%s4764_s0 + $0xc0] sm:$0xff] }
   0xa   :  { %2035 = vmatprep.subr.bf16.mxu0 %v2034_v15  ;;  %v2050_v39 = vpack.c.bf16 %v139_v37, %v137_v36  ;;  %v138_v41 = vld [vmem:[%s4764_s0 + $0xd0] sm:$0xff]  ;;  %v141_v42 = vld [vmem:[%s4764_s0 + $0xe8] sm:$0xff]  ;;  %v143_v43 = vld [vmem:[%s4764_s0 + $0xf8] sm:$0xff] }
   0xb   :  { %v2052_v44 = vpack.c.bf16 %v138_v41, %v136_v40  ;;  %v2054_v45 = vpack.c.bf16 %v143_v43, %v141_v42  ;;  %v140_v46 = vld [vmem:[%s4764_s0 + $0xe0] sm:$0xff]  ;;  %v142_v47 = vld [vmem:[%s4764_s0 + $0xf0] sm:$0xff]  ;;  %v17_v50 = vld [vmem:[%s4765_s1 + $0x8] sm:$0xff] }
   0xc   :  { %v2056_v48 = vpack.c.bf16 %v142_v47, %v140_v46  ;;  %v16_v49 = vld [vmem:[%s4765_s1] sm:$0xff]  ;;  %v18_v51 = vld [vmem:[%s4765_s1 + $0x10] sm:$0xff]  ;;  %v19_v52 = vld [vmem:[%s4765_s1 + $0x18] sm:$0xff] }
   0xd   :  { %2037 = vmatpush1.bf16.msra.mxu0 %v2036_v20  ;;  %v20_v53 = vld [vmem:[%s4765_s1 + $0x20] sm:$0xff]  ;;  %v21_v54 = vld [vmem:[%s4765_s1 + $0x28] sm:$0xff]  ;;  %v22_v55 = vld [vmem:[%s4765_s1 + $0x30] sm:$0xff] }
   0xe   :  { %2039 = vmatprep.subr.bf16.mxu0 %v2038_v21  ;;  %v23_v56 = vld [vmem:[%s4765_s1 + $0x38] sm:$0xff]  ;;  %v24_v57 = vld [vmem:[%s4765_s1 + $0x40] sm:$0xff]  ;;  %v25_v58 = vld [vmem:[%s4765_s1 + $0x48] sm:$0xff] }
   0xf   :  { %v26_v59 = vld [vmem:[%s4765_s1 + $0x50] sm:$0xff]  ;;  %v27_v60 = vld [vmem:[%s4765_s1 + $0x58] sm:$0xff]  ;;  %v28_v61 = vld [vmem:[%s4765_s1 + $0x60] sm:$0xff] }
  0x10   :  { %v29_v62 = vld [vmem:[%s4765_s1 + $0x68] sm:$0xff]  ;;  %v30_v63 = vld [vmem:[%s4765_s1 + $0x70] sm:$0xff]  ;;  %v31_v0 = vld [vmem:[%s4765_s1 + $0x78] sm:$0xff] }
  0x11   :  { %2041 = vmatpush1.bf16.msra.mxu0 %v2040_v26  ;;  %v32_v1 = vld [vmem:[%s4765_s1 + $0x80] sm:$0xff]  ;;  %v33_v2 = vld [vmem:[%s4765_s1 + $0x88] sm:$0xff]  ;;  %v34_v4 = vld [vmem:[%s4765_s1 + $0x90] sm:$0xff] }
  0x12   :  { %2043 = vmatprep.subr.bf16.mxu0 %v2042_v27  ;;  %v35_v5 = vld [vmem:[%s4765_s1 + $0x98] sm:$0xff]  ;;  %v36_v6 = vld [vmem:[%s4765_s1 + $0xa0] sm:$0xff]  ;;  %v37_v7 = vld [vmem:[%s4765_s1 + $0xa8] sm:$0xff] }
  0x13   :  { %v49_v8 = vld [vmem:[%s4766_s2 + $0x8] sm:$0xff]  ;;  %v51_v9 = vld [vmem:[%s4766_s2 + $0x18] sm:$0xff]  ;;  %v48_v11 = vld [vmem:[%s4766_s2] sm:$0xff] }
  0x14   :  { %v2058_v10 = vpack.c.bf16 %v51_v9, %v49_v8  ;;  %v50_v12 = vld [vmem:[%s4766_s2 + $0x10] sm:$0xff]  ;;  %v53_v15 = vld [vmem:[%s4766_s2 + $0x28] sm:$0xff]  ;;  %v55_v16 = vld [vmem:[%s4766_s2 + $0x38] sm:$0xff] }
  0x15   :  { %2045 = vmatpush1.bf16.msra.mxu0 %v2044_v32  ;;  %v2060_v13 = vpack.c.bf16 %v50_v12, %v48_v11  ;;  %v38_v14 = vld [vmem:[%s4765_s1 + $0xb0] sm:$0xff]  ;;  %v2062_v17 = vpack.c.bf16 %v55_v16, %v53_v15  ;;  %v52_v18 = vld [vmem:[%s4766_s2 + $0x20] sm:$0xff]  ;;  %v39_v21 = vld [vmem:[%s4765_s1 + $0xb8] sm:$0xff] }
  0x16   :  { %2047 = vmatprep.subr.bf16.mxu0 %v2046_v33  ;;  %2122 = vmatprep.subr.bf16.mxu1 %v2058_v10  ;;  %v54_v19 = vld [vmem:[%s4766_s2 + $0x30] sm:$0xff]  ;;  %v57_v22 = vld [vmem:[%s4766_s2 + $0x48] sm:$0xff]  ;;  %v59_v23 = vld [vmem:[%s4766_s2 + $0x58] sm:$0xff] }
  0x17   :  { %2138 = vmatpush1.bf16.msra.mxu1 %v2060_v13  ;;  %v2064_v20 = vpack.c.bf16 %v54_v19, %v52_v18  ;;  %v2066_v24 = vpack.c.bf16 %v59_v23, %v57_v22  ;;  %v56_v25 = vld [vmem:[%s4766_s2 + $0x40] sm:$0xff]  ;;  %v58_v26 = vld [vmem:[%s4766_s2 + $0x50] sm:$0xff]  ;;  %v61_v29 = vld [vmem:[%s4766_s2 + $0x68] sm:$0xff] }
  0x18   :  { %2123 = vmatprep.subr.bf16.mxu1 %v2062_v17  ;;  %v2068_v27 = vpack.c.bf16 %v58_v26, %v56_v25  ;;  %v40_v28 = vld [vmem:[%s4765_s1 + $0xc0] sm:$0xff]  ;;  %v63_v30 = vld [vmem:[%s4766_s2 + $0x78] sm:$0xff]  ;;  %v62_v33 = vld [vmem:[%s4766_s2 + $0x70] sm:$0xff] }
  0x19   :  { %2049 = vmatpush1.bf16.msra.mxu0 %v2048_v38  ;;  %v2070_v31 = vpack.c.bf16 %v63_v30, %v61_v29  ;;  %v60_v32 = vld [vmem:[%s4766_s2 + $0x60] sm:$0xff]  ;;  %v41_v35 = vld [vmem:[%s4765_s1 + $0xc8] sm:$0xff]  ;;  %v67_v37 = vld [vmem:[%s4766_s2 + $0x98] sm:$0xff] }
  0x1a   :  { %2051 = vmatprep.subr.bf16.mxu0 %v2050_v39  ;;  %v2072_v34 = vpack.c.bf16 %v62_v33, %v60_v32  ;;  %v65_v36 = vld [vmem:[%s4766_s2 + $0x88] sm:$0xff]  ;;  %v64_v39 = vld [vmem:[%s4766_s2 + $0x80] sm:$0xff]  ;;  %v66_v40 = vld [vmem:[%s4766_s2 + $0x90] sm:$0xff] }
  0x1b   :  { %2139 = vmatpush1.bf16.msra.mxu1 %v2064_v20  ;;  %v2074_v38 = vpack.c.bf16 %v67_v37, %v65_v36  ;;  %v2076_v41 = vpack.c.bf16 %v66_v40, %v64_v39  ;;  %v42_v42 = vld [vmem:[%s4765_s1 + $0xd0] sm:$0xff]  ;;  %v69_v43 = vld [vmem:[%s4766_s2 + $0xa8] sm:$0xff]  ;;  %v68_v46 = vld [vmem:[%s4766_s2 + $0xa0] sm:$0xff] }
  0x1c   :  { %2124 = vmatprep.subr.bf16.mxu1 %v2066_v24  ;;  %v70_v47 = vld [vmem:[%s4766_s2 + $0xb0] sm:$0xff]  ;;  %v85_v8 = vld [vmem:[%s4766_s2 + $0x128] sm:$0xff]  ;;  %v87_v9 = vld [vmem:[%s4766_s2 + $0x138] sm:$0xff] }
  0x1d   :  { %2053 = vmatpush1.bf16.msra.mxu0 %v2052_v44  ;;  %v71_v44 = vld [vmem:[%s4766_s2 + $0xb8] sm:$0xff]  ;;  %v84_v11 = vld [vmem:[%s4766_s2 + $0x120] sm:$0xff]  ;;  %v86_v12 = vld [vmem:[%s4766_s2 + $0x130] sm:$0xff] }
  0x1e   :  { %2055 = vmatprep.subr.bf16.mxu0 %v2054_v45  ;;  %v2078_v45 = vpack.c.bf16 %v71_v44, %v69_v43  ;;  %v89_v15 = vld [vmem:[%s4766_s2 + $0x148] sm:$0xff]  ;;  %v91_v16 = vld [vmem:[%s4766_s2 + $0x158] sm:$0xff]  ;;  %v88_v18 = vld [vmem:[%s4766_s2 + $0x140] sm:$0xff] }
  0x1f   :  { %2140 = vmatpush1.bf16.msra.mxu1 %v2068_v27  ;;  %v90_v19 = vld [vmem:[%s4766_s2 + $0x150] sm:$0xff]  ;;  %v95_v22 = vld [vmem:[%s4766_s2 + $0x178] sm:$0xff]  ;;  %v96_v30 = vld [vmem:[%s4766_s2 + $0x180] sm:$0xff] }
  0x20   :  { %2125 = vmatprep.subr.bf16.mxu1 %v2070_v31  ;;  %v94_v25 = vld [vmem:[%s4766_s2 + $0x170] sm:$0xff]  ;;  %v101_v33 = vld [vmem:[%s4766_s2 + $0x1a8] sm:$0xff]  ;;  %v100_v36 = vld [vmem:[%s4766_s2 + $0x1a0] sm:$0xff] }
  0x21   :  { %2057 = vmatpush1.bf16.msra.mxu0 %v2056_v48  ;;  %v2080_v48 = vpack.c.bf16 %v70_v47, %v68_v46  ;;  %v102_v37 = vld [vmem:[%s4766_s2 + $0x1b0] sm:$0xff]  ;;  %v105_v39 = vld [vmem:[%s4766_s2 + $0x1c8] sm:$0xff]  ;;  %v107_v40 = vld [vmem:[%s4766_s2 + $0x1d8] sm:$0xff] }
  0x22   :  { %2059 = vmatprep.subr.bf16.mxu0 %v2058_v10  ;;  %v2094_v10 = vpack.c.bf16 %v87_v9, %v85_v8  ;;  %v106_v43 = vld [vmem:[%s4766_s2 + $0x1d0] sm:$0xff]  ;;  %v111_v46 = vld [vmem:[%s4766_s2 + $0x1f8] sm:$0xff] }
  0x23   :  { %2141 = vmatpush1.bf16.msra.mxu1 %v2072_v34 }
  0x24   :  { %209 = vmatmul.mubr.f32.vlgmr.msra.gmra.mrb[0].mxu0 %v16_v49  ;;  %2126 = vmatprep.subr.bf16.mxu1 %v2074_v38  ;;  %v43_v49 = vld [vmem:[%s4765_s1 + $0xd8] sm:$0xff] }
  0x25   :  { %214 = vmatprep.mubr.f32.mxu0 %v4769_v3  ;;  %2061 = vmatpush1.bf16.msra.mxu0 %v2060_v13  ;;  %v2096_v13 = vpack.c.bf16 %v86_v12, %v84_v11 }
  0x26   :  { %2063 = vmatprep.subr.bf16.mxu0 %v2062_v17  ;;  %v2098_v17 = vpack.c.bf16 %v91_v16, %v89_v15 }
  0x27   :  { %2142 = vmatpush1.bf16.msra.mxu1 %v2076_v41 }
  0x28   :  { %215 = vmatmul.mubr.f32.gmra.mrb[2].mxu0 %v17_v50  ;;  %v73_v50 = vld [vmem:[%s4766_s2 + $0xc8] sm:$0xff]  ;;  %2127 = vmatprep.subr.bf16.mxu1 %v2078_v45 }
  0x29   :  { %220 = vmatprep.mubr.f32.mxu0 %v4769_v3  ;;  %2065 = vmatpush1.bf16.msra.mxu0 %v2064_v20  ;;  %v2100_v20 = vpack.c.bf16 %v90_v19, %v88_v18 }
  0x2a   :  { %2067 = vmatprep.subr.bf16.mxu0 %v2066_v24  ;;  %v92_v24 = vld [vmem:[%s4766_s2 + $0x160] sm:$0xff] }
  0x2b   :  { %2143 = vmatpush1.bf16.msra.mxu1 %v2080_v48  ;;  %v2104_v26 = vpack.c.bf16 %v94_v25, %v92_v24 }
  0x2c   :  { %221 = vmatmul.mubr.f32.gmra.mrb[4].mxu0 %v18_v51  ;;  %v75_v51 = vld [vmem:[%s4766_s2 + $0xd8] sm:$0xff] }
  0x2d   :  { %226 = vmatprep.mubr.f32.mxu0 %v4769_v3  ;;  %2069 = vmatpush1.bf16.msra.mxu0 %v2068_v27  ;;  %v97_v27 = vld [vmem:[%s4766_s2 + $0x188] sm:$0xff] }
  0x2e   :  { %2071 = vmatprep.subr.bf16.mxu0 %v2070_v31  ;;  %v98_v31 = vld [vmem:[%s4766_s2 + $0x190] sm:$0xff] }
  0x2f   :  { %v2108_v32 = vpack.c.bf16 %v98_v31, %v96_v30 }
  0x30   :  { %227 = vmatmul.mubr.f32.gmra.mrb[6].mxu0 %v19_v52  ;;  %v2082_v52 = vpack.c.bf16 %v75_v51, %v73_v50 }
  0x31   :  { %232 = vmatprep.mubr.f32.mxu0 %v4769_v3  ;;  %2073 = vmatpush1.bf16.msra.mxu0 %v2072_v34  ;;  %v103_v34 = vld [vmem:[%s4766_s2 + $0x1b8] sm:$0xff] }
  0x32   :  { %2075 = vmatprep.subr.bf16.mxu0 %v2074_v38  ;;  %2128 = vmatprep.subr.bf16.mxu1 %v2082_v52  ;;  %v2112_v38 = vpack.c.bf16 %v102_v37, %v100_v36 }
  0x34   :  { %233 = vmatmul.mubr.f32.gmra.mrb[8].mxu0 %v20_v53  ;;  %v72_v53 = vld [vmem:[%s4766_s2 + $0xc0] sm:$0xff] }
  0x35   :  { %238 = vmatprep.mubr.f32.mxu0 %v4769_v3  ;;  %2077 = vmatpush1.bf16.msra.mxu0 %v2076_v41  ;;  %v2114_v41 = vpack.c.bf16 %v107_v40, %v105_v39 }
  0x36   :  { %2079 = vmatprep.subr.bf16.mxu0 %v2078_v45  ;;  %v109_v45 = vld [vmem:[%s4766_s2 + $0x1e8] sm:$0xff] }
  0x37   :  { %v2118_v47 = vpack.c.bf16 %v111_v46, %v109_v45 }
  0x38   :  { %239 = vmatmul.mubr.f32.gmra.mrb[10].mxu0 %v21_v54  ;;  %v74_v54 = vld [vmem:[%s4766_s2 + $0xd0] sm:$0xff] }
  0x39   :  { %244 = vmatprep.mubr.f32.mxu0 %v4769_v3  ;;  %2081 = vmatpush1.bf16.msra.mxu0 %v2080_v48  ;;  %v108_v48 = vld [vmem:[%s4766_s2 + $0x1e0] sm:$0xff] }
  0x3a   :  { %2083 = vmatprep.subr.bf16.mxu0 %v2082_v52 }
  0x3c   :  { %245 = vmatmul.mubr.f32.gmra.mrb[12].mxu0 %v22_v55  ;;  %v2084_v55 = vpack.c.bf16 %v74_v54, %v72_v53 }
  0x3d   :  { %250 = vmatprep.mubr.f32.mxu0 %v4769_v3 }
  0x3e   :  { %2085 = vmatpush1.bf16.msra.mxu0 %v2084_v55  ;;  %2144 = vmatpush1.bf16.msra.mxu1 %v2084_v55 }
  0x40   :  { %251 = vmatmul.mubr.f32.gmra.mrb[14].mxu0 %v23_v56  ;;  %v44_v56 = vld [vmem:[%s4765_s1 + $0xe0] sm:$0xff] }
  0x41   :  { %256 = vmatprep.mubr.f32.mxu0 %v4769_v3 }
  0x44   :  { %257 = vmatmul.mubr.f32.gmra.mrb[16].mxu0 %v24_v57  ;;  %v77_v57 = vld [vmem:[%s4766_s2 + $0xe8] sm:$0xff] }
  0x45   :  { %262 = vmatprep.mubr.f32.mxu0 %v4769_v3 }
  0x48   :  { %263 = vmatmul.mubr.f32.gmra.mrb[18].mxu0 %v25_v58  ;;  %v79_v58 = vld [vmem:[%s4766_s2 + $0xf8] sm:$0xff] }
  0x49   :  { %268 = vmatprep.mubr.f32.mxu0 %v4769_v3 }
  0x4c   :  { %269 = vmatmul.mubr.f32.gmra.mrb[20].mxu0 %v26_v59  ;;  %v2086_v59 = vpack.c.bf16 %v79_v58, %v77_v57 }
  0x4d   :  { %274 = vmatprep.mubr.f32.mxu0 %v4769_v3 }
  0x4e   :  { %2087 = vmatprep.subr.bf16.mxu0 %v2086_v59  ;;  %2129 = vmatprep.subr.bf16.mxu1 %v2086_v59 }
  0x50   :  { %275 = vmatmul.mubr.f32.gmra.mrb[22].mxu0 %v27_v60  ;;  %v76_v60 = vld [vmem:[%s4766_s2 + $0xe0] sm:$0xff] }
  0x51   :  { %280 = vmatprep.mubr.f32.mxu0 %v4769_v3 }
  0x54   :  { %281 = vmatmul.mubr.f32.gmra.mrb[24].mxu0 %v28_v61  ;;  %v78_v61 = vld [vmem:[%s4766_s2 + $0xf0] sm:$0xff] }
  0x55   :  { %286 = vmatprep.mubr.f32.mxu0 %v4769_v3 }
  0x58   :  { %287 = vmatmul.mubr.f32.gmra.mrb[26].mxu0 %v29_v62  ;;  %v2088_v62 = vpack.c.bf16 %v78_v61, %v76_v60 }
  0x59   :  { %292 = vmatprep.mubr.f32.mxu0 %v4769_v3 }
  0x5a   :  { %2089 = vmatpush1.bf16.msra.mxu0 %v2088_v62  ;;  %2145 = vmatpush1.bf16.msra.mxu1 %v2088_v62 }
  0x5c   :  { %293 = vmatmul.mubr.f32.gmra.mrb[28].mxu0 %v30_v63  ;;  %v45_v63 = vld [vmem:[%s4765_s1 + $0xe8] sm:$0xff] }
  0x5d   :  { %298 = vmatprep.mubr.f32.mxu0 %v4769_v3 }
  0x60   :  { %299 = vmatmul.mubr.f32.gmra.mrb[30].mxu0 %v31_v0  ;;  %v81_v0 = vld [vmem:[%s4766_s2 + $0x108] sm:$0xff] }
  0x61   :  { %304 = vmatprep.mubr.f32.mxu0 %v4769_v3 }
  0x64   :  { %305 = vmatmul.mubr.f32.gmra.mrb[32].mxu0 %v32_v1  ;;  %v83_v1 = vld [vmem:[%s4766_s2 + $0x118] sm:$0xff] }
  0x65   :  { %310 = vmatprep.mubr.f32.mxu0 %v4769_v3 }
  0x68   :  { %311 = vmatmul.mubr.f32.gmra.mrb[34].mxu0 %v33_v2  ;;  %v2090_v2 = vpack.c.bf16 %v83_v1, %v81_v0 }
  0x69   :  { %316 = vmatprep.mubr.f32.mxu0 %v4769_v3 }
  0x6a   :  { %2091 = vmatprep.subr.bf16.mxu0 %v2090_v2  ;;  %2130 = vmatprep.subr.bf16.mxu1 %v2090_v2 }
  0x6c   :  { %317 = vmatmul.mubr.f32.gmra.mrb[36].mxu0 %v34_v4  ;;  %v80_v4 = vld [vmem:[%s4766_s2 + $0x100] sm:$0xff] }
  0x6d   :  { %322 = vmatprep.mubr.f32.mxu0 %v4769_v3 }
  0x70   :  { %323 = vmatmul.mubr.f32.gmra.mrb[38].mxu0 %v35_v5  ;;  %v82_v5 = vld [vmem:[%s4766_s2 + $0x110] sm:$0xff] }
  0x71   :  { %328 = vmatprep.mubr.f32.mxu0 %v4769_v3 }
  0x74   :  { %329 = vmatmul.mubr.f32.gmra.mrb[40].mxu0 %v36_v6  ;;  %v2092_v6 = vpack.c.bf16 %v82_v5, %v80_v4 }
  0x75   :  { %334 = vmatprep.mubr.f32.mxu0 %v4769_v3 }
  0x76   :  { %2093 = vmatpush1.bf16.msra.mxu0 %v2092_v6  ;;  %2146 = vmatpush1.bf16.msra.mxu1 %v2092_v6 }
  0x77   :  { %2095 = vmatprep.subr.bf16.mxu0 %v2094_v10  ;;  %2131 = vmatprep.subr.bf16.mxu1 %v2094_v10 }
  0x78   :  { %335 = vmatmul.mubr.f32.gmra.mrb[42].mxu0 %v37_v7  ;;  %v46_v7 = vld [vmem:[%s4765_s1 + $0xf0] sm:$0xff] }
  0x79   :  { %340 = vmatprep.mubr.f32.mxu0 %v4769_v3 }
  0x7a   :  { %2097 = vmatpush1.bf16.msra.mxu0 %v2096_v13  ;;  %2147 = vmatpush1.bf16.msra.mxu1 %v2096_v13 }
  0x7b   :  { %2099 = vmatprep.subr.bf16.mxu0 %v2098_v17  ;;  %2132 = vmatprep.subr.bf16.mxu1 %v2098_v17 }
  0x7c   :  { %341 = vmatmul.mubr.f32.gmra.mrb[44].mxu0 %v38_v14  ;;  %v47_v14 = vld [vmem:[%s4765_s1 + $0xf8] sm:$0xff] }
  0x7d   :  { %346 = vmatprep.mubr.f32.mxu0 %v4769_v3 }
  0x7e   :  { %2101 = vmatpush1.bf16.msra.mxu0 %v2100_v20  ;;  %2148 = vmatpush1.bf16.msra.mxu1 %v2100_v20 }
  0x80   :  { %347 = vmatmul.mubr.f32.gmra.mrb[46].mxu0 %v39_v21  ;;  %v93_v21 = vld [vmem:[%s4766_s2 + $0x168] sm:$0xff] }
  0x81   :  { %352 = vmatprep.mubr.f32.mxu0 %v4769_v3  ;;  %v2102_v23 = vpack.c.bf16 %v95_v22, %v93_v21 }
  0x83   :  { %2103 = vmatprep.subr.bf16.mxu0 %v2102_v23  ;;  %2133 = vmatprep.subr.bf16.mxu1 %v2102_v23 }
  0x84   :  { %353 = vmatmul.mubr.f32.gmra.mrb[48].mxu0 %v40_v28  ;;  %v99_v28 = vld [vmem:[%s4766_s2 + $0x198] sm:$0xff]  ;;  %2149 = vmatpush1.bf16.msra.mxu1 %v2104_v26 }
  0x85   :  { %358 = vmatprep.mubr.f32.mxu0 %v4769_v3  ;;  %2105 = vmatpush1.bf16.msra.mxu0 %v2104_v26  ;;  %v2106_v29 = vpack.c.bf16 %v99_v28, %v97_v27 }
  0x87   :  { %2107 = vmatprep.subr.bf16.mxu0 %v2106_v29  ;;  %2134 = vmatprep.subr.bf16.mxu1 %v2106_v29 }
  0x88   :  { %359 = vmatmul.mubr.f32.gmra.mrb[50].mxu0 %v41_v35  ;;  %v2110_v35 = vpack.c.bf16 %v103_v34, %v101_v33  ;;  %2150 = vmatpush1.bf16.msra.mxu1 %v2108_v32 }
  0x89   :  { %364 = vmatprep.mubr.f32.mxu0 %v4769_v3  ;;  %2109 = vmatpush1.bf16.msra.mxu0 %v2108_v32 }
  0x8a   :  { %2111 = vmatprep.subr.bf16.mxu0 %v2110_v35  ;;  %2135 = vmatprep.subr.bf16.mxu1 %v2110_v35 }
  0x8c   :  { %365 = vmatmul.mubr.f32.gmra.mrb[52].mxu0 %v42_v42  ;;  %v104_v42 = vld [vmem:[%s4766_s2 + $0x1c0] sm:$0xff]  ;;  %2151 = vmatpush1.bf16.msra.mxu1 %v2112_v38 }
  0x8d   :  { %370 = vmatprep.mubr.f32.mxu0 %v4769_v3  ;;  %2113 = vmatpush1.bf16.msra.mxu0 %v2112_v38  ;;  %v2116_v44 = vpack.c.bf16 %v106_v43, %v104_v42 }
  0x8e   :  { %2115 = vmatprep.subr.bf16.mxu0 %v2114_v41  ;;  %2136 = vmatprep.subr.bf16.mxu1 %v2114_v41 }
  0x90   :  { %371 = vmatmul.mubr.f32.gmra.mrb[54].mxu0 %v43_v49  ;;  %v110_v49 = vld [vmem:[%s4766_s2 + $0x1f0] sm:$0xff]  ;;  %2152 = vmatpush1.bf16.msra.mxu1 %v2116_v44 }
  0x91   :  { %376 = vmatprep.mubr.f32.mxu0 %v4769_v3  ;;  %2117 = vmatpush1.bf16.msra.mxu0 %v2116_v44  ;;  %v2120_v50 = vpack.c.bf16 %v110_v49, %v108_v48 }
  0x92   :  { %2119 = vmatprep.subr.bf16.mxu0 %v2118_v47  ;;  %2137 = vmatprep.subr.bf16.mxu1 %v2118_v47 }
  0x94   :  { %377 = vmatmul.mubr.f32.gmra.mrb[56].mxu0 %v44_v56  ;;  %2153 = vmatpush1.bf16.msra.mxu1 %v2120_v50 }
  0x95   :  { %382 = vmatprep.mubr.f32.mxu0 %v4769_v3  ;;  %2121 = vmatpush1.bf16.msra.mxu0 %v2120_v50 }
  0x98   :  { %383 = vmatmul.mubr.f32.gmra.mrb[58].mxu0 %v45_v63 }
  0x99   :  { %388 = vmatprep.mubr.f32.mxu0 %v4769_v3 }
  0x9c   :  { %389 = vmatmul.mubr.f32.gmra.mrb[60].mxu0 %v46_v7 }
  0x9d   :  { %394 = vmatprep.mubr.f32.mxu0 %v4769_v3 }
  0xa0   :  { %395 = vmatmul.mubr.f32.gmra.mrb[62].mxu0 %v47_v14 }
  0xf7   :  { %v210_v51 = vpop.f32.mrb[0].mxu0 }
  0xf8   :  { %v2759_v52 = vpop.f32.mrb[1].mxu0 }
  0xfb   :  { %v216_v53 = vpop.f32.mrb[2].mxu0 }
  0xfc   :  { %v2761_v54 = vpop.f32.mrb[3].mxu0 }
  0xff   :  { %v222_v55 = vpop.f32.mrb[4].mxu0 }
 0x100   :  { %v2763_v56 = vpop.f32.mrb[5].mxu0 }
 0x103   :  { %v228_v57 = vpop.f32.mrb[6].mxu0 }
 0x104   :  { %v2765_v58 = vpop.f32.mrb[7].mxu0 }
 0x107   :  { %v234_v59 = vpop.f32.mrb[8].mxu0 }
 0x108   :  { %v2767_v60 = vpop.f32.mrb[9].mxu0 }
 0x10b   :  { %v240_v61 = vpop.f32.mrb[10].mxu0 }
 0x10c   :  { %v2769_v62 = vpop.f32.mrb[11].mxu0 }
 0x10f   :  { %v246_v63 = vpop.f32.mrb[12].mxu0 }
 0x110   :  { %v2771_v0 = vpop.f32.mrb[13].mxu0 }
 0x113   :  { %v252_v1 = vpop.f32.mrb[14].mxu0 }
 0x114   :  { %v2773_v2 = vpop.f32.mrb[15].mxu0 }
 0x117   :  { %v258_v4 = vpop.f32.mrb[16].mxu0 }
 0x118   :  { %v2775_v5 = vpop.f32.mrb[17].mxu0 }
 0x11b   :  { %v264_v6 = vpop.f32.mrb[18].mxu0 }
 0x11c   :  { %v2777_v7 = vpop.f32.mrb[19].mxu0 }
 0x11f   :  { %v270_v8 = vpop.f32.mrb[20].mxu0 }
 0x120   :  { %v2779_v9 = vpop.f32.mrb[21].mxu0 }
 0x123   :  { %v276_v10 = vpop.f32.mrb[22].mxu0 }
 0x124   :  { %v2781_v11 = vpop.f32.mrb[23].mxu0 }
 0x127   :  { %v282_v12 = vpop.f32.mrb[24].mxu0 }
 0x128   :  { %v2783_v13 = vpop.f32.mrb[25].mxu0 }
 0x12b   :  { %v288_v14 = vpop.f32.mrb[26].mxu0 }
 0x12c   :  { %v2785_v15 = vpop.f32.mrb[27].mxu0 }
 0x12f   :  { %v294_v16 = vpop.f32.mrb[28].mxu0 }
 0x130   :  { %v2787_v17 = vpop.f32.mrb[29].mxu0 }
 0x133   :  { %v2789_v18 = vpop.f32.mrb[30].mxu0 }
 0x134   :  { %v2791_v19 = vpop.f32.mrb[31].mxu0 }
 0x137   :  { %v306_v20 = vpop.f32.mrb[32].mxu0 }
 0x138   :  { %v308_v21 = vpop.f32.mrb[33].mxu0  ;;  %465 = vmatprep.mubr.f32.mxu0 %v306_v20 }
 0x139   :  { %466 = vmatmul.mubr.f32.vlgmr.msra.gmra.mrb[64].mxu0 %v210_v51 }
 0x13b   :  { %v312_v22 = vpop.f32.mrb[34].mxu0 }
 0x13c   :  { %v314_v23 = vpop.f32.mrb[35].mxu0  ;;  %471 = vmatprep.mubr.f32.mxu0 %v312_v22 }
 0x13d   :  { %472 = vmatmul.mubr.f32.gmra.mrb[66].mxu0 %v216_v53 }
 0x13f   :  { %v318_v24 = vpop.f32.mrb[36].mxu0 }
 0x140   :  { %v320_v25 = vpop.f32.mrb[37].mxu0  ;;  %477 = vmatprep.mubr.f32.mxu0 %v318_v24 }
 0x141   :  { %478 = vmatmul.mubr.f32.gmra.mrb[68].mxu0 %v222_v55 }
 0x143   :  { %v324_v26 = vpop.f32.mrb[38].mxu0 }
 0x144   :  { %v326_v27 = vpop.f32.mrb[39].mxu0  ;;  %483 = vmatprep.mubr.f32.mxu0 %v324_v26 }
 0x145   :  { %484 = vmatmul.mubr.f32.gmra.mrb[70].mxu0 %v228_v57 }
 0x147   :  { %v330_v28 = vpop.f32.mrb[40].mxu0 }
 0x148   :  { %v332_v29 = vpop.f32.mrb[41].mxu0  ;;  %489 = vmatprep.mubr.f32.mxu1 %v330_v28 }
 0x149   :  { %490 = vmatmul.mubr.f32.vlgmr.msra.gmra.mrb[0].mxu1 %v234_v59 }
 0x14b   :  { %v336_v30 = vpop.f32.mrb[42].mxu0 }
 0x14c   :  { %v338_v31 = vpop.f32.mrb[43].mxu0  ;;  %495 = vmatprep.mubr.f32.mxu1 %v336_v30 }
 0x14d   :  { %496 = vmatmul.mubr.f32.gmra.mrb[2].mxu1 %v240_v61 }
 0x14f   :  { %v342_v32 = vpop.f32.mrb[44].mxu0 }
 0x150   :  { %v344_v33 = vpop.f32.mrb[45].mxu0  ;;  %501 = vmatprep.mubr.f32.mxu1 %v342_v32 }
 0x151   :  { %502 = vmatmul.mubr.f32.gmra.mrb[4].mxu1 %v246_v63 }
 0x153   :  { %v348_v34 = vpop.f32.mrb[46].mxu0 }
 0x154   :  { %v350_v35 = vpop.f32.mrb[47].mxu0  ;;  %507 = vmatprep.mubr.f32.mxu1 %v348_v34 }
 0x155   :  { %508 = vmatmul.mubr.f32.gmra.mrb[6].mxu1 %v252_v1 }
 0x157   :  { %v354_v36 = vpop.f32.mrb[48].mxu0 }
 0x158   :  { %v356_v37 = vpop.f32.mrb[49].mxu0  ;;  %513 = vmatprep.mubr.f32.mxu1 %v354_v36 }
 0x159   :  { %514 = vmatmul.mubr.f32.gmra.mrb[8].mxu1 %v258_v4 }
 0x15b   :  { %v360_v38 = vpop.f32.mrb[50].mxu0 }
 0x15c   :  { %v362_v39 = vpop.f32.mrb[51].mxu0  ;;  %519 = vmatprep.mubr.f32.mxu1 %v360_v38 }
 0x15d   :  { %520 = vmatmul.mubr.f32.gmra.mrb[10].mxu1 %v264_v6 }
 0x15f   :  { %v366_v40 = vpop.f32.mrb[52].mxu0 }
 0x160   :  { %v368_v41 = vpop.f32.mrb[53].mxu0  ;;  %525 = vmatprep.mubr.f32.mxu1 %v366_v40 }
 0x161   :  { %526 = vmatmul.mubr.f32.gmra.mrb[12].mxu1 %v270_v8 }
 0x163   :  { %v372_v42 = vpop.f32.mrb[54].mxu0 }
 0x164   :  { %v374_v43 = vpop.f32.mrb[55].mxu0  ;;  %531 = vmatprep.mubr.f32.mxu1 %v372_v42 }
 0x165   :  { %532 = vmatmul.mubr.f32.gmra.mrb[14].mxu1 %v276_v10 }
 0x167   :  { %v378_v44 = vpop.f32.mrb[56].mxu0 }
 0x168   :  { %v380_v45 = vpop.f32.mrb[57].mxu0  ;;  %537 = vmatprep.mubr.f32.mxu1 %v378_v44 }
 0x169   :  { %538 = vmatmul.mubr.f32.gmra.mrb[16].mxu1 %v282_v12 }
 0x16b   :  { %v384_v46 = vpop.f32.mrb[58].mxu0 }
 0x16c   :  { %v386_v47 = vpop.f32.mrb[59].mxu0  ;;  %543 = vmatprep.mubr.f32.mxu1 %v384_v46 }
 0x16d   :  { %544 = vmatmul.mubr.f32.gmra.mrb[18].mxu1 %v288_v14 }
 0x16f   :  { %v390_v48 = vpop.f32.mrb[60].mxu0 }
 0x170   :  { %v392_v49 = vpop.f32.mrb[61].mxu0  ;;  %549 = vmatprep.mubr.f32.mxu1 %v390_v48 }
 0x171   :  { %550 = vmatmul.mubr.f32.gmra.mrb[20].mxu1 %v294_v16 }
 0x173   :  { %v396_v50 = vpop.f32.mrb[62].mxu0 }
 0x174   :  { %v398_v51 = vpop.f32.mrb[63].mxu0  ;;  %555 = vmatprep.mubr.f32.mxu1 %v396_v50 }
 0x175   :  { %556 = vmatmul.mubr.f32.gmra.mrb[22].mxu1 %v2789_v18 }
 0x176   :  { %561 = vmatprep.mubr.f32.mxu1 %v308_v21 }
 0x179   :  { %562 = vmatmul.mubr.f32.gmra.mrb[24].mxu1 %v2759_v52 }
 0x17a   :  { %567 = vmatprep.mubr.f32.mxu1 %v314_v23 }
 0x17d   :  { %568 = vmatmul.mubr.f32.gmra.mrb[26].mxu1 %v2761_v54 }
 0x17e   :  { %573 = vmatprep.mubr.f32.mxu1 %v320_v25 }
 0x181   :  { %574 = vmatmul.mubr.f32.gmra.mrb[28].mxu1 %v2763_v56 }
 0x182   :  { %579 = vmatprep.mubr.f32.mxu1 %v326_v27 }
 0x185   :  { %580 = vmatmul.mubr.f32.gmra.mrb[30].mxu1 %v2765_v58 }
 0x186   :  { %585 = vmatprep.mubr.f32.mxu1 %v332_v29 }
 0x189   :  { %586 = vmatmul.mubr.f32.gmra.mrb[32].mxu1 %v2767_v60 }
 0x18a   :  { %591 = vmatprep.mubr.f32.mxu1 %v338_v31 }
 0x18d   :  { %592 = vmatmul.mubr.f32.gmra.mrb[34].mxu1 %v2769_v62 }
 0x18e   :  { %597 = vmatprep.mubr.f32.mxu1 %v344_v33 }
 0x191   :  { %598 = vmatmul.mubr.f32.gmra.mrb[36].mxu1 %v2771_v0 }
 0x192   :  { %603 = vmatprep.mubr.f32.mxu1 %v350_v35 }
 0x195   :  { %604 = vmatmul.mubr.f32.gmra.mrb[38].mxu1 %v2773_v2 }
 0x196   :  { %609 = vmatprep.mubr.f32.mxu1 %v356_v37 }
 0x199   :  { %610 = vmatmul.mubr.f32.gmra.mrb[40].mxu1 %v2775_v5 }
 0x19a   :  { %615 = vmatprep.mubr.f32.mxu1 %v362_v39 }
 0x19d   :  { %616 = vmatmul.mubr.f32.gmra.mrb[42].mxu1 %v2777_v7 }
 0x19e   :  { %621 = vmatprep.mubr.f32.mxu1 %v368_v41 }
 0x1a1   :  { %622 = vmatmul.mubr.f32.gmra.mrb[44].mxu1 %v2779_v9 }
 0x1a2   :  { %627 = vmatprep.mubr.f32.mxu1 %v374_v43 }
 0x1a5   :  { %628 = vmatmul.mubr.f32.gmra.mrb[46].mxu1 %v2781_v11 }
 0x1a6   :  { %633 = vmatprep.mubr.f32.mxu1 %v380_v45 }
 0x1a9   :  { %634 = vmatmul.mubr.f32.gmra.mrb[48].mxu1 %v2783_v13 }
 0x1aa   :  { %639 = vmatprep.mubr.f32.mxu1 %v386_v47 }
 0x1ad   :  { %640 = vmatmul.mubr.f32.gmra.mrb[50].mxu1 %v2785_v15 }
 0x1ae   :  { %645 = vmatprep.mubr.f32.mxu1 %v392_v49 }
 0x1b1   :  { %646 = vmatmul.mubr.f32.gmra.mrb[52].mxu1 %v2787_v17 }
 0x1b2   :  { %651 = vmatprep.mubr.f32.mxu1 %v398_v51 }
 0x1b5   :  { %652 = vmatmul.mubr.f32.gmra.mrb[54].mxu1 %v2791_v19 }
 0x20c   :  { %v2810_v52 = vpop.f32.mrb[64].mxu0 }
 0x20d   :  { %v1522_v53 = vmul.f32 %v2810_v52, %v2810_v52  ;;  %v2814_v54 = vpop.f32.mrb[65].mxu0 }
 0x20e   :  { %v1538_v55 = vmul.f32 %v2814_v54, %v2814_v54 }
 0x210   :  { %v2818_v56 = vadd.f32 %v1538_v55, %v1522_v53  ;;  %v2820_v57 = vpop.f32.mrb[66].mxu0 }
 0x211   :  { %v1523_v58 = vmul.f32 %v2820_v57, %v2820_v57  ;;  %v2824_v59 = vpop.f32.mrb[67].mxu0 }
 0x212   :  { %v1539_v60 = vmul.f32 %v2824_v59, %v2824_v59  ;;  %2156 = vrsqrt.f32 %v2818_v56  ;;  %vm1572_vm0 = vcmp.eq.f32.partialorder %v2818_v56, inf  ;;  %vm1574_vm1 = vcmp.eq.f32.partialorder %v2818_v56, 0.0 }
 0x213   :  { %v1575_v55 = vand.u32 2147483648, %v2818_v56 }
 0x214   :  { %v2828_v61 = vpop.f32.mrb[68].mxu0  ;;  %v2830_v62 = vadd.f32 %v1539_v60, %v1523_v58 }
 0x215   :  { %v1524_v63 = vmul.f32 %v2828_v61, %v2828_v61  ;;  %v2834_v0 = vpop.f32.mrb[69].mxu0 }
 0x216   :  { %v1540_v1 = vmul.f32 %v2834_v0, %v2834_v0  ;;  %2158 = vrsqrt.f32 %v2830_v62  ;;  %vm1579_vm2 = vcmp.eq.f32.partialorder %v2830_v62, inf  ;;  %vm1581_vm3 = vcmp.eq.f32.partialorder %v2830_v62, 0.0 }
 0x218   :  { %v2838_v2 = vadd.f32 %v1540_v1, %v1524_v63  ;;  %v2840_v4 = vpop.f32.mrb[70].mxu0 }
 0x219   :  { %v1525_v5 = vmul.f32 %v2840_v4, %v2840_v4  ;;  %v2844_v6 = vpop.f32.mrb[71].mxu0 }
 0x21a   :  { %v1541_v7 = vmul.f32 %v2844_v6, %v2844_v6  ;;  %2160 = vrsqrt.f32 %v2838_v2  ;;  %vm1586_vm4 = vcmp.eq.f32.partialorder %v2838_v2, inf  ;;  %vm1588_vm5 = vcmp.eq.f32.partialorder %v2838_v2, 0.0 }
 0x21c   :  { %v2848_v8 = vpop.f32.mrb[0].mxu1  ;;  %v2850_v9 = vadd.f32 %v1541_v7, %v1525_v5  ;;  %v2157_v39 = vpop.eup %2156 }
 0x21d   :  { %v1526_v10 = vmul.f32 %v2848_v8, %v2848_v8  ;;  %v2854_v11 = vpop.f32.mrb[1].mxu1  ;;  %v1571_v45 = vmul.f32 %v2157_v39, %v2818_v56 }
 0x21e   :  { %v1542_v12 = vmul.f32 %v2854_v11, %v2854_v11  ;;  %2162 = vrsqrt.f32 %v2850_v9  ;;  %vm1593_vm6 = vcmp.eq.f32.partialorder %v2850_v9, inf  ;;  %vm1595_vm7 = vcmp.eq.f32.partialorder %v2850_v9, 0.0 }
 0x21f   :  { %v1573_v63 = vsel %vm1572_vm0, %v2818_v56, %v1571_v45  ;;  %v1596_v45 = vand.u32 2147483648, %v2850_v9 }
 0x220   :  { %v2858_v13 = vadd.f32 %v1542_v12, %v1526_v10  ;;  %v2860_v14 = vpop.f32.mrb[2].mxu1  ;;  %v2159_v44 = vpop.eup %2158 }
 0x221   :  { %v1527_v15 = vmul.f32 %v2860_v14, %v2860_v14  ;;  %v2864_v16 = vpop.f32.mrb[3].mxu1  ;;  %v1578_v53 = vmul.f32 %v2159_v44, %v2830_v62 }
 0x222   :  { %v1543_v17 = vmul.f32 %v2864_v16, %v2864_v16  ;;  %2164 = vrsqrt.f32 %v2858_v13  ;;  %vm1600_vm8 = vcmp.eq.f32.partialorder %v2858_v13, inf  ;;  %vm1602_vm9 = vcmp.eq.f32.partialorder %v2858_v13, 0.0 }
 0x224   :  { %v2868_v18 = vpop.f32.mrb[4].mxu1  ;;  %v2870_v19 = vadd.f32 %v1543_v17, %v1527_v15  ;;  %v2161_v48 = vpop.eup %2160  ;;  %v1580_v17 = vsel %vm1579_vm2, %v2830_v62, %v1578_v53 }
 0x225   :  { %4844 = vst [vmem:[#allocation2_spill] sm:$0xff] %v2868_v18  ;;  %v1528_v20 = vmul.f32 %v2868_v18, %v2868_v18  ;;  %v2874_v21 = vpop.f32.mrb[5].mxu1  ;;  %v1585_v1 = vmul.f32 %v2161_v48, %v2838_v2 }
 0x226   :  { %4845 = vst [vmem:[#allocation3_spill] sm:$0xff] %v2874_v21  ;;  %v1544_v22 = vmul.f32 %v2874_v21, %v2874_v21  ;;  %2166 = vrsqrt.f32 %v2870_v19  ;;  %vm1607_vm10 = vcmp.eq.f32.partialorder %v2870_v19, inf  ;;  %vm1609_vm11 = vcmp.eq.f32.partialorder %v2870_v19, 0.0 }
 0x228   :  { %v2878_v23 = vadd.f32 %v1544_v22, %v1528_v20  ;;  %v2880_v24 = vpop.f32.mrb[6].mxu1  ;;  %v2163_v51 = vpop.eup %2162  ;;  %v1582_v20 = vand.u32 2147483648, %v2830_v62 }
 0x229   :  { %4846 = vst [vmem:[#allocation4_spill] sm:$0xff] %v2880_v24  ;;  %v1529_v25 = vmul.f32 %v2880_v24, %v2880_v24  ;;  %v2884_v26 = vpop.f32.mrb[7].mxu1  ;;  %v1592_v7 = vmul.f32 %v2163_v51, %v2850_v9 }
 0x22a   :  { %4847 = vst [vmem:[#allocation5_spill] sm:$0xff] %v2884_v26  ;;  %v1545_v27 = vmul.f32 %v2884_v26, %v2884_v26  ;;  %2168 = vrsqrt.f32 %v2878_v23  ;;  %vm1614_vm12 = vcmp.eq.f32.partialorder %v2878_v23, inf  ;;  %vm1616_vm13 = vcmp.eq.f32.partialorder %v2878_v23, 0.0 }
 0x22b   :  { %v1594_v56 = vsel %vm1593_vm6, %v2850_v9, %v1592_v7 }
 0x22c   :  { %v2889_v28 = vpop.f32.mrb[8].mxu1  ;;  %v2892_v29 = vadd.f32 %v1545_v27, %v1529_v25  ;;  %v2165_v60 = vpop.eup %2164  ;;  %v1576_v25 = vsel %vm1574_vm1, %v1575_v55, %v1573_v63  ;;  %v1597_v55 = vsel %vm1595_vm7, %v1596_v45, %v1594_v56 }
 0x22d   :  { %4848 = vst [vmem:[#allocation6_spill] sm:$0xff] %v2889_v28  ;;  %v1530_v30 = vmul.f32 %v2889_v28, %v2889_v28  ;;  %v2896_v31 = vpop.f32.mrb[9].mxu1  ;;  %v1599_v27 = vmul.f32 %v2165_v60, %v2858_v13  ;;  %v1842_v44 = vadd.f32 1.0, %v1576_v25  ;;  %v1845_v25 = vadd.f32 1.0, %v1597_v55 }
 0x22e   :  { %4849 = vst [vmem:[#allocation7_spill] sm:$0xff] %v2896_v31  ;;  %v1546_v32 = vmul.f32 %v2896_v31, %v2896_v31  ;;  %2170 = vrsqrt.f32 %v2892_v29  ;;  %vm1621_vm14 = vcmp.eq.f32.partialorder %v2892_v29, inf  ;;  %vm1623_vm15 = vcmp.eq.f32.partialorder %v2892_v29, 0.0 }
 0x22f   :  { %v3022_v55 = vadd.f32 1e-08, %v1845_v25  ;;  %v4893_v31 = vmov 0 }
 0x230   :  { %v2902_v33 = vadd.f32 %v1546_v32, %v1530_v30  ;;  %v2904_v34 = vpop.f32.mrb[10].mxu1  ;;  %v1587_v30 = vsel %vm1586_vm4, %v2838_v2, %v1585_v1  ;;  %v1589_v32 = vand.u32 2147483648, %v2838_v2 }
 0x231   :  { %4850 = vst [vmem:[#allocation8_spill] sm:$0xff] %v2904_v34  ;;  %v1531_v35 = vmul.f32 %v2904_v34, %v2904_v34  ;;  %v2908_v36 = vpop.f32.mrb[11].mxu1 }
 0x232   :  { %4851 = vst [vmem:[#allocation9_spill] sm:$0xff] %v2908_v36  ;;  %v1547_v37 = vmul.f32 %v2908_v36, %v2908_v36  ;;  %2172 = vrsqrt.f32 %v2902_v33  ;;  %v1590_v48 = vsel %vm1588_vm5, %v1589_v32, %v1587_v30  ;;  %v1610_v30 = vand.u32 2147483648, %v2870_v19 }
 0x233   :  { %vm1628_vm0 = vcmp.eq.f32.partialorder %v2902_v33, inf  ;;  %vm1630_vm1 = vcmp.eq.f32.partialorder %v2902_v33, 0.0 }
 0x234   :  { %v2913_v38 = vpop.f32.mrb[12].mxu1  ;;  %v2915_v40 = vadd.f32 %v1547_v37, %v1531_v35  ;;  %v1583_v37 = vsel %vm1581_vm3, %v1582_v20, %v1580_v17 }
 0x235   :  { %4852 = vst [vmem:[#allocation10_spill] sm:$0xff] %v2913_v38  ;;  %v1532_v41 = vmul.f32 %v2913_v38, %v2913_v38  ;;  %v2919_v42 = vpop.f32.mrb[13].mxu1  ;;  %v1843_v53 = vadd.f32 1.0, %v1583_v37 }
 0x236   :  { %4853 = vst [vmem:[#allocation11_spill] sm:$0xff] %v2919_v42  ;;  %v1548_v43 = vmul.f32 %v2919_v42, %v2919_v42  ;;  %2174 = vrsqrt.f32 %v2915_v40  ;;  %vm1635_vm2 = vcmp.eq.f32.partialorder %v2915_v40, inf  ;;  %vm1637_vm3 = vcmp.eq.f32.partialorder %v2915_v40, 0.0 }
 0x238   :  { %v2925_v46 = vadd.f32 %v1548_v43, %v1532_v41  ;;  %v2927_v47 = vpop.f32.mrb[14].mxu1  ;;  %v2167_v43 = vpop.eup %2166 }
 0x239   :  { %4854 = vst [vmem:[#allocation12_spill] sm:$0xff] %v2927_v47  ;;  %v1533_v49 = vmul.f32 %v2927_v47, %v2927_v47  ;;  %v2931_v50 = vpop.f32.mrb[15].mxu1  ;;  %v1606_v9 = vmul.f32 %v2167_v43, %v2870_v19  ;;  %v2169_v7 = vpop.eup %2168 }
 0x23a   :  { %4855 = vst [vmem:[#allocation13_spill] sm:$0xff] %v2931_v50  ;;  %v1549_v58 = vmul.f32 %v2931_v50, %v2931_v50  ;;  %2176 = vrsqrt.f32 %v2925_v46  ;;  %v1613_v43 = vmul.f32 %v2169_v7, %v2878_v23  ;;  %vm1642_vm4 = vcmp.eq.f32.partialorder %v2925_v46, inf }
 0x23c   :  { %v2943_v5 = vpop.f32.mrb[16].mxu1  ;;  %v2947_v10 = vadd.f32 %v1549_v58, %v1533_v49  ;;  %v1601_v49 = vsel %vm1600_vm8, %v2858_v13, %v1599_v27  ;;  %v1603_v58 = vand.u32 2147483648, %v2858_v13  ;;  %v2171_v13 = vpop.eup %2170  ;;  %v3003_v27 = vadd.f32 1e-08, %v1843_v53 }
 0x23d   :  { %4856 = vst [vmem:[#allocation14_spill] sm:$0xff] %v2943_v5  ;;  %v1534_v12 = vmul.f32 %v2943_v5, %v2943_v5  ;;  %v2951_v15 = vpop.f32.mrb[17].mxu1  ;;  %v2173_v53 = vpop.eup %2172 }
 0x23e   :  { %4857 = vst [vmem:[#allocation15_spill] sm:$0xff] %v2951_v15  ;;  %v1550_v22 = vmul.f32 %v2951_v15, %v2951_v15  ;;  %v1604_v17 = vsel %vm1602_vm9, %v1603_v58, %v1601_v49  ;;  %v1617_v49 = vand.u32 2147483648, %v2878_v23  ;;  %2178 = vrsqrt.f32 %v2947_v10 }
 0x23f   :  { %v1846_v56 = vadd.f32 1.0, %v1604_v17  ;;  %v4886_v42 = vand.u32 2147483648, %v2947_v10 }
 0x240   :  { %v2966_v35 = vadd.f32 %v1550_v22, %v1534_v12  ;;  %v2968_v62 = vpop.f32.mrb[18].mxu1  ;;  %v1844_v12 = vadd.f32 1.0, %v1590_v48  ;;  %v2999_v22 = vadd.f32 1e-08, %v1842_v44 }
 0x241   :  { %4858 = vst [vmem:[#allocation16_spill] sm:$0xff] %v2968_v62  ;;  %v1535_v39 = vmul.f32 %v2968_v62, %v2968_v62  ;;  %v2974_v41 = vpop.f32.mrb[19].mxu1  ;;  %v3033_v17 = vadd.f32 1e-08, %v1846_v56 }
 0x242   :  { %4859 = vst [vmem:[#allocation17_spill] sm:$0xff] %v2974_v41  ;;  %v1551_v51 = vmul.f32 %v2974_v41, %v2974_v41  ;;  %v3017_v48 = vadd.f32 1e-08, %v1844_v12  ;;  %v2175_v12 = vpop.eup %2174 }
 0x243   :  { %4866 = vst [vmem:[#allocation24_spill] sm:$0xff] %v3033_v17  ;;  %v4906_v17 = vmov 0.7853982  }
 0x244   :  { %v2987_v60 = vpop.f32.mrb[20].mxu1  ;;  %v2991_v2 = vadd.f32 %v1551_v51, %v1535_v39  ;;  %v1608_v39 = vsel %vm1607_vm10, %v2870_v19, %v1606_v9  ;;  %v1620_v51 = vmul.f32 %v2171_v13, %v2892_v29  ;;  %vm1644_vm10 = vcmp.eq.f32.partialorder %v2925_v46, 0.0 }
 0x245   :  { %4860 = vst [vmem:[#allocation18_spill] sm:$0xff] %v2987_v60  ;;  %v1536_v63 = vmul.f32 %v2987_v60, %v2987_v60  ;;  %v2995_v1 = vpop.f32.mrb[21].mxu1  ;;  %v1611_v9 = vsel %vm1609_vm11, %v1610_v30, %v1608_v39  ;;  %v1627_v39 = vmul.f32 %v2173_v53, %v2902_v33 }
 0x246   :  { %4861 = vst [vmem:[#allocation19_spill] sm:$0xff] %v2991_v2  ;;  %4862 = vst [vmem:[#allocation20_spill] sm:$0xff] %v2995_v1  ;;  %v1552_v20 = vmul.f32 %v2995_v1, %v2995_v1  ;;  %v1622_v30 = vsel %vm1621_vm14, %v2892_v29, %v1620_v51  ;;  %v1847_v56 = vadd.f32 1.0, %v1611_v9  ;;  %v1631_v1 = vand.u32 2147483648, %v2902_v33 }
 0x247   :  { %vm1651_vm14 = vcmp.eq.f32.partialorder %v2947_v10, 0.0 }
 0x248   :  { %v3007_v32 = vadd.f32 %v1552_v20, %v1536_v63  ;;  %v3009_v37 = vpop.f32.mrb[22].mxu1  ;;  %v1624_v63 = vand.u32 2147483648, %v2892_v29  ;;  %v1615_v20 = vsel %vm1614_vm12, %v2878_v23, %v1613_v43  ;;  %v1629_v23 = vsel %vm1628_vm0, %v2902_v33, %v1627_v39 }
 0x249   :  { %4864 = vst [vmem:[#allocation22_spill] sm:$0xff] %v3009_v37  ;;  %v1537_v44 = vmul.f32 %v3009_v37, %v3009_v37  ;;  %v3015_v45 = vpop.f32.mrb[23].mxu1  ;;  %v2177_v37 = vpop.eup %2176  ;;  %v1618_v43 = vsel %vm1616_vm13, %v1617_v49, %v1615_v20  ;;  %vm1649_vm13 = vcmp.eq.f32.partialorder %v2947_v10, inf }
 0x24a   :  { %4863 = vst [vmem:[#allocation21_spill] sm:$0xff] %v3007_v32  ;;  %4865 = vst [vmem:[#allocation23_spill] sm:$0xff] %v3015_v45  ;;  %v1553_v58 = vmul.f32 %v3015_v45, %v3015_v45  ;;  %v1641_v49 = vmul.f32 %v2177_v37, %v2925_v46  ;;  %v1848_v29 = vadd.f32 1.0, %v1618_v43 }
 0x24c   :  { %v563_v7 = vpop.f32.mrb[24].mxu1  ;;  %v3038_v13 = vadd.f32 %v1553_v58, %v1537_v44  ;;  %v1634_v44 = vmul.f32 %v2175_v12, %v2915_v40 }
 0x24d   :  { %v658_v25 = vmul.f32 %v563_v7, %v2810_v52  ;;  %v565_v19 = vpop.f32.mrb[25].mxu1  ;;  %v706_v3 = vmul.f32 %v563_v7, %v2814_v54  ;;  %v1682_v51 = vmul.f32 %v563_v7, %v563_v7  ;;  %v3065_v7 = vadd.f32 1e-08, %v1847_v56 }
 0x24e   :  { %4867 = vst [vmem:[#allocation25_spill] sm:$0xff] %v3038_v13  ;;  %v674_v45 = vmul.f32 %v565_v19, %v2814_v54  ;;  %v1625_v54 = vsel %vm1623_vm15, %v1624_v63, %v1622_v30  ;;  %v722_v9 = vmul.f32 %v565_v19, %v2810_v52  ;;  %v1698_v13 = vmul.f32 %v565_v19, %v565_v19 }
 0x24f   :  { %4868 = vst [vmem:[#allocation26_spill] sm:$0xff] %v3065_v7  ;;  %v1638_v52 = vand.u32 2147483648, %v2915_v40  ;;  %v1636_v12 = vsel %vm1635_vm2, %v2915_v40, %v1634_v44  ;;  %v1632_v19 = vsel %vm1630_vm1, %v1631_v1, %v1629_v23  ;;  %v1643_v56 = vsel %vm1642_vm4, %v2925_v46, %v1641_v49 }
 0x250   :  { %v3051_v58 = vadd.f32 %v674_v45, %v658_v25  ;;  %v569_v53 = vpop.f32.mrb[26].mxu1  ;;  %v3068_v63 = vsub.f32 %v706_v3, %v722_v9  ;;  %v3076_v37 = vadd.f32 %v1698_v13, %v1682_v51  ;;  %v1849_v25 = vadd.f32 1.0, %v1625_v54 }
 0x251   :  { %v659_v60 = vmul.f32 %v569_v53, %v2820_v57  ;;  %v571_v41 = vpop.f32.mrb[27].mxu1  ;;  %v1645_v3 = vand.u32 2147483648, %v2925_v46  ;;  %v1639_v33 = vsel %vm1637_vm3, %v1638_v52, %v1636_v12  ;;  %v3108_v44 = vadd.f32 1e-08, %v1848_v29 }
 0x252   :  { %v3063_v45 = vand.u32 2147483647, %v3051_v58  ;;  %vm788_vm5 = vcmp.ne.f32.partialorder %v3051_v58, %v3051_v58  ;;  %v3084_v30 = vand.u32 2147483647, %v3068_v63  ;;  %vm789_vm6 = vcmp.ne.f32.partialorder %v3068_v63, %v3068_v63 }
 0x253   :  { %2180 = vrsqrt.f32 %v3076_v37  ;;  %vm3104_vm9 = vmor %vm788_vm5, %vm789_vm6  ;;  %4871 = vst [vmem:[#allocation27_spill] sm:$0xff] %v3108_v44  ;;  %v3114_v51 = vadd.f32 1e-08, %v1849_v25  ;;  %v1850_v54 = vadd.f32 1.0, %v1632_v19  ;;  %v1646_v9 = vsel %vm1644_vm10, %v1645_v3, %v1643_v56 }
 0x254   :  { %v3078_v20 = vpop.f32.mrb[28].mxu1  ;;  %vm794_vm7 = vcmp.eq.s32.totalorder %v3063_v45, inf  ;;  %v757_v13 = vmax.f32 %v3063_v45, %v3084_v30  ;;  %vm778_vm8 = vcmp.gt.f32.partialorder %v3084_v30, %v3063_v45  ;;  %vm795_vm11 = vcmp.eq.s32.totalorder %v3084_v30, inf }
 0x255   :  { %v3086_v39 = vpop.f32.mrb[29].mxu1  ;;  %4872 = vst [vmem:[#allocation28_spill] sm:$0xff] %v3114_v51  ;;  %vm3118_vm12 = vmand %vm794_vm7, %vm795_vm11  ;;  %v1851_v29 = vadd.f32 1.0, %v1639_v33  ;;  %v707_v46 = vmul.f32 %v569_v53, %v2824_v59  ;;  %v1683_v52 = vmul.f32 %v569_v53, %v569_v53  ;;  %v675_v12 = vmul.f32 %v571_v41, %v2824_v59 }
 0x256   :  { %2182 = vrcp.f32 %v757_v13  ;;  %v723_v19 = vmul.f32 %v571_v41, %v2820_v57  ;;  %v1699_v3 = vmul.f32 %v571_v41, %v571_v41  ;;  %v660_v56 = vmul.f32 %v3078_v20, %v2828_v61  ;;  %v2179_v13 = vpop.eup %2178 }
 0x257   :  { %v1852_v1 = vadd.f32 1.0, %v1646_v9  ;;  %2184 = vrsqrt.f32 %v2966_v35  ;;  %v3132_v33 = vadd.f32 %v675_v12, %v659_v60  ;;  %v708_v62 = vmul.f32 %v3078_v20, %v2834_v0 }
 0x258   :  { %v3112_v40 = vpop.f32.mrb[30].mxu1  ;;  %v3138_v59 = vadd.f32 1e-08, %v1850_v54  ;;  %v3140_v25 = vsub.f32 %v707_v46, %v723_v19  ;;  %v3142_v57 = vadd.f32 %v1699_v3, %v1683_v52  ;;  %v676_v41 = vmul.f32 %v3086_v39, %v2834_v0 }
 0x259   :  { %v3122_v49 = vpop.f32.mrb[31].mxu1  ;;  %v3148_v9 = vadd.f32 1e-08, %v1851_v29  ;;  %2186 = vrsqrt.f32 %v2991_v2  ;;  %v3153_v12 = vand.u32 2147483647, %v3132_v33  ;;  %v1648_v54 = vmul.f32 %v2179_v13, %v2947_v10 }
 0x25a   :  { %4875 = vst [vmem:[#allocation29_spill] sm:$0xff] %v3138_v59  ;;  %v3159_v52 = vand.u32 2147483647, %v3140_v25  ;;  %vm835_vm15 = vcmp.ne.f32.partialorder %v3132_v33, %v3132_v33  ;;  %v3163_v29 = vadd.f32 1e-08, %v1852_v1  ;;  %2188 = vrsqrt.f32 %v3007_v32 }
 0x25b   :  { %4876 = vst [vmem:[#allocation30_spill] sm:$0xff] %v3148_v9  ;;  %vm836_vm0 = vcmp.ne.f32.partialorder %v3140_v25, %v3140_v25  ;;  %vm841_vm1 = vcmp.eq.s32.totalorder %v3153_v12, inf  ;;  %vm1732_vm4 = vcmp.eq.f32.partialorder %v3076_v37, inf  ;;  %v1735_v32 = vand.u32 2147483648, %v3076_v37 }
 0x25c   :  { %v3136_v53 = vpop.f32.mrb[32].mxu1  ;;  %4877 = vst [vmem:[#allocation31_spill] sm:$0xff] %v3163_v29  ;;  %v804_v46 = vmax.f32 %v3153_v12, %v3159_v52  ;;  %vm3178_vm3 = vmor %vm835_vm15, %vm836_vm0  ;;  %vm842_vm5 = vcmp.eq.s32.totalorder %v3159_v52, inf  ;;  %2190 = vrsqrt.f32 %v3142_v57  ;;  %v1650_v13 = vsel %vm1649_vm13, %v2947_v10, %v1648_v54 }
 0x25d   :  { %v3146_v15 = vpop.f32.mrb[33].mxu1  ;;  %v2181_v0 = vpop.eup %2180  ;;  %vm1734_vm6 = vcmp.eq.f32.partialorder %v3076_v37, 0.0  ;;  %vm3195_vm7 = vmand %vm841_vm1, %vm842_vm5  ;;  %v4882_v5 = vmin.f32 %v3063_v45, %v3084_v30  ;;  %v3204_v59 = vadd.f32 %v676_v41, %v660_v56  ;;  %v724_v54 = vmul.f32 %v3086_v39, %v2828_v61 }
 0x25e   :  { %v1731_v3 = vmul.f32 %v2181_v0, %v3076_v37  ;;  %2192 = vrcp.f32 %v804_v46  ;;  %vm781_vm10 = vcmp.lt.f32.partialorder %v3051_v58, 0.0  ;;  %v661_v46 = vmul.f32 %v3112_v40, %v2840_v4 }
 0x25f   :  { %v709_v2 = vmul.f32 %v3112_v40, %v2844_v6  ;;  %vm784_vm11 = vcmp.lt.s32.totalorder %v3051_v58, 0  ;;  %v3224_v61 = vsub.f32 %v708_v62, %v724_v54  ;;  %v1684_v41 = vmul.f32 %v3078_v20, %v3078_v20 }
 0x260   :  { %v3169_v19 = vpop.f32.mrb[34].mxu1  ;;  %v2183_v0 = vpop.eup %2182  ;;  %v1733_v29 = vsel %vm1732_vm4, %v3076_v37, %v1731_v3  ;;  %vm882_vm13 = vcmp.ne.f32.partialorder %v3204_v59, %v3204_v59  ;;  %v1653_v62 = vsel %vm1651_vm14, %v4886_v42, %v1650_v13  ;;  %v4887_v20 = vmov 0.0  }
 0x261   :  { %v3182_v60 = vpop.f32.mrb[35].mxu1  ;;  %v3202_v50 = vmul.f32 %v2183_v0, %v4882_v5  ;;  %v1736_v47 = vsel %vm1734_vm6, %v1735_v32, %v1733_v29  ;;  %v3217_v5 = vpop.eup %2184  ;;  %v1700_v29 = vmul.f32 %v3086_v39, %v3086_v39  ;;  %vm883_vm15 = vcmp.ne.f32.partialorder %v3224_v61, %v3224_v61 }
 0x262   :  { %v1874_v37 = vadd.f32 1.0, %v1736_v47  ;;  %v3227_v47 = vand.u32 2147483647, %v3204_v59  ;;  %v3248_v38 = vsel %vm784_vm11, 3.1415927, %v4887_v20  ;;  %vm3255_vm0 = vmor %vm882_vm13, %vm883_vm15  ;;  %v1685_v7 = vmul.f32 %v3112_v40, %v3112_v40 }
 0x263   :  { %v3221_v32 = vmul.f32 %v3202_v50, %v3202_v50  ;;  %v3235_v0 = vpop.eup %2186  ;;  %v4804_v44 = vmov 0.7853982   ;;  %vm1739_vm6 = vcmp.eq.f32.partialorder %v3142_v57, inf  ;;  %vm1741_vm11 = vcmp.eq.f32.partialorder %v3142_v57, 0.0 }
 0x264   :  { %v3208_v3 = vpop.f32.mrb[36].mxu1  ;;  %v1890_v56 = vadd.f32 1e-08, %v1874_v37  ;;  %4885 = vst [vmem:[#allocation34_spill] sm:$0xff] %v3235_v0  ;;  %v3243_v37 = vand.u32 2147483647, %v3224_v61  ;;  %v3262_v13 = vpop.eup %2188  ;;  %v3313_v24 = vmul.f32 %v3136_v53, %v2848_v8  ;;  %v726_v21 = vmul.f32 %v3146_v15, %v2848_v8 }
 0x265   :  { %4883 = vst [vmem:[#allocation32_spill] sm:$0xff] %v3208_v3  ;;  %v3215_v51 = vpop.f32.mrb[37].mxu1  ;;  %v761_v54 = vmul.f32 0.002785687, %v3221_v32  ;;  %v3253_v39 = vsel %vm781_vm10, 2.3561945, %v4804_v44  ;;  %v3273_v44 = vadd.f32 %v1700_v29, %v1684_v41  ;;  %v725_v41 = vmul.f32 %v3122_v49, %v2840_v4 }
 0x266   :  { %4884 = vst [vmem:[#allocation33_spill] sm:$0xff] %v3215_v51  ;;  %2194 = vrcp.f32 %v1890_v56  ;;  %vm888_vm14 = vcmp.eq.s32.totalorder %v3227_v47, inf  ;;  %4891 = vst [vmem:[#allocation36_spill] sm:$0xff] %v3262_v13  ;;  %v851_v34 = vmax.f32 %v3227_v47, %v3243_v37  ;;  %vm889_vm4 = vcmp.eq.s32.totalorder %v3243_v37, inf  ;;  %v2191_v13 = vpop.eup %2190 }
 0x267   :  { %v762_v0 = vadd.f32 -0.015866, %v761_v54  ;;  %v677_v54 = vmul.f32 %v3122_v49, %v2844_v6  ;;  %vm3282_vm5 = vmand %vm888_vm14, %vm889_vm4  ;;  %v1701_v29 = vmul.f32 %v3122_v49, %v3122_v49  ;;  %v1738_v6 = vmul.f32 %v2191_v13, %v3142_v57 }
 0x268   :  { %v3260_v10 = vpop.f32.mrb[38].mxu1  ;;  %2196 = vrcp.f32 %v851_v34  ;;  %v4894_v31 = vsel %vm3282_vm5, 4294967295, %v4893_v31  ;;  %v2193_v28 = vpop.eup %2192  ;;  %v4898_v4 = vmin.f32 %v3153_v12, %v3159_v52  ;;  %v1742_v49 = vand.u32 2147483648, %v3142_v57 }
 0x269   :  { %4890 = vst [vmem:[#allocation35_spill] sm:$0xff] %v3260_v10  ;;  %v3270_v56 = vpop.f32.mrb[39].mxu1  ;;  %v763_v36 = vmul.f32 %v762_v0, %v3221_v32  ;;  %4895 = vst [vmem:[#allocation38_spill] sm:$0xff] %v4894_v31  ;;  %2198 = vrsqrt.f32 %v3273_v44  ;;  %v1740_v13 = vsel %vm1739_vm6, %v3142_v57, %v1738_v6  ;;  %v3307_v26 = vsub.f32 %v709_v2, %v725_v41 }
 0x26a   :  { %4892 = vst [vmem:[#allocation37_spill] sm:$0xff] %v3270_v56  ;;  %v3301_v56 = vmul.f32 %v2193_v28, %v4898_v4  ;;  %v3309_v10 = vadd.f32 %v1701_v29, %v1685_v7  ;;  %v1743_v4 = vsel %vm1741_vm11, %v1742_v49, %v1740_v13  ;;  %v3325_v2 = vadd.f32 1.0, %v1653_v62 }
 0x26b   :  { %v764_v0 = vadd.f32 0.04247222, %v763_v36  ;;  %4900 = vst [vmem:[#allocation42_spill] sm:$0xff] %v3307_v26  ;;  %vm4820_vm13 = vcmp.lt.f32.partialorder %v3132_v33, 0.0  ;;  %v1875_v7 = vadd.f32 1.0, %v1743_v4  ;;  %vm831_vm15 = vcmp.lt.s32.totalorder %v3132_v33, 0 }
 0x26c   :  { %v3290_v40 = vpop.f32.mrb[40].mxu1  ;;  %v3318_v28 = vmul.f32 %v3301_v56, %v3301_v56  ;;  %4902 = vst [vmem:[#allocation44_spill] sm:$0xff] %v3325_v2  ;;  %v3329_v57 = vand.u32 2147483647, %v3307_v26  ;;  %vm930_vm6 = vcmp.ne.f32.partialorder %v3307_v26, %v3307_v26  ;;  %vm1746_vm1 = vcmp.eq.f32.partialorder %v3273_v44, inf }
 0x26d   :  { %4896 = vst [vmem:[#allocation39_spill] sm:$0xff] %v3290_v40  ;;  %v3296_v34 = vpop.f32.mrb[41].mxu1  ;;  %v3304_v40 = vadd.f32 %v677_v54, %v661_v46  ;;  %v765_v36 = vmul.f32 %v764_v0, %v3221_v32  ;;  %v1891_v49 = vadd.f32 1e-08, %v1875_v7  ;;  %v3349_v7 = vsel %vm831_vm15, 3.1415927, %v4887_v20 }
 0x26e   :  { %4897 = vst [vmem:[#allocation40_spill] sm:$0xff] %v3296_v34  ;;  %v808_v6 = vmul.f32 0.002785687, %v3318_v28  ;;  %vm936_vm4 = vcmp.eq.s32.totalorder %v3329_v57, inf  ;;  %v678_v51 = vmul.f32 %v3146_v15, %v2854_v11 }
 0x26f   :  { %4899 = vst [vmem:[#allocation41_spill] sm:$0xff] %v3304_v40  ;;  %v3321_v46 = vand.u32 2147483647, %v3304_v40  ;;  %v766_v29 = vadd.f32 -0.074975304, %v765_v36  ;;  %vm929_vm14 = vcmp.ne.f32.partialorder %v3304_v40, %v3304_v40  ;;  %2200 = vrcp.f32 %v1891_v49 }
 0x270   :  { %v3323_v54 = vpop.f32.mrb[42].mxu1  ;;  %v2195_v0 = vpop.eup %2194  ;;  %vm3365_vm15 = vmor %vm929_vm14, %vm930_vm6  ;;  %v4910_v49 = vmin.f32 %v3227_v47, %v3243_v37  ;;  %vm875_vm14 = vcmp.lt.f32.partialorder %v3204_v59, 0.0 }
 0x271   :  { %4901 = vst [vmem:[#allocation43_spill] sm:$0xff] %v3323_v54  ;;  %v3331_v41 = vpop.f32.mrb[43].mxu1  ;;  %v898_v13 = vmax.f32 %v3321_v46, %v3329_v57  ;;  %v767_v36 = vmul.f32 %v766_v29, %v3221_v32  ;;  %v809_v54 = vadd.f32 -0.015866, %v808_v6  ;;  %vm935_vm11 = vcmp.eq.s32.totalorder %v3321_v46, inf }
 0x272   :  { %4903 = vst [vmem:[#allocation45_spill] sm:$0xff] %v3331_v41  ;;  %v1922_v41 = vmul.f32 %v2195_v0, %v2999_v22  ;;  %v2197_v34 = vpop.eup %2196  ;;  %v3360_v22 = vsel %vm4820_vm13, 2.3561945, %v4906_v17  ;;  %v4907_v6 = vmov 0  ;;  %vm1748_vm13 = vcmp.eq.f32.partialorder %v3273_v44, 0.0  ;;  %vm3377_vm2 = vmand %vm935_vm11, %vm936_vm4 }
 0x273   :  { %v768_v29 = vadd.f32 0.1064488, %v767_v36  ;;  %v810_v4 = vmul.f32 %v809_v54, %v3318_v28  ;;  %v4908_v6 = vsel %vm3365_vm15, 4294967295, %v4907_v6  ;;  %v2199_v0 = vpop.eup %2198  ;;  %v3373_v36 = vmul.f32 %v2197_v34, %v4910_v49 }
 0x274   :  { %v3346_v2 = vpop.f32.mrb[44].mxu1  ;;  %4909 = vst [vmem:[#allocation48_spill] sm:$0xff] %v4908_v6  ;;  %2202 = vrcp.f32 %v898_v13  ;;  %v4911_v54 = vmov 0  ;;  %v1745_v6 = vmul.f32 %v2199_v0, %v3273_v44  ;;  %v1749_v49 = vand.u32 2147483648, %v3273_v44 }
 0x275   :  { %4904 = vst [vmem:[#allocation46_spill] sm:$0xff] %v3346_v2  ;;  %v3354_v62 = vpop.f32.mrb[45].mxu1  ;;  %v4912_v54 = vsel %vm3377_vm2, 4294967295, %v4911_v54  ;;  %v811_v2 = vadd.f32 0.04247222, %v810_v4  ;;  %2204 = vrsqrt.f32 %v3309_v10  ;;  %v3386_v34 = vmul.f32 %v3373_v36, %v3373_v36 }
 0x276   :  { %4905 = vst [vmem:[#allocation47_spill] sm:$0xff] %v3354_v62  ;;  %4913 = vst [vmem:[#allocation49_spill] sm:$0xff] %v4912_v54  ;;  %v769_v62 = vmul.f32 %v768_v29, %v3221_v32  ;;  %2206 = vlog2.f32 %v1922_v41  ;;  %v710_v13 = vmul.f32 %v3136_v53, %v2854_v11  ;;  %v1747_v29 = vsel %vm1746_vm1, %v3273_v44, %v1745_v6 }
 0x277   :  { %v812_v54 = vmul.f32 %v811_v2, %v3318_v28  ;;  %v1686_v4 = vmul.f32 %v3136_v53, %v3136_v53  ;;  %v855_v0 = vmul.f32 0.002785687, %v3386_v34  ;;  %v1750_v41 = vsel %vm1748_vm13, %v1749_v49, %v1747_v29 }
 0x278   :  { %v770_v26 = vadd.f32 -0.14207031, %v769_v62  ;;  %v1876_v2 = vadd.f32 1.0, %v1750_v41  ;;  %v1702_v6 = vmul.f32 %v3146_v15, %v3146_v15  ;;  %v3406_v53 = vadd.f32 %v678_v51, %v3313_v24  ;;  %v3425_v51 = vpop.f32.mrb[46].mxu1 }
 0x279   :  { %v813_v3 = vadd.f32 -0.074975304, %v812_v54  ;;  %v856_v18 = vadd.f32 -0.015866, %v855_v0  ;;  %v3408_v40 = vsub.f32 %v710_v13, %v726_v21  ;;  %v3412_v44 = vmul.f32 %v3169_v19, %v2860_v14  ;;  %v2201_v54 = vpop.eup %2200  ;;  %4914 = vst [vmem:[#allocation50_spill] sm:$0xff] %v3425_v51 }
 0x27a   :  { %v771_v62 = vmul.f32 %v770_v26, %v3221_v32  ;;  %v1892_v49 = vadd.f32 1e-08, %v1876_v2  ;;  %v3415_v26 = vadd.f32 %v1702_v6, %v1686_v4  ;;  %v3420_v24 = vand.u32 2147483647, %v3406_v53  ;;  %v3429_v4 = vpop.f32.mrb[47].mxu1 }
 0x27b   :  { %v814_v8 = vmul.f32 %v813_v3, %v3318_v28  ;;  %v857_v15 = vmul.f32 %v856_v18, %v3386_v34  ;;  %v3423_v21 = vand.u32 2147483647, %v3408_v40  ;;  %v1923_v3 = vmul.f32 %v2201_v54, %v3003_v27  ;;  %4915 = vst [vmem:[#allocation51_spill] sm:$0xff] %v3429_v4 }
 0x27c   :  { %v772_v11 = vadd.f32 0.19993454, %v771_v62  ;;  %2208 = vrcp.f32 %v1892_v49  ;;  %vm1753_vm1 = vcmp.eq.f32.partialorder %v3309_v10, inf  ;;  %v4916_v27 = vmin.f32 %v3321_v46, %v3329_v57 }
 0x27d   :  { %v815_v0 = vadd.f32 0.1064488, %v814_v8  ;;  %v858_v62 = vadd.f32 0.04247222, %v857_v15  ;;  %v944_v18 = vmin.f32 %v3420_v24, %v3423_v21  ;;  %v945_v2 = vmax.f32 %v3420_v24, %v3423_v21 }
 0x27e   :  { %v773_v13 = vmul.f32 %v772_v11, %v3221_v32  ;;  %v2203_v41 = vpop.eup %2202  ;;  %2210 = vlog2.f32 %v1923_v3  ;;  %v1756_v4 = vand.u32 2147483648, %v3309_v10  ;;  %vm1755_vm4 = vcmp.eq.f32.partialorder %v3309_v10, 0.0 }
 0x27f   :  { %v2205_v6 = vpop.eup %2204  ;;  %v816_v11 = vmul.f32 %v815_v0, %v3318_v28  ;;  %v3440_v8 = vmul.f32 %v2203_v41, %v4916_v27  ;;  %v859_v54 = vmul.f32 %v858_v62, %v3386_v34  ;;  %2212 = vrcp.f32 %v945_v2 }
 0x280   :  { %v774_v29 = vadd.f32 -0.33333147, %v773_v13  ;;  %v2207_v49 = vpop.eup %2206  ;;  %v1752_v15 = vmul.f32 %v2205_v6, %v3309_v10  ;;  %vm878_vm11 = vcmp.lt.s32.totalorder %v3204_v59, 0  ;;  %vm976_vm13 = vcmp.ne.f32.partialorder %v3406_v53, %v3406_v53 }
 0x281   :  { %v817_v31 = vadd.f32 -0.14207031, %v816_v11  ;;  %v3448_v13 = vmul.f32 %v3440_v8, %v3440_v8  ;;  %v860_v0 = vadd.f32 -0.074975304, %v859_v54  ;;  %2214 = vrsqrt.f32 %v3415_v26 }
 0x282   :  { %v775_v51 = vmul.f32 %v774_v29, %v3221_v32  ;;  %v1754_v3 = vsel %vm1753_vm1, %v3309_v10, %v1752_v15  ;;  %vm977_vm1 = vcmp.ne.f32.partialorder %v3408_v40, %v3408_v40  ;;  %vm982_vm6 = vcmp.eq.s32.totalorder %v3420_v24, inf }
 0x283   :  { %v818_v32 = vmul.f32 %v817_v31, %v3318_v28  ;;  %v902_v29 = vmul.f32 0.002785687, %v3448_v13  ;;  %v1757_v62 = vsel %vm1755_vm4, %v1756_v4, %v1754_v3  ;;  %v861_v2 = vmul.f32 %v860_v0, %v3386_v34  ;;  %vm3468_vm4 = vmor %vm976_vm13, %vm977_vm1 }
 0x284   :  { %v776_v41 = vmul.f32 %v775_v51, %v3202_v50  ;;  %v1877_v6 = vadd.f32 1.0, %v1757_v62  ;;  %v1939_v31 = vmul.f32 0.6931472, %v2207_v49  ;;  %vm983_vm13 = vcmp.eq.s32.totalorder %v3423_v21, inf }
 0x285   :  { %v819_v10 = vadd.f32 0.19993454, %v818_v32  ;;  %v903_v27 = vadd.f32 -0.015866, %v902_v29  ;;  %v862_v51 = vadd.f32 0.1064488, %v861_v2  ;;  %vm3487_vm1 = vmand %vm982_vm6, %vm983_vm13 }
 0x286   :  { %v777_v11 = vadd.f32 %v776_v41, %v3202_v50  ;;  %v1893_v4 = vadd.f32 1e-08, %v1877_v6  ;;  %v2209_v15 = vpop.eup %2208  ;;  %v3485_v2 = vsel %vm875_vm14, 2.3561945, %v4906_v17  ;;  %v3495_v45 = vsel %vm878_vm11, 3.1415927, %v4887_v20 }
 0x287   :  { %v820_v3 = vmul.f32 %v819_v10, %v3318_v28  ;;  %v904_v50 = vmul.f32 %v903_v27, %v3448_v13  ;;  %v863_v41 = vmul.f32 %v862_v51, %v3386_v34  ;;  %v1924_v49 = vmul.f32 %v2209_v15, %v3017_v48  ;;  %v4957_v10 = vld [vmem:[#allocation7_spill] sm:$0xff] }
 0x288   :  { %v779_v0 = vsub.f32 1.5707964, %v777_v11  ;;  %2216 = vrcp.f32 %v1893_v4  ;;  %v2211_v32 = vpop.eup %2210  ;;  %vm1760_vm6 = vcmp.eq.f32.partialorder %v3415_v26, inf  ;;  %vm4924_vm11 = vcmp.lt.f32.partialorder %v3132_v33, 0.0 }
 0x289   :  { %v821_v62 = vadd.f32 -0.33333147, %v820_v3  ;;  %v905_v6 = vadd.f32 0.04247222, %v904_v50  ;;  %v2213_v48 = vpop.eup %2212  ;;  %v1941_v51 = vmul.f32 0.6931472, %v2211_v32  ;;  %2218 = vlog2.f32 %v1924_v49 }
 0x28a   :  { %v780_v29 = vsel %vm778_vm8, %v779_v0, %v777_v11  ;;  %v864_v4 = vadd.f32 -0.14207031, %v863_v41  ;;  %v3498_v11 = vmul.f32 %v2213_v48, %v944_v18  ;;  %v1970_v3 = vand.u32 2147483647, %v1939_v31  ;;  %v3511_v18 = vpop.f32.mrb[48].mxu1 }
 0x28b   :  { %v782_v27 = vsub.f32 3.1415927, %v780_v29  ;;  %v822_v15 = vmul.f32 %v821_v62, %v3318_v28  ;;  %v906_v30 = vmul.f32 %v905_v6, %v3448_v13  ;;  %v1971_v50 = vand.u32 2147483647, %v1941_v51  ;;  %v3517_v6 = vpop.f32.mrb[49].mxu1  ;;  %v2215_v43 = vpop.eup %2214 }
 0x28c   :  { %v865_v32 = vmul.f32 %v864_v4, %v3386_v34  ;;  %vm4921_vm8 = vcmp.eq.f32.partialorder %v3068_v63, 0.0  ;;  %v3509_v62 = vmul.f32 %v3498_v11, %v3498_v11  ;;  %v1759_v23 = vmul.f32 %v2215_v43, %v3415_v26 }
 0x28d   :  { %v783_v0 = vsel %vm781_vm10, %v782_v27, %v780_v29  ;;  %v823_v41 = vmul.f32 %v822_v15, %v3301_v56  ;;  %v907_v49 = vadd.f32 -0.074975304, %v906_v30  ;;  %vm833_vm10 = vcmp.eq.f32.partialorder %v3140_v25, 0.0 }
 0x28e   :  { %v787_v28 = vsel %vm4921_vm8, %v3248_v38, %v783_v0  ;;  %v2002_v31 = vadd.f32 %v1971_v50, %v1970_v3  ;;  %v866_v29 = vadd.f32 0.19993454, %v865_v32  ;;  %v949_v51 = vmul.f32 0.002785687, %v3509_v62 }
 0x28f   :  { %v791_v58 = vsel %vm3104_vm9, nan, %v787_v28  ;;  %v824_v48 = vadd.f32 %v823_v41, %v3301_v56  ;;  %v908_v27 = vmul.f32 %v907_v49, %v3448_v13  ;;  %vm1762_vm9 = vcmp.eq.f32.partialorder %v3415_v26, 0.0 }
 0x290   :  { %v797_v38 = vsel %vm3118_vm12, %v3253_v39, %v791_v58  ;;  %v867_v15 = vmul.f32 %v866_v29, %v3386_v34  ;;  %v711_v30 = vmul.f32 %v3169_v19, %v2864_v16  ;;  %v950_v50 = vadd.f32 -0.015866, %v949_v51 }
 0x291   :  { %v798_v4 = vand.u32 2147483647, %v797_v38  ;;  %v826_v0 = vsub.f32 1.5707964, %v824_v48  ;;  %v909_v3 = vadd.f32 0.1064488, %v908_v27  ;;  %v679_v41 = vmul.f32 %v3182_v60, %v2864_v16 }
 0x292   :  { %v2217_v39 = vpop.eup %2216  ;;  %v4922_v56 = vand.u32 2147483648, %v3068_v63  ;;  %v868_v28 = vadd.f32 -0.33333147, %v867_v15  ;;  %v727_v49 = vmul.f32 %v3182_v60, %v2860_v14  ;;  %vm4923_vm12 = vcmp.gt.f32.partialorder %v3159_v52, %v3153_v12 }
 0x293   :  { %v827_v58 = vsel %vm4923_vm12, %v826_v0, %v824_v48  ;;  %v910_v29 = vmul.f32 %v909_v3, %v3448_v13  ;;  %v1925_v38 = vmul.f32 %v2217_v39, %v3022_v55  ;;  %v951_v27 = vmul.f32 %v950_v50, %v3509_v62  ;;  %v2219_v51 = vpop.eup %2218 }
 0x294   :  { %v800_v32 = vor.u32 %v4922_v56, %v798_v4  ;;  %v829_v63 = vsub.f32 3.1415927, %v827_v58  ;;  %v869_v43 = vmul.f32 %v868_v28, %v3386_v34  ;;  %v1761_v16 = vsel %vm1760_vm6, %v3415_v26, %v1759_v23 }
 0x295   :  { %v1763_v14 = vand.u32 2147483648, %v3415_v26  ;;  %v1943_v4 = vmul.f32 0.6931472, %v2219_v51  ;;  %v911_v15 = vadd.f32 -0.14207031, %v910_v29  ;;  %2220 = vlog2.f32 %v1925_v38 }
 0x296   :  { %v952_v12 = vadd.f32 0.04247222, %v951_v27  ;;  %v830_v52 = vsel %vm4924_vm11, %v829_v63, %v827_v58  ;;  %v870_v55 = vmul.f32 %v869_v43, %v3373_v36  ;;  %v3553_v34 = vadd.f32 %v679_v41, %v3412_v44 }
 0x297   :  { %v1764_v48 = vsel %vm1762_vm9, %v1763_v14, %v1761_v16  ;;  %v834_v0 = vsel %vm833_vm10, %v3349_v7, %v830_v52  ;;  %v1972_v3 = vand.u32 2147483647, %v1943_v4  ;;  %v912_v50 = vmul.f32 %v911_v15, %v3448_v13 }
 0x298   :  { %v953_v23 = vmul.f32 %v952_v12, %v3509_v62  ;;  %v838_v33 = vsel %vm3178_vm3, nan, %v834_v0  ;;  %v871_v39 = vadd.f32 %v870_v55, %v3373_v36  ;;  %v1878_v56 = vadd.f32 1.0, %v1764_v48 }
 0x299   :  { %v3563_v26 = vsub.f32 %v711_v30, %v727_v49  ;;  %v844_v44 = vsel %vm3195_vm7, %v3360_v22, %v838_v33  ;;  %v2003_v28 = vadd.f32 %v2002_v31, %v1972_v3  ;;  %v913_v41 = vadd.f32 0.19993454, %v912_v50  ;;  %v4942_v50 = vld [vmem:[#allocation4_spill] sm:$0xff] }
 0x29a   :  { %v954_v7 = vadd.f32 -0.074975304, %v953_v23  ;;  %v3570_v58 = vmul.f32 %v3217_v5, %v2966_v35  ;;  %v845_v29 = vand.u32 2147483647, %v844_v44  ;;  %v873_v38 = vsub.f32 1.5707964, %v871_v39 }
 0x29b   :  { %v1894_v1 = vadd.f32 1e-08, %v1878_v56  ;;  %v914_v27 = vmul.f32 %v913_v41, %v3448_v13  ;;  %v3575_v30 = vand.u32 2147483647, %v3553_v34  ;;  %v3578_v9 = vand.u32 2147483647, %v3563_v26 }
 0x29c   :  { %v955_v36 = vmul.f32 %v954_v7, %v3509_v62  ;;  %v4925_v22 = vand.u32 2147483648, %v3140_v25  ;;  %vm4926_vm3 = vcmp.gt.f32.partialorder %v3243_v37, %v3227_v47  ;;  %vm880_vm7 = vcmp.eq.f32.partialorder %v3224_v61, 0.0  ;;  %v3592_v25 = vpop.f32.mrb[50].mxu1 }
 0x29d   :  { %v874_v5 = vsel %vm4926_vm3, %v873_v38, %v871_v39  ;;  %2222 = vrcp.f32 %v1894_v1  ;;  %v915_v51 = vadd.f32 -0.33333147, %v914_v27  ;;  %v991_v43 = vmin.f32 %v3575_v30, %v3578_v9  ;;  %4927 = vst [vmem:[#allocation52_spill] sm:$0xff] %v3592_v25  ;;  %v4935_v38 = vld [vmem:[#allocation2_spill] sm:$0xff]  ;;  %v4936_v1 = vld [vmem:[#allocation32_spill] sm:$0xff] }
 0x29e   :  { %v847_v31 = vor.u32 %v4925_v22, %v845_v29  ;;  %v876_v49 = vsub.f32 3.1415927, %v874_v5  ;;  %v956_v63 = vadd.f32 0.1064488, %v955_v36  ;;  %v1506_v16 = vand.u32 2147483647, %v800_v32 }
 0x29f   :  { %v992_v4 = vmax.f32 %v3575_v30, %v3578_v9  ;;  %vm1013_vm13 = vcmp.gt.f32.partialorder %v3578_v9, %v3575_v30  ;;  %v2221_v47 = vpop.eup %2220  ;;  %v916_v15 = vmul.f32 %v915_v51, %v3448_v13  ;;  %vm1023_vm8 = vcmp.ne.f32.partialorder %v3553_v34, %v3553_v34  ;;  %v3600_v32 = vpop.f32.mrb[51].mxu1  ;;  %v4937_v22 = vld [vmem:[#allocation3_spill] sm:$0xff] }
 0x2a0   :  { %v1507_v14 = vand.u32 2147483647, %v847_v31  ;;  %v877_v37 = vsel %vm875_vm14, %v876_v49, %v874_v5  ;;  %v957_v12 = vmul.f32 %v956_v63, %v3509_v62  ;;  %4928 = vst [vmem:[#allocation53_spill] sm:$0xff] %v3600_v32  ;;  %v1945_v48 = vmul.f32 0.6931472, %v2221_v47 }
 0x2a1   :  { %v881_v55 = vsel %vm880_vm7, %v3495_v45, %v877_v37  ;;  %2224 = vrcp.f32 %v992_v4  ;;  %v893_v0 = vand.u32 2147483648, %v3224_v61  ;;  %v917_v13 = vmul.f32 %v916_v15, %v3440_v8  ;;  %v4941_v37 = vld [vmem:[#allocation42_spill] sm:$0xff] }
 0x2a2   :  { %v1986_v52 = vadd.f32 %v1507_v14, %v1506_v16  ;;  %v885_v59 = vsel %vm3255_vm0, nan, %v881_v55  ;;  %v958_v3 = vadd.f32 -0.14207031, %v957_v12  ;;  %v1973_v33 = vand.u32 2147483647, %v1945_v48  ;;  %v4940_v16 = vld [vmem:[#allocation24_spill] sm:$0xff] }
 0x2a3   :  { %v891_v23 = vsel %vm3282_vm5, %v3485_v2, %v885_v59  ;;  %v1687_v39 = vmul.f32 %v3169_v19, %v3169_v19  ;;  %vm1024_vm14 = vcmp.ne.f32.partialorder %v3563_v26, %v3563_v26  ;;  %v918_v42 = vadd.f32 %v917_v13, %v3440_v8  ;;  %v4932_v2 = vld [vmem:[#allocation41_spill] sm:$0xff] }
 0x2a4   :  { %v892_v45 = vand.u32 2147483647, %v891_v23  ;;  %v959_v56 = vmul.f32 %v958_v3, %v3509_v62  ;;  %vm3621_vm0 = vmor %vm1023_vm8, %vm1024_vm14  ;;  %vm1029_vm5 = vcmp.eq.s32.totalorder %v3575_v30, inf  ;;  %vm925_vm10 = vcmp.lt.s32.totalorder %v4932_v2, 0  ;;  %v4943_v23 = vld [vmem:[#allocation35_spill] sm:$0xff] }
 0x2a5   :  { %v3627_v19 = vadd.f32 %v2003_v28, %v1973_v33  ;;  %vm1030_vm6 = vcmp.eq.s32.totalorder %v3578_v9, inf  ;;  %v1703_v8 = vmul.f32 %v3182_v60, %v3182_v60  ;;  %v920_v41 = vsub.f32 1.5707964, %v918_v42  ;;  %v4938_v60 = vld [vmem:[#allocation33_spill] sm:$0xff] }
 0x2a6   :  { %v894_v44 = vor.u32 %v893_v0, %v892_v45  ;;  %v960_v7 = vadd.f32 0.19993454, %v959_v56  ;;  %vm3632_vm9 = vmand %vm1029_vm5, %vm1030_vm6  ;;  %v664_v27 = vmul.f32 %v4936_v1, %v4935_v38  ;;  %vm922_vm12 = vcmp.lt.f32.partialorder %v4932_v2, 0.0 }
 0x2a7   :  { %v2223_v36 = vpop.eup %2222  ;;  %v3639_v28 = vadd.f32 %v1703_v8, %v1687_v39  ;;  %v712_v31 = vmul.f32 %v4936_v1, %v4937_v22  ;;  %v680_v5 = vmul.f32 %v4938_v60, %v4937_v22  ;;  %vm4939_vm11 = vcmp.gt.f32.partialorder %v3329_v57, %v3321_v46 }
 0x2a8   :  { %v1508_v49 = vand.u32 2147483647, %v894_v44  ;;  %v921_v51 = vsel %vm4939_vm11, %v920_v41, %v918_v42  ;;  %v961_v63 = vmul.f32 %v960_v7, %v3509_v62  ;;  %v1926_v14 = vmul.f32 %v2223_v36, %v4940_v16  ;;  %v3690_v7 = vpop.f32.mrb[52].mxu1 }
 0x2a9   :  { %v923_v4 = vsub.f32 3.1415927, %v921_v51  ;;  %v926_v47 = vsel %vm925_vm10, 3.1415927, %v4887_v20  ;;  %vm927_vm3 = vcmp.eq.f32.partialorder %v4941_v37, 0.0  ;;  %2226 = vrsqrt.f32 %v3639_v28  ;;  %4946 = vst [vmem:[#allocation38_spill] sm:$0xff] %v3690_v7 }
 0x2aa   :  { %v1987_v15 = vadd.f32 %v1986_v52, %v1508_v49  ;;  %v934_v12 = vsel %vm922_vm12, 2.3561945, %v4906_v17  ;;  %v962_v46 = vadd.f32 -0.33333147, %v961_v63  ;;  %2228 = vlog2.f32 %v1926_v14  ;;  %v3703_v22 = vpop.f32.mrb[53].mxu1 }
 0x2ab   :  { %v2225_v57 = vpop.eup %2224  ;;  %v924_v55 = vsel %vm922_vm12, %v923_v4, %v921_v51  ;;  %v940_v48 = vand.u32 2147483648, %v4941_v37  ;;  %v3661_v59 = vadd.f32 %v680_v5, %v664_v27  ;;  %v728_v0 = vmul.f32 %v4938_v60, %v4935_v38  ;;  %4947 = vst [vmem:[#allocation41_spill] sm:$0xff] %v3703_v22 }
 0x2ac   :  { %v928_v13 = vsel %vm927_vm3, %v926_v47, %v924_v55  ;;  %v963_v52 = vmul.f32 %v962_v46, %v3509_v62  ;;  %v3666_v3 = vmul.f32 %v2225_v57, %v991_v43  ;;  %v3670_v33 = vmul.f32 %v4943_v23, %v4942_v50 }
 0x2ad   :  { %v932_v45 = vsel %vm3365_vm15, nan, %v928_v13  ;;  %v1688_v42 = vmul.f32 %v4936_v1, %v4936_v1  ;;  %v3676_v56 = vsub.f32 %v712_v31, %v728_v0  ;;  %v3679_v2 = vand.u32 2147483647, %v3661_v59 }
 0x2ae   :  { %v938_v62 = vsel %vm3377_vm2, %v934_v12, %v932_v45  ;;  %v964_v43 = vmul.f32 %v963_v52, %v3498_v11  ;;  %v3686_v44 = vmul.f32 %v3666_v3, %v3666_v3  ;;  %v1704_v41 = vmul.f32 %v4938_v60, %v4938_v60 }
 0x2af   :  { %v939_v38 = vand.u32 2147483647, %v938_v62  ;;  %vm969_vm15 = vcmp.lt.f32.partialorder %v3406_v53, 0.0  ;;  %v3694_v1 = vand.u32 2147483647, %v3676_v56  ;;  %vm1070_vm2 = vcmp.ne.f32.partialorder %v3661_v59, %v3661_v59  ;;  %v4953_v62 = vld [vmem:[#allocation5_spill] sm:$0xff] }
 0x2b0   :  { %v965_v27 = vadd.f32 %v964_v43, %v3498_v11  ;;  %vm972_vm7 = vcmp.lt.s32.totalorder %v3406_v53, 0  ;;  %v996_v36 = vmul.f32 0.002785687, %v3686_v44  ;;  %vm1071_vm8 = vcmp.ne.f32.partialorder %v3676_v56, %v3676_v56 }
 0x2b1   :  { %v941_v31 = vor.u32 %v940_v48, %v939_v38  ;;  %v1038_v60 = vmin.f32 %v3679_v2, %v3694_v1  ;;  %v1039_v5 = vmax.f32 %v3679_v2, %v3694_v1  ;;  %vm1060_vm14 = vcmp.gt.f32.partialorder %v3694_v1, %v3679_v2  ;;  %vm3711_vm5 = vmor %vm1070_vm2, %vm1071_vm8 }
 0x2b2   :  { %v967_v49 = vsub.f32 1.5707964, %v965_v27  ;;  %v997_v51 = vadd.f32 -0.015866, %v996_v36  ;;  %vm1767_vm10 = vcmp.eq.f32.partialorder %v3639_v28, inf  ;;  %v3716_v63 = vadd.f32 %v1704_v41, %v1688_v42 }
 0x2b3   :  { %v2227_v16 = vpop.eup %2226  ;;  %v1509_v14 = vand.u32 2147483647, %v941_v31  ;;  %2230 = vrcp.f32 %v1039_v5  ;;  %vm1076_vm6 = vcmp.eq.s32.totalorder %v3679_v2, inf  ;;  %vm1077_vm12 = vcmp.eq.s32.totalorder %v3694_v1, inf }
 0x2b4   :  { %v2229_v4 = vpop.eup %2228  ;;  %vm4950_vm11 = vcmp.gt.f32.partialorder %v3423_v21, %v3420_v24  ;;  %v998_v37 = vmul.f32 %v997_v51, %v3686_v44  ;;  %v1766_v12 = vmul.f32 %v2227_v16, %v3639_v28  ;;  %v1770_v46 = vand.u32 2147483648, %v3639_v28  ;;  %vm3726_vm3 = vmand %vm1076_vm6, %vm1077_vm12 }
 0x2b5   :  { %v968_v47 = vsel %vm4950_vm11, %v967_v49, %v965_v27  ;;  %v1988_v55 = vadd.f32 %v1987_v15, %v1509_v14  ;;  %v1947_v0 = vmul.f32 0.6931472, %v2229_v4  ;;  %2232 = vrsqrt.f32 %v3716_v63  ;;  %v4954_v27 = vld [vmem:[#allocation37_spill] sm:$0xff]  ;;  %v4956_v14 = vld [vmem:[#allocation39_spill] sm:$0xff] }
 0x2b6   :  { %v970_v48 = vsub.f32 3.1415927, %v968_v47  ;;  %vm974_vm2 = vcmp.eq.f32.partialorder %v3408_v40, 0.0  ;;  %v999_v13 = vadd.f32 0.04247222, %v998_v37  ;;  %v1768_v24 = vsel %vm1767_vm10, %v3639_v28, %v1766_v12 }
 0x2b7   :  { %vm1769_vm8 = vcmp.eq.f32.partialorder %v3639_v28, 0.0  ;;  %v973_v15 = vsel %vm972_vm7, 3.1415927, %v4887_v20  ;;  %v1974_v52 = vand.u32 2147483647, %v1947_v0  ;;  %v713_v43 = vmul.f32 %v4943_v23, %v4953_v62 }
 0x2b8   :  { %v971_v21 = vsel %vm969_vm15, %v970_v48, %v968_v47  ;;  %v1771_v39 = vsel %vm1769_vm8, %v1770_v46, %v1768_v24  ;;  %v1000_v42 = vmul.f32 %v999_v13, %v3686_v44  ;;  %v981_v28 = vsel %vm969_vm15, 2.3561945, %v4906_v17 }
 0x2b9   :  { %v975_v45 = vsel %vm974_vm2, %v973_v15, %v971_v21  ;;  %v1879_v8 = vadd.f32 1.0, %v1771_v39  ;;  %v3750_v38 = vadd.f32 %v3627_v19, %v1974_v52  ;;  %v681_v36 = vmul.f32 %v4954_v27, %v4953_v62  ;;  %v4955_v19 = vld [vmem:[#allocation6_spill] sm:$0xff] }
 0x2ba   :  { %v979_v41 = vsel %vm3468_vm4, nan, %v975_v45  ;;  %vm1656_vm7 = vcmp.eq.f32.partialorder %v2966_v35, inf  ;;  %v1001_v5 = vadd.f32 -0.074975304, %v1000_v42  ;;  %v729_v54 = vmul.f32 %v4954_v27, %v4942_v50  ;;  %v3801_v42 = vpop.f32.mrb[54].mxu1 }
 0x2bb   :  { %v985_v31 = vsel %vm3487_vm1, %v981_v28, %v979_v41  ;;  %v1895_v49 = vadd.f32 1e-08, %v1879_v8  ;;  %v987_v53 = vand.u32 2147483648, %v3408_v40  ;;  %v3761_v16 = vadd.f32 %v681_v36, %v3670_v33  ;;  %4960 = vst [vmem:[#allocation2_spill] sm:$0xff] %v3801_v42  ;;  %v3810_v41 = vpop.f32.mrb[55].mxu1 }
 0x2bc   :  { %v986_v51 = vand.u32 2147483647, %v985_v31  ;;  %v666_v4 = vmul.f32 %v4956_v14, %v4955_v19  ;;  %v1002_v47 = vmul.f32 %v1001_v5, %v3686_v44  ;;  %v3766_v37 = vsub.f32 %v713_v43, %v729_v54  ;;  %4961 = vst [vmem:[#allocation32_spill] sm:$0xff] %v3810_v41  ;;  %v4978_v41 = vld [vmem:[#allocation45_spill] sm:$0xff] }
 0x2bd   :  { %2234 = vrcp.f32 %v1895_v49  ;;  %v714_v12 = vmul.f32 %v4956_v14, %v4957_v10  ;;  %v2231_v46 = vpop.eup %2230  ;;  %vm1774_vm4 = vcmp.eq.f32.partialorder %v3716_v63, inf  ;;  %vm1776_vm1 = vcmp.eq.f32.partialorder %v3716_v63, 0.0 }
 0x2be   :  { %v988_v48 = vor.u32 %v987_v53, %v986_v51  ;;  %v3773_v40 = vand.u32 2147483647, %v3761_v16  ;;  %vm1658_vm15 = vcmp.eq.f32.partialorder %v2966_v35, 0.0  ;;  %v1003_v50 = vadd.f32 0.1064488, %v1002_v47 }
 0x2bf   :  { %v3776_v33 = vmul.f32 %v2231_v46, %v1038_v60  ;;  %v1689_v0 = vmul.f32 %v4943_v23, %v4943_v23  ;;  %v3781_v13 = vand.u32 2147483647, %v3766_v37  ;;  %v2233_v24 = vpop.eup %2232  ;;  %vm1117_vm10 = vcmp.ne.f32.partialorder %v3761_v16, %v3761_v16 }
 0x2c0   :  { %v1510_v21 = vand.u32 2147483647, %v988_v48  ;;  %vm1118_vm6 = vcmp.ne.f32.partialorder %v3766_v37, %v3766_v37  ;;  %v1705_v15 = vmul.f32 %v4954_v27, %v4954_v27  ;;  %v1004_v60 = vmul.f32 %v1003_v50, %v3686_v44 }
 0x2c1   :  { %v3792_v52 = vmul.f32 %v3776_v33, %v3776_v33  ;;  %v1773_v23 = vmul.f32 %v2233_v24, %v3716_v63  ;;  %v1085_v39 = vmin.f32 %v3773_v40, %v3781_v13  ;;  %vm3797_vm12 = vmor %vm1117_vm10, %vm1118_vm6  ;;  %v1777_v62 = vand.u32 2147483648, %v3716_v63 }
 0x2c2   :  { %v3803_v8 = vadd.f32 %v1988_v55, %v1510_v21  ;;  %v1086_v43 = vmax.f32 %v3773_v40, %v3781_v13  ;;  %v1005_v28 = vadd.f32 -0.14207031, %v1004_v60  ;;  %vm1123_vm2 = vcmp.eq.s32.totalorder %v3773_v40, inf }
 0x2c3   :  { %v1043_v27 = vmul.f32 0.002785687, %v3792_v52  ;;  %v1775_v36 = vsel %vm1774_vm4, %v3716_v63, %v1773_v23  ;;  %v1657_v55 = vsel %vm1656_vm7, %v2966_v35, %v3570_v58  ;;  %vm1124_vm8 = vcmp.eq.s32.totalorder %v3781_v13, inf  ;;  %v4964_v58 = vld [vmem:[#allocation40_spill] sm:$0xff] }
 0x2c4   :  { %v1778_v31 = vsel %vm1776_vm1, %v1777_v62, %v1775_v36  ;;  %2236 = vrcp.f32 %v1086_v43  ;;  %v1006_v5 = vmul.f32 %v1005_v28, %v3686_v44  ;;  %vm3825_vm10 = vmand %vm1123_vm2, %vm1124_vm8  ;;  %v3829_v53 = vadd.f32 %v1705_v15, %v1689_v0  ;;  %v4965_v0 = vld [vmem:[#allocation44_spill] sm:$0xff] }
 0x2c5   :  { %v1044_v49 = vadd.f32 -0.015866, %v1043_v27  ;;  %v1880_v54 = vadd.f32 1.0, %v1778_v31  ;;  %v1690_v47 = vmul.f32 %v4956_v14, %v4956_v14  ;;  %v682_v63 = vmul.f32 %v4964_v58, %v4957_v10  ;;  %v4969_v31 = vld [vmem:[#allocation8_spill] sm:$0xff] }
 0x2c6   :  { %v730_v46 = vmul.f32 %v4964_v58, %v4955_v19  ;;  %v1706_v48 = vmul.f32 %v4964_v58, %v4964_v58  ;;  %v1007_v24 = vadd.f32 0.19993454, %v1006_v5  ;;  %2238 = vrsqrt.f32 %v3829_v53  ;;  %v4968_v19 = vld [vmem:[#allocation26_spill] sm:$0xff]  ;;  %v4970_v5 = vld [vmem:[#allocation43_spill] sm:$0xff] }
 0x2c7   :  { %v2235_v50 = vpop.eup %2234  ;;  %v1045_v21 = vmul.f32 %v1044_v49, %v3792_v52  ;;  %v1896_v60 = vadd.f32 1e-08, %v1880_v54  ;;  %v3842_v15 = vadd.f32 1e-08, %v4965_v0  ;;  %v4967_v14 = vand.u32 2147483648, %v2966_v35 }
 0x2c8   :  { %vm1019_vm7 = vcmp.lt.s32.totalorder %v3553_v34, 0  ;;  %v1927_v23 = vmul.f32 %v2235_v50, %v4968_v19  ;;  %v1008_v62 = vmul.f32 %v1007_v24, %v3686_v44  ;;  %v3851_v28 = vadd.f32 %v682_v63, %v666_v4 }
 0x2c9   :  { %4966 = vst [vmem:[#allocation3_spill] sm:$0xff] %v3842_v15  ;;  %v1660_v10 = vsel %vm1658_vm15, %v4967_v14, %v1657_v55  ;;  %v1046_v43 = vadd.f32 0.04247222, %v1045_v21  ;;  %2240 = vrcp.f32 %v1896_v60  ;;  %v3853_v27 = vsub.f32 %v714_v12, %v730_v46  ;;  %v4977_v14 = vld [vmem:[#allocation27_spill] sm:$0xff] }
 0x2ca   :  { %2242 = vlog2.f32 %v1927_v23  ;;  %v3855_v36 = vadd.f32 %v1706_v48, %v1690_v47  ;;  %v667_v49 = vmul.f32 %v4970_v5, %v4969_v31  ;;  %v1009_v35 = vadd.f32 -0.33333147, %v1008_v62 }
 0x2cb   :  { %vm1016_vm4 = vcmp.lt.f32.partialorder %v3553_v34, 0.0  ;;  %v1047_v55 = vmul.f32 %v1046_v43, %v3792_v52  ;;  %v3862_v54 = vand.u32 2147483647, %v3851_v28  ;;  %v3864_v58 = vadd.f32 1.0, %v1660_v10  ;;  %v5045_v43 = vld [vmem:[#allocation32_spill] sm:$0xff] }
 0x2cc   :  { %v1020_v4 = vsel %vm1019_vm7, 3.1415927, %v4887_v20  ;;  %v3868_v12 = vand.u32 2147483647, %v3853_v27  ;;  %vm1164_vm1 = vcmp.ne.f32.partialorder %v3851_v28, %v3851_v28  ;;  %v1010_v47 = vmul.f32 %v1009_v35, %v3686_v44 }
 0x2cd   :  { %4971 = vst [vmem:[#allocation33_spill] sm:$0xff] %v3864_v58  ;;  %v1048_v63 = vadd.f32 -0.074975304, %v1047_v55  ;;  %vm1066_vm15 = vcmp.lt.s32.totalorder %v3661_v59, 0  ;;  %vm1165_vm6 = vcmp.ne.f32.partialorder %v3853_v27, %v3853_v27  ;;  %v1028_v48 = vsel %vm1016_vm4, 2.3561945, %v4906_v17 }
 0x2ce   :  { %v2237_v46 = vpop.eup %2236  ;;  %v1133_v24 = vmax.f32 %v3862_v54, %v3868_v12  ;;  %vm3885_vm8 = vmor %vm1164_vm1, %vm1165_vm6  ;;  %v1011_v21 = vmul.f32 %v1010_v47, %v3666_v3  ;;  %vm1170_vm7 = vcmp.eq.s32.totalorder %v3862_v54, inf  ;;  %vm1021_vm11 = vcmp.eq.f32.partialorder %v3563_v26, 0.0  ;;  %v4976_v55 = vld [vmem:[#allocation9_spill] sm:$0xff] }
 0x2cf   :  { %v1049_v60 = vmul.f32 %v1048_v63, %v3792_v52  ;;  %v3891_v0 = vmul.f32 %v2237_v46, %v1085_v39  ;;  %v3897_v10 = vsel %vm1066_vm15, 3.1415927, %v4887_v20  ;;  %vm1171_vm1 = vcmp.eq.s32.totalorder %v3868_v12, inf }
 0x2d0   :  { %2244 = vrcp.f32 %v1133_v24  ;;  %v2239_v19 = vpop.eup %2238  ;;  %v1012_v23 = vadd.f32 %v1011_v21, %v3666_v3  ;;  %vm3905_vm6 = vmand %vm1170_vm7, %vm1171_vm1  ;;  %vm1781_vm15 = vcmp.eq.f32.partialorder %v3829_v53, inf  ;;  %vm1783_vm2 = vcmp.eq.f32.partialorder %v3829_v53, 0.0 }
 0x2d1   :  { %v1050_v62 = vadd.f32 0.1064488, %v1049_v60  ;;  %v3903_v39 = vmul.f32 %v3891_v0, %v3891_v0  ;;  %2246 = vrsqrt.f32 %v3855_v36  ;;  %v1780_v35 = vmul.f32 %v2239_v19, %v3829_v53 }
 0x2d2   :  { %v715_v3 = vmul.f32 %v4970_v5, %v4976_v55  ;;  %v1014_v63 = vsub.f32 1.5707964, %v1012_v23  ;;  %v1784_v21 = vand.u32 2147483648, %v3829_v53  ;;  %v683_v42 = vmul.f32 %v4978_v41, %v4976_v55 }
 0x2d3   :  { %v2241_v47 = vpop.eup %2240  ;;  %v1051_v46 = vmul.f32 %v1050_v62, %v3792_v52  ;;  %v1090_v24 = vmul.f32 0.002785687, %v3903_v39  ;;  %v1782_v19 = vsel %vm1781_vm15, %v3829_v53, %v1780_v35  ;;  %v731_v22 = vmul.f32 %v4978_v41, %v4969_v31 }
 0x2d4   :  { %v2243_v60 = vpop.eup %2242  ;;  %v1928_v50 = vmul.f32 %v2241_v47, %v4977_v14  ;;  %v1015_v15 = vsel %vm1013_vm13, %v1014_v63, %v1012_v23  ;;  %vm1063_vm7 = vcmp.lt.f32.partialorder %v3661_v59, 0.0  ;;  %v1785_v14 = vsel %vm1783_vm2, %v1784_v21, %v1782_v19 }
 0x2d5   :  { %v1949_v62 = vmul.f32 0.6931472, %v2243_v60  ;;  %v1052_v58 = vadd.f32 -0.14207031, %v1051_v46  ;;  %v1091_v7 = vadd.f32 -0.015866, %v1090_v24  ;;  %v3930_v35 = vadd.f32 %v683_v42, %v667_v49 }
 0x2d6   :  { %v1017_v32 = vsub.f32 3.1415927, %v1015_v15  ;;  %2248 = vlog2.f32 %v1928_v50  ;;  %v1881_v25 = vadd.f32 1.0, %v1785_v14  ;;  %vm1788_vm13 = vcmp.eq.f32.partialorder %v3855_v36, inf }
 0x2d7   :  { %v1975_v55 = vand.u32 2147483647, %v1949_v62  ;;  %v1053_v47 = vmul.f32 %v1052_v58, %v3792_v52  ;;  %v1092_v31 = vmul.f32 %v1091_v7, %v3903_v39  ;;  %v3937_v9 = vsub.f32 %v715_v3, %v731_v22 }
 0x2d8   :  { %v1018_v30 = vsel %vm1016_vm4, %v1017_v32, %v1015_v15  ;;  %v3940_v50 = vand.u32 2147483647, %v3930_v35  ;;  %v1897_v34 = vadd.f32 1e-08, %v1881_v25  ;;  %v1791_v32 = vand.u32 2147483648, %v3855_v36 }
 0x2d9   :  { %v1022_v42 = vsel %vm1021_vm11, %v1020_v4, %v1018_v30  ;;  %v2006_v53 = vadd.f32 %v3750_v38, %v1975_v55  ;;  %v1054_v49 = vadd.f32 0.19993454, %v1053_v47  ;;  %v1093_v58 = vadd.f32 0.04247222, %v1092_v31 }
 0x2da   :  { %v2245_v23 = vpop.eup %2244  ;;  %v1026_v7 = vsel %vm3621_vm0, nan, %v1022_v42  ;;  %v3949_v22 = vand.u32 2147483647, %v3937_v9  ;;  %v4979_v63 = vmin.f32 %v3862_v54, %v3868_v12  ;;  %2250 = vrcp.f32 %v1897_v34 }
 0x2db   :  { %v2247_v15 = vpop.eup %2246  ;;  %v1032_v3 = vsel %vm3632_vm9, %v1028_v48, %v1026_v7  ;;  %v1055_v4 = vmul.f32 %v1054_v49, %v3792_v52  ;;  %v1094_v38 = vmul.f32 %v1093_v58, %v3903_v39  ;;  %v4980_v19 = vand.u32 2147483648, %v3563_v26 }
 0x2dc   :  { %v3958_v46 = vmul.f32 %v2245_v23, %v4979_v63  ;;  %v1033_v61 = vand.u32 2147483647, %v1032_v3  ;;  %v1787_v25 = vmul.f32 %v2247_v15, %v3855_v36  ;;  %v1179_v24 = vmin.f32 %v3940_v50, %v3949_v22 }
 0x2dd   :  { %v1056_v21 = vadd.f32 -0.33333147, %v1055_v4  ;;  %v1095_v60 = vadd.f32 -0.074975304, %v1094_v38  ;;  %v1180_v48 = vmax.f32 %v3940_v50, %v3949_v22  ;;  %vm1790_vm0 = vcmp.eq.f32.partialorder %v3855_v36, 0.0 }
 0x2de   :  { %v3965_v29 = vmul.f32 %v3958_v46, %v3958_v46  ;;  %v1035_v62 = vor.u32 %v4980_v19, %v1033_v61  ;;  %v1789_v14 = vsel %vm1788_vm13, %v3855_v36, %v1787_v25  ;;  %v1075_v26 = vsel %vm1063_vm7, 2.3561945, %v4906_v17 }
 0x2df   :  { %v1057_v55 = vmul.f32 %v1056_v21, %v3792_v52  ;;  %v1096_v47 = vmul.f32 %v1095_v60, %v3903_v39  ;;  %v1792_v30 = vsel %vm1790_vm0, %v1791_v32, %v1789_v14  ;;  %2252 = vrcp.f32 %v1180_v48 }
 0x2e0   :  { %v1137_v31 = vmul.f32 0.002785687, %v3965_v29  ;;  %v2249_v42 = vpop.eup %2248  ;;  %v1511_v49 = vand.u32 2147483647, %v1035_v62  ;;  %v1882_v58 = vadd.f32 1.0, %v1792_v30  ;;  %vm1068_vm11 = vcmp.eq.f32.partialorder %v3676_v56, 0.0 }
 0x2e1   :  { %v1058_v36 = vmul.f32 %v1057_v55, %v3776_v33  ;;  %v1951_v23 = vmul.f32 0.6931472, %v2249_v42  ;;  %v1097_v7 = vadd.f32 0.1064488, %v1096_v47  ;;  %vm1211_vm4 = vcmp.ne.f32.partialorder %v3930_v35, %v3930_v35  ;;  %v4986_v62 = vld [vmem:[#allocation46_spill] sm:$0xff]  ;;  %v4987_v55 = vld [vmem:[#allocation11_spill] sm:$0xff] }
 0x2e2   :  { %v1138_v34 = vadd.f32 -0.015866, %v1137_v31  ;;  %v3985_v52 = vadd.f32 %v3803_v8, %v1511_v49  ;;  %v1898_v15 = vadd.f32 1e-08, %v1882_v58  ;;  %vm1212_vm2 = vcmp.ne.f32.partialorder %v3937_v9, %v3937_v9  ;;  %v4988_v30 = vld [vmem:[#allocation28_spill] sm:$0xff] }
 0x2e3   :  { %v1059_v32 = vadd.f32 %v1058_v36, %v3776_v33  ;;  %v1976_v3 = vand.u32 2147483647, %v1951_v23  ;;  %v1098_v4 = vmul.f32 %v1097_v7, %v3903_v39  ;;  %vm3995_vm1 = vmor %vm1211_vm4, %vm1212_vm2  ;;  %v1691_v8 = vmul.f32 %v4970_v5, %v4970_v5  ;;  %v4985_v5 = vld [vmem:[#allocation10_spill] sm:$0xff]  ;;  %v4989_v36 = vld [vmem:[#allocation47_spill] sm:$0xff] }
 0x2e4   :  { %v1139_v38 = vmul.f32 %v1138_v34, %v3965_v29  ;;  %2254 = vrcp.f32 %v1898_v15  ;;  %vm1217_vm15 = vcmp.eq.s32.totalorder %v3940_v50, inf  ;;  %vm1218_vm13 = vcmp.eq.s32.totalorder %v3949_v22, inf  ;;  %v2251_v48 = vpop.eup %2250 }
 0x2e5   :  { %v1061_v61 = vsub.f32 1.5707964, %v1059_v32  ;;  %v4003_v25 = vadd.f32 %v2006_v53, %v1976_v3  ;;  %v1099_v33 = vadd.f32 -0.14207031, %v1098_v4  ;;  %vm4005_vm0 = vmand %vm1217_vm15, %vm1218_vm13  ;;  %vm1113_vm4 = vcmp.lt.s32.totalorder %v3761_v16, 0 }
 0x2e6   :  { %v1140_v21 = vadd.f32 0.04247222, %v1139_v38  ;;  %v1707_v19 = vmul.f32 %v4978_v41, %v4978_v41  ;;  %v668_v14 = vmul.f32 %v4986_v62, %v4985_v5  ;;  %v716_v47 = vmul.f32 %v4986_v62, %v4987_v55 }
 0x2e7   :  { %v1062_v53 = vsel %vm1060_vm14, %v1061_v61, %v1059_v32  ;;  %v1100_v31 = vmul.f32 %v1099_v33, %v3903_v39  ;;  %v1929_v42 = vmul.f32 %v2251_v48, %v4988_v30  ;;  %vm1110_vm2 = vcmp.lt.f32.partialorder %v3761_v16, 0.0  ;;  %v4992_v30 = vld [vmem:[#allocation29_spill] sm:$0xff] }
 0x2e8   :  { %v1141_v49 = vmul.f32 %v1140_v21, %v3965_v29  ;;  %v1064_v58 = vsub.f32 3.1415927, %v1062_v53  ;;  %v4023_v41 = vadd.f32 %v1707_v19, %v1691_v8  ;;  %v684_v23 = vmul.f32 %v4989_v36, %v4987_v55  ;;  %v4991_v55 = vld [vmem:[#allocation34_spill] sm:$0xff] }
 0x2e9   :  { %v1101_v7 = vadd.f32 0.19993454, %v1100_v31  ;;  %2256 = vlog2.f32 %v1929_v42  ;;  %v732_v2 = vmul.f32 %v4989_v36, %v4985_v5  ;;  %v2253_v1 = vpop.eup %2252  ;;  %v1081_v32 = vand.u32 2147483648, %v3676_v56  ;;  %v4990_v5 = vld [vmem:[#allocation19_spill] sm:$0xff] }
 0x2ea   :  { %v1142_v34 = vadd.f32 -0.074975304, %v1141_v49  ;;  %v1065_v15 = vsel %vm1063_vm7, %v1064_v58, %v1062_v53  ;;  %v4035_v3 = vsel %vm1113_vm4, 3.1415927, %v4887_v20  ;;  %2258 = vrsqrt.f32 %v4023_v41 }
 0x2eb   :  { %v1069_v4 = vsel %vm1068_vm11, %v3897_v10, %v1065_v15  ;;  %v1102_v38 = vmul.f32 %v1101_v7, %v3903_v39  ;;  %v4046_v59 = vmul.f32 %v2253_v1, %v1179_v24  ;;  %v4053_v33 = vsel %vm1110_vm2, 2.3561945, %v4906_v17 }
 0x2ec   :  { %v1143_v8 = vmul.f32 %v1142_v34, %v3965_v29  ;;  %v1073_v61 = vsel %vm3711_vm5, nan, %v1069_v4  ;;  %v4055_v21 = vadd.f32 %v684_v23, %v668_v14  ;;  %v4057_v56 = vsub.f32 %v716_v47, %v732_v2 }
 0x2ed   :  { %v1079_v10 = vsel %vm3726_vm3, %v1075_v26, %v1073_v61  ;;  %v1103_v48 = vadd.f32 -0.33333147, %v1102_v38  ;;  %v4063_v24 = vmul.f32 %v4046_v59, %v4046_v59  ;;  %v4067_v53 = vmul.f32 %v4991_v55, %v4990_v5 }
 0x2ee   :  { %v1144_v19 = vadd.f32 0.1064488, %v1143_v8  ;;  %v2255_v11 = vpop.eup %2254  ;;  %v1080_v31 = vand.u32 2147483647, %v1079_v10  ;;  %v4070_v14 = vand.u32 2147483647, %v4055_v21  ;;  %vm1258_vm3 = vcmp.ne.f32.partialorder %v4055_v21, %v4055_v21 }
 0x2ef   :  { %v4073_v47 = vand.u32 2147483647, %v4057_v56  ;;  %v1104_v57 = vmul.f32 %v1103_v48, %v3903_v39  ;;  %v1930_v42 = vmul.f32 %v2255_v11, %v4992_v30  ;;  %v1184_v49 = vmul.f32 0.002785687, %v4063_v24 }
 0x2f0   :  { %v1145_v26 = vmul.f32 %v1144_v19, %v3965_v29  ;;  %v1082_v58 = vor.u32 %v1081_v32, %v1080_v31  ;;  %vm1115_vm5 = vcmp.eq.f32.partialorder %v3766_v37, 0.0  ;;  %v1128_v15 = vand.u32 2147483648, %v3766_v37 }
 0x2f1   :  { %v1226_v23 = vmin.f32 %v4070_v14, %v4073_v47  ;;  %v1227_v7 = vmax.f32 %v4070_v14, %v4073_v47  ;;  %v1105_v34 = vmul.f32 %v1104_v57, %v3891_v0  ;;  %2260 = vlog2.f32 %v1930_v42 }
 0x2f2   :  { %v1146_v2 = vadd.f32 -0.14207031, %v1145_v26  ;;  %v1185_v39 = vadd.f32 -0.015866, %v1184_v49  ;;  %v1512_v1 = vand.u32 2147483647, %v1082_v58  ;;  %vm1259_vm15 = vcmp.ne.f32.partialorder %v4057_v56, %v4057_v56 }
 0x2f3   :  { %2262 = vrcp.f32 %v1227_v7  ;;  %v2257_v32 = vpop.eup %2256  ;;  %v1106_v4 = vadd.f32 %v1105_v34, %v3891_v0  ;;  %vm1795_vm7 = vcmp.eq.f32.partialorder %v4023_v41, inf  ;;  %vm1797_vm11 = vcmp.eq.f32.partialorder %v4023_v41, 0.0  ;;  %vm4105_vm4 = vmor %vm1258_vm3, %vm1259_vm15  ;;  %v5028_v58 = vld [vmem:[#allocation25_spill] sm:$0xff] }
 0x2f4   :  { %v1147_v38 = vmul.f32 %v1146_v2, %v3965_v29  ;;  %v1186_v8 = vmul.f32 %v1185_v39, %v4063_v24  ;;  %v2259_v61 = vpop.eup %2258  ;;  %v4095_v10 = vadd.f32 %v3985_v52, %v1512_v1  ;;  %v1953_v48 = vmul.f32 0.6931472, %v2257_v32 }
 0x2f5   :  { %v1108_v19 = vsub.f32 1.5707964, %v1106_v4  ;;  %v1794_v55 = vmul.f32 %v2259_v61, %v4023_v41  ;;  %v1798_v57 = vand.u32 2147483648, %v4023_v41  ;;  %vm1264_vm14 = vcmp.eq.s32.totalorder %v4070_v14, inf  ;;  %v5000_v61 = vld [vmem:[#allocation13_spill] sm:$0xff] }
 0x2f6   :  { %v1148_v11 = vadd.f32 0.19993454, %v1147_v38  ;;  %v1187_v0 = vadd.f32 0.04247222, %v1186_v8  ;;  %v1977_v52 = vand.u32 2147483647, %v1953_v48  ;;  %vm4995_vm13 = vcmp.gt.f32.partialorder %v3781_v13, %v3773_v40 }
 0x2f7   :  { %vm1265_vm9 = vcmp.eq.s32.totalorder %v4073_v47, inf  ;;  %v1109_v26 = vsel %vm4995_vm13, %v1108_v19, %v1106_v4  ;;  %v1796_v49 = vsel %vm1795_vm7, %v4023_v41, %v1794_v55  ;;  %v1692_v40 = vmul.f32 %v4986_v62, %v4986_v62  ;;  %v4998_v38 = vld [vmem:[#allocation12_spill] sm:$0xff]  ;;  %v4999_v8 = vld [vmem:[#allocation50_spill] sm:$0xff] }
 0x2f8   :  { %v1149_v30 = vmul.f32 %v1148_v11, %v3965_v29  ;;  %v1188_v42 = vmul.f32 %v1187_v0, %v4063_v24  ;;  %vm4120_vm3 = vmand %vm1264_vm14, %vm1265_vm9  ;;  %v1111_v7 = vsub.f32 3.1415927, %v1109_v26  ;;  %v2008_v34 = vadd.f32 %v4003_v25, %v1977_v52 }
 0x2f9   :  { %v1799_v2 = vsel %vm1797_vm11, %v1798_v57, %v1796_v49  ;;  %v1708_v32 = vmul.f32 %v4989_v36, %v4989_v36  ;;  %vm1160_vm9 = vcmp.lt.s32.totalorder %v3851_v28, 0  ;;  %v669_v25 = vmul.f32 %v4999_v8, %v4998_v38  ;;  %v5001_v57 = vld [vmem:[#allocation51_spill] sm:$0xff] }
 0x2fa   :  { %v1150_v13 = vadd.f32 -0.33333147, %v1149_v30  ;;  %v1189_v39 = vadd.f32 -0.074975304, %v1188_v42  ;;  %v1883_v1 = vadd.f32 1.0, %v1799_v2  ;;  %v1112_v4 = vsel %vm1110_vm2, %v1111_v7, %v1109_v26 }
 0x2fb   :  { %v717_v41 = vmul.f32 %v4999_v8, %v5000_v61  ;;  %v2261_v48 = vpop.eup %2260  ;;  %v1116_v62 = vsel %vm1115_vm5, %v4035_v3, %v1112_v4  ;;  %v4145_v52 = vadd.f32 %v1708_v32, %v1692_v40  ;;  %v685_v26 = vmul.f32 %v5001_v57, %v5000_v61  ;;  %v5003_v61 = vld [vmem:[#allocation14_spill] sm:$0xff] }
 0x2fc   :  { %v1151_v19 = vmul.f32 %v1150_v13, %v3965_v29  ;;  %v1190_v36 = vmul.f32 %v1189_v39, %v4063_v24  ;;  %v1899_v11 = vadd.f32 1e-08, %v1883_v1  ;;  %v1120_v0 = vsel %vm3797_vm12, nan, %v1116_v62 }
 0x2fd   :  { %v2263_v16 = vpop.eup %2262  ;;  %v1955_v55 = vmul.f32 0.6931472, %v2261_v48  ;;  %v1126_v37 = vsel %vm3825_vm10, %v4053_v33, %v1120_v0  ;;  %v1161_v51 = vsel %vm1160_vm9, 3.1415927, %v4887_v20  ;;  %vm1162_vm12 = vcmp.eq.f32.partialorder %v3853_v27, 0.0 }
 0x2fe   :  { %v1152_v3 = vmul.f32 %v1151_v19, %v3958_v46  ;;  %v1191_v29 = vadd.f32 0.1064488, %v1190_v36  ;;  %2264 = vrcp.f32 %v1899_v11  ;;  %v1127_v30 = vand.u32 2147483647, %v1126_v37 }
 0x2ff   :  { %v1978_v42 = vand.u32 2147483647, %v1955_v55  ;;  %v4156_v45 = vmul.f32 %v2263_v16, %v1226_v23  ;;  %2266 = vrsqrt.f32 %v4145_v52  ;;  %vm5002_vm10 = vcmp.lt.f32.partialorder %v3851_v28, 0.0 }
 0x300   :  { %v1153_v49 = vadd.f32 %v1152_v3, %v3958_v46  ;;  %v1192_v33 = vmul.f32 %v1191_v29, %v4063_v24  ;;  %v1129_v7 = vor.u32 %v1128_v15, %v1127_v30  ;;  %v1169_v2 = vsel %vm5002_vm10, 2.3561945, %v4906_v17  ;;  %vm5005_vm7 = vmmov %vm5002_vm10 }
 0x301   :  { %v4168_v40 = vadd.f32 %v2008_v34, %v1978_v42  ;;  %v4172_v23 = vmul.f32 %v4156_v45, %v4156_v45  ;;  %v4174_v39 = vadd.f32 %v685_v26, %v669_v25  ;;  %v733_v1 = vmul.f32 %v5001_v57, %v4998_v38  ;;  %v5006_v42 = vld [vmem:[#allocation30_spill] sm:$0xff] }
 0x302   :  { %v1155_v46 = vsub.f32 1.5707964, %v1153_v49  ;;  %v1193_v13 = vadd.f32 -0.14207031, %v1192_v33  ;;  %v1513_v32 = vand.u32 2147483647, %v1129_v7  ;;  %v4182_v34 = vmul.f32 %v3511_v18, %v5003_v61 }
 0x303   :  { %v1175_v15 = vand.u32 2147483648, %v3853_v27  ;;  %v1231_v4 = vmul.f32 0.002785687, %v4172_v23  ;;  %vm5004_vm2 = vcmp.gt.f32.partialorder %v3868_v12, %v3862_v54  ;;  %vm1207_vm14 = vcmp.lt.s32.totalorder %v3930_v35, 0 }
 0x304   :  { %v1156_v48 = vsel %vm5004_vm2, %v1155_v46, %v1153_v49  ;;  %v1194_v62 = vmul.f32 %v1193_v13, %v4063_v24  ;;  %v4189_v25 = vsub.f32 %v717_v41, %v733_v1  ;;  %v4192_v38 = vand.u32 2147483647, %v4174_v39 }
 0x305   :  { %v1992_v19 = vadd.f32 %v4095_v10, %v1513_v32  ;;  %v1158_v36 = vsub.f32 3.1415927, %v1156_v48  ;;  %v1232_v11 = vadd.f32 -0.015866, %v1231_v4  ;;  %v1693_v16 = vmul.f32 %v4999_v8, %v4999_v8 }
 0x306   :  { %v1195_v0 = vadd.f32 0.19993454, %v1194_v62  ;;  %vm1802_vm5 = vcmp.eq.f32.partialorder %v4145_v52, inf  ;;  %v1805_v54 = vand.u32 2147483648, %v4145_v52  ;;  %v4200_v12 = vand.u32 2147483647, %v4189_v25 }
 0x307   :  { %v1159_v41 = vsel %vm5005_vm7, %v1158_v36, %v1156_v48  ;;  %v1233_v55 = vmul.f32 %v1232_v11, %v4172_v23  ;;  %vm1305_vm11 = vcmp.ne.f32.partialorder %v4174_v39, %v4174_v39  ;;  %v1709_v10 = vmul.f32 %v5001_v57, %v5001_v57  ;;  %v5011_v11 = vld [vmem:[#allocation15_spill] sm:$0xff] }
 0x308   :  { %v2265_v8 = vpop.eup %2264  ;;  %v1163_v26 = vsel %vm1162_vm12, %v1161_v51, %v1159_v41  ;;  %v1196_v37 = vmul.f32 %v1195_v0, %v4063_v24  ;;  %v1273_v3 = vmin.f32 %v4192_v38, %v4200_v12  ;;  %v1274_v28 = vmax.f32 %v4192_v38, %v4200_v12 }
 0x309   :  { %v2267_v29 = vpop.eup %2266  ;;  %v1167_v30 = vsel %vm3885_vm8, nan, %v1163_v26  ;;  %v1931_v49 = vmul.f32 %v2265_v8, %v5006_v42  ;;  %v1234_v33 = vadd.f32 0.04247222, %v1233_v55  ;;  %vm1295_vm15 = vcmp.gt.f32.partialorder %v4200_v12, %v4192_v38 }
 0x30a   :  { %v1173_v27 = vsel %vm3905_vm6, %v1169_v2, %v1167_v30  ;;  %v1197_v57 = vadd.f32 -0.33333147, %v1196_v37  ;;  %v1801_v51 = vmul.f32 %v2267_v29, %v4145_v52  ;;  %2268 = vrcp.f32 %v1274_v28  ;;  %v5012_v29 = vld [vmem:[#allocation16_spill] sm:$0xff] }
 0x30b   :  { %v1174_v7 = vand.u32 2147483647, %v1173_v27  ;;  %2270 = vlog2.f32 %v1931_v49  ;;  %v1235_v46 = vmul.f32 %v1234_v33, %v4172_v23  ;;  %vm1306_vm8 = vcmp.ne.f32.partialorder %v4189_v25, %v4189_v25  ;;  %v5013_v30 = vld [vmem:[#allocation52_spill] sm:$0xff]  ;;  %v5014_v49 = vld [vmem:[#allocation17_spill] sm:$0xff] }
 0x30c   :  { %v1198_v44 = vmul.f32 %v1197_v57, %v4063_v24  ;;  %v1803_v13 = vsel %vm1802_vm5, %v4145_v52, %v1801_v51  ;;  %vm1804_vm13 = vcmp.eq.f32.partialorder %v4145_v52, 0.0  ;;  %vm4235_vm6 = vmor %vm1305_vm11, %vm1306_vm8  ;;  %vm1311_vm9 = vcmp.eq.s32.totalorder %v4192_v38, inf }
 0x30d   :  { %vm1663_vm12 = vcmp.eq.f32.partialorder %v4990_v5, inf  ;;  %v1176_v2 = vor.u32 %v1175_v15, %v1174_v7  ;;  %v1236_v1 = vadd.f32 -0.074975304, %v1235_v46  ;;  %v1806_v24 = vsel %vm1804_vm13, %v1805_v54, %v1803_v13 }
 0x30e   :  { %vm1312_vm10 = vcmp.eq.s32.totalorder %v4200_v12, inf  ;;  %v1199_v32 = vmul.f32 %v1198_v44, %v4046_v59  ;;  %vm1204_vm2 = vcmp.lt.f32.partialorder %v3930_v35, 0.0  ;;  %v1884_v52 = vadd.f32 1.0, %v1806_v24 }
 0x30f   :  { %vm4244_vm5 = vmand %vm1311_vm9, %vm1312_vm10  ;;  %v4248_v48 = vadd.f32 %v1709_v10, %v1693_v16  ;;  %v1514_v62 = vand.u32 2147483647, %v1176_v2  ;;  %v1208_v15 = vsel %vm1207_vm14, 3.1415927, %v4887_v20  ;;  %v1237_v36 = vmul.f32 %v1236_v1, %v4172_v23 }
 0x310   :  { %v718_v0 = vmul.f32 %v3511_v18, %v5011_v11  ;;  %v1200_v54 = vadd.f32 %v1199_v32, %v4046_v59  ;;  %vm1209_vm7 = vcmp.eq.f32.partialorder %v3937_v9, 0.0  ;;  %v1900_v41 = vadd.f32 1e-08, %v1884_v52 }
 0x311   :  { %2272 = vrsqrt.f32 %v4248_v48  ;;  %v4259_v55 = vadd.f32 %v1992_v19, %v1514_v62  ;;  %v1216_v16 = vsel %vm1204_vm2, 2.3561945, %v4906_v17  ;;  %v1238_v10 = vadd.f32 0.1064488, %v1237_v36 }
 0x312   :  { %v1694_v8 = vmul.f32 %v3511_v18, %v3511_v18  ;;  %v1202_v26 = vsub.f32 1.5707964, %v1200_v54  ;;  %2274 = vrcp.f32 %v1900_v41  ;;  %v686_v59 = vmul.f32 %v3517_v6, %v5011_v11 }
 0x313   :  { %v734_v37 = vmul.f32 %v3517_v6, %v5003_v61  ;;  %v1239_v28 = vmul.f32 %v1238_v10, %v4172_v23  ;;  %v1710_v19 = vmul.f32 %v3517_v6, %v3517_v6  ;;  %v4275_v42 = vmul.f32 %v5013_v30, %v5012_v29 }
 0x314   :  { %v4279_v18 = vmul.f32 %v5013_v30, %v5014_v49  ;;  %v2269_v33 = vpop.eup %2268  ;;  %vm5015_vm14 = vcmp.gt.f32.partialorder %v3949_v22, %v3940_v50  ;;  %v1222_v61 = vand.u32 2147483648, %v3937_v9  ;;  %v4286_v57 = vadd.f32 %v686_v59, %v4182_v34 }
 0x315   :  { %v1203_v27 = vsel %vm5015_vm14, %v1202_v26, %v1200_v54  ;;  %v4288_v51 = vsub.f32 %v718_v0, %v734_v37  ;;  %v2271_v6 = vpop.eup %2270  ;;  %v1240_v46 = vadd.f32 -0.14207031, %v1239_v28  ;;  %v4290_v44 = vmul.f32 %v2269_v33, %v1273_v3 }
 0x316   :  { %v1205_v7 = vsub.f32 3.1415927, %v1203_v27  ;;  %v4292_v13 = vadd.f32 %v1710_v19, %v1694_v8  ;;  %v4298_v50 = vsel %vm1663_vm12, %v4990_v5, %v4067_v53  ;;  %v1957_v22 = vmul.f32 0.6931472, %v2271_v6 }
 0x317   :  { %v4301_v2 = vand.u32 2147483647, %v4286_v57  ;;  %v4304_v34 = vand.u32 2147483647, %v4288_v51  ;;  %v1241_v3 = vmul.f32 %v1240_v46, %v4172_v23  ;;  %vm1251_vm11 = vcmp.lt.f32.partialorder %v4055_v21, 0.0 }
 0x318   :  { %v1206_v1 = vsel %vm1204_vm2, %v1205_v7, %v1203_v27  ;;  %v4312_v24 = vmul.f32 %v4290_v44, %v4290_v44  ;;  %v1979_v32 = vand.u32 2147483647, %v1957_v22  ;;  %vm1352_vm13 = vcmp.ne.f32.partialorder %v4286_v57, %v4286_v57 }
 0x319   :  { %v1210_v53 = vsel %vm1209_vm7, %v1208_v15, %v1206_v1  ;;  %v1320_v52 = vmin.f32 %v4301_v2, %v4304_v34  ;;  %v1321_v62 = vmax.f32 %v4301_v2, %v4304_v34  ;;  %v1242_v36 = vadd.f32 0.19993454, %v1241_v3 }
 0x31a   :  { %v1214_v35 = vsel %vm3995_vm1, nan, %v1210_v53  ;;  %v1278_v11 = vmul.f32 0.002785687, %v4312_v24  ;;  %v4328_v15 = vadd.f32 %v4168_v40, %v1979_v32  ;;  %vm1254_vm1 = vcmp.lt.s32.totalorder %v4055_v21, 0 }
 0x31b   :  { %v2273_v0 = vpop.eup %2272  ;;  %v1220_v9 = vsel %vm4005_vm0, %v1216_v16, %v1214_v35  ;;  %2276 = vrcp.f32 %v1321_v62  ;;  %v1243_v63 = vmul.f32 %v1242_v36, %v4172_v23  ;;  %vm1809_vm9 = vcmp.eq.f32.partialorder %v4248_v48, inf  ;;  %v5016_v16 = vld [vmem:[#allocation31_spill] sm:$0xff] }
 0x31c   :  { %v1221_v54 = vand.u32 2147483647, %v1220_v9  ;;  %v1279_v41 = vadd.f32 -0.015866, %v1278_v11  ;;  %v1808_v10 = vmul.f32 %v2273_v0, %v4248_v48  ;;  %v2275_v8 = vpop.eup %2274  ;;  %vm1811_vm0 = vcmp.eq.f32.partialorder %v4248_v48, 0.0  ;;  %v5022_v0 = vld [vmem:[#allocation18_spill] sm:$0xff] }
 0x31d   :  { %vm1353_vm12 = vcmp.ne.f32.partialorder %v4288_v51, %v4288_v51  ;;  %v1244_v40 = vadd.f32 -0.33333147, %v1243_v63  ;;  %v1932_v26 = vmul.f32 %v2275_v8, %v5016_v16  ;;  %v1812_v19 = vand.u32 2147483648, %v4248_v48  ;;  %v5023_v9 = vld [vmem:[#allocation38_spill] sm:$0xff] }
 0x31e   :  { %v1223_v60 = vor.u32 %v1222_v61, %v1221_v54  ;;  %v1280_v59 = vmul.f32 %v1279_v41, %v4312_v24  ;;  %vm4341_vm10 = vmor %vm1352_vm13, %vm1353_vm12  ;;  %v1810_v28 = vsel %vm1809_vm9, %v4248_v48, %v1808_v10  ;;  %vm1358_vm2 = vcmp.eq.s32.totalorder %v4301_v2, inf  ;;  %v5021_v48 = vld [vmem:[#allocation53_spill] sm:$0xff] }
 0x31f   :  { %vm1359_vm7 = vcmp.eq.s32.totalorder %v4304_v34, inf  ;;  %v1245_v27 = vmul.f32 %v1244_v40, %v4172_v23  ;;  %2278 = vlog2.f32 %v1932_v26  ;;  %v1255_v7 = vsel %vm1254_vm1, 3.1415927, %v4887_v20 }
 0x320   :  { %v1515_v33 = vand.u32 2147483647, %v1223_v60  ;;  %v1281_v61 = vadd.f32 0.04247222, %v1280_v59  ;;  %vm4350_vm14 = vmand %vm1358_vm2, %vm1359_vm7  ;;  %v1813_v46 = vsel %vm1811_vm0, %v1812_v19, %v1810_v28  ;;  %2280 = vrsqrt.f32 %v4292_v13 }
 0x321   :  { %v1695_v22 = vmul.f32 %v5013_v30, %v5013_v30  ;;  %v1246_v1 = vmul.f32 %v1245_v27, %v4156_v45  ;;  %v1885_v53 = vadd.f32 1.0, %v1813_v46  ;;  %v1263_v32 = vsel %vm1251_vm11, 2.3561945, %v4906_v17 }
 0x322   :  { %v4363_v23 = vadd.f32 %v4259_v55, %v1515_v33  ;;  %v1282_v3 = vmul.f32 %v1281_v61, %v4312_v24  ;;  %v687_v62 = vmul.f32 %v5021_v48, %v5014_v49  ;;  %v735_v35 = vmul.f32 %v5021_v48, %v5012_v29  ;;  %v5024_v29 = vld [vmem:[#allocation20_spill] sm:$0xff] }
 0x323   :  { %v1711_v30 = vmul.f32 %v5021_v48, %v5021_v48  ;;  %v1247_v55 = vadd.f32 %v1246_v1, %v4156_v45  ;;  %v1901_v11 = vadd.f32 1e-08, %v1885_v53  ;;  %v4379_v54 = vmul.f32 %v5023_v9, %v5022_v0 }
 0x324   :  { %v1283_v36 = vadd.f32 -0.074975304, %v1282_v3  ;;  %v4382_v41 = vadd.f32 %v687_v62, %v4275_v42  ;;  %v4385_v49 = vsub.f32 %v4279_v18, %v735_v35  ;;  %v4391_v8 = vmul.f32 %v5023_v9, %v5024_v29 }
 0x325   :  { %v2277_v63 = vpop.eup %2276  ;;  %v4387_v10 = vadd.f32 %v1711_v30, %v1695_v22  ;;  %v1249_v45 = vsub.f32 1.5707964, %v1247_v55  ;;  %2282 = vrcp.f32 %v1901_v11  ;;  %vm1256_vm13 = vcmp.eq.f32.partialorder %v4057_v56, 0.0 }
 0x326   :  { %v1284_v60 = vmul.f32 %v1283_v36, %v4312_v24  ;;  %v4394_v40 = vmul.f32 %v2277_v63, %v1320_v52  ;;  %v1269_v42 = vand.u32 2147483648, %v4057_v56  ;;  %v4399_v16 = vand.u32 2147483647, %v4382_v41 }
 0x327   :  { %v4402_v18 = vand.u32 2147483647, %v4385_v49  ;;  %vm5025_vm1 = vcmp.gt.f32.partialorder %v4073_v47, %v4070_v14  ;;  %vm1816_vm9 = vcmp.eq.f32.partialorder %v4292_v13, inf  ;;  %vm1665_vm0 = vcmp.eq.f32.partialorder %v4990_v5, 0.0 }
 0x328   :  { %v1250_v26 = vsel %vm5025_vm1, %v1249_v45, %v1247_v55  ;;  %v1285_v59 = vadd.f32 0.1064488, %v1284_v60  ;;  %v4409_v28 = vmul.f32 %v4394_v40, %v4394_v40  ;;  %vm1818_vm2 = vcmp.eq.f32.partialorder %v4292_v13, 0.0 }
 0x329   :  { %v1252_v52 = vsub.f32 3.1415927, %v1250_v26  ;;  %v1367_v19 = vmin.f32 %v4399_v16, %v4402_v18  ;;  %v1368_v33 = vmax.f32 %v4399_v16, %v4402_v18  ;;  %v2279_v14 = vpop.eup %2278  ;;  %vm1399_vm7 = vcmp.ne.f32.partialorder %v4382_v41, %v4382_v41 }
 0x32a   :  { %v1286_v47 = vmul.f32 %v1285_v59, %v4312_v24  ;;  %v1325_v27 = vmul.f32 0.002785687, %v4409_v28  ;;  %v2281_v61 = vpop.eup %2280  ;;  %v1959_v22 = vmul.f32 0.6931472, %v2279_v14  ;;  %vm1400_vm1 = vcmp.ne.f32.partialorder %v4385_v49, %v4385_v49  ;;  %v5032_v14 = vld [vmem:[#allocation3_spill] sm:$0xff] }
 0x32b   :  { %v1253_v46 = vsel %vm1251_vm11, %v1252_v52, %v1250_v26  ;;  %2284 = vrcp.f32 %v1368_v33  ;;  %v1815_v48 = vmul.f32 %v2281_v61, %v4292_v13  ;;  %vm4431_vm12 = vmor %vm1399_vm7, %vm1400_vm1  ;;  %v1819_v30 = vand.u32 2147483648, %v4292_v13  ;;  %v5031_v52 = vld [vmem:[#allocation33_spill] sm:$0xff] }
 0x32c   :  { %v1257_v1 = vsel %vm1256_vm13, %v1255_v7, %v1253_v46  ;;  %v1287_v3 = vadd.f32 -0.14207031, %v1286_v47  ;;  %v1326_v53 = vadd.f32 -0.015866, %v1325_v27  ;;  %v1980_v35 = vand.u32 2147483647, %v1959_v22 }
 0x32d   :  { %v1261_v21 = vsel %vm4105_vm4, nan, %v1257_v1  ;;  %vm1405_vm11 = vcmp.eq.s32.totalorder %v4399_v16, inf  ;;  %v1817_v36 = vsel %vm1816_vm9, %v4292_v13, %v1815_v48  ;;  %vm1406_vm4 = vcmp.eq.s32.totalorder %v4402_v18, inf  ;;  %v5034_v1 = vld [vmem:[#allocation21_spill] sm:$0xff] }
 0x32e   :  { %v1267_v56 = vsel %vm4120_vm3, %v1263_v32, %v1261_v21  ;;  %v1288_v7 = vmul.f32 %v1287_v3, %v4312_v24  ;;  %v1327_v55 = vmul.f32 %v1326_v53, %v4409_v28  ;;  %v4447_v31 = vadd.f32 %v4328_v15, %v1980_v35  ;;  %vm4453_vm3 = vmand %vm1405_vm11, %vm1406_vm4  ;;  %v5035_v3 = vld [vmem:[#allocation36_spill] sm:$0xff] }
 0x32f   :  { %v1268_v11 = vand.u32 2147483647, %v1267_v56  ;;  %v1820_v63 = vsel %vm1818_vm2, %v1819_v30, %v1817_v36  ;;  %v2283_v45 = vpop.eup %2282  ;;  %2286 = vrsqrt.f32 %v5028_v58  ;;  %v4458_v33 = vadd.f32 1e-08, %v5031_v52  ;;  %v5037_v36 = vld [vmem:[#allocation22_spill] sm:$0xff] }
 0x330   :  { %v1289_v32 = vadd.f32 0.19993454, %v1288_v7  ;;  %v1328_v60 = vadd.f32 0.04247222, %v1327_v55  ;;  %v1886_v26 = vadd.f32 1.0, %v1820_v63  ;;  %v1933_v47 = vmul.f32 %v2283_v45, %v5032_v14 }
 0x331   :  { %v1270_v15 = vor.u32 %v1269_v42, %v1268_v11  ;;  %2288 = vrsqrt.f32 %v4387_v10  ;;  %v5033_v13 = vand.u32 2147483648, %v4990_v5  ;;  %v4471_v53 = vmul.f32 %v5035_v3, %v5034_v1  ;;  %v5036_v5 = vld [vmem:[#allocation41_spill] sm:$0xff]  ;;  %v5038_v11 = vld [vmem:[#allocation2_spill] sm:$0xff] }
 0x332   :  { %v1290_v61 = vmul.f32 %v1289_v32, %v4312_v24  ;;  %v1329_v46 = vmul.f32 %v1328_v60, %v4409_v28  ;;  %v1902_v22 = vadd.f32 1e-08, %v1886_v26  ;;  %2290 = vlog2.f32 %v1933_v47  ;;  %v5039_v26 = vld [vmem:[#allocation23_spill] sm:$0xff] }
 0x333   :  { %v1667_v27 = vsel %vm1665_vm0, %v5033_v13, %v4298_v50  ;;  %v1516_v42 = vand.u32 2147483647, %v1270_v15  ;;  %v1696_v48 = vmul.f32 %v5023_v9, %v5023_v9  ;;  %v688_v50 = vmul.f32 %v5036_v5, %v5024_v29 }
 0x334   :  { %v1291_v21 = vadd.f32 -0.33333147, %v1290_v61  ;;  %v1330_v35 = vadd.f32 -0.074975304, %v1329_v46  ;;  %2292 = vrcp.f32 %v1902_v22  ;;  %v736_v7 = vmul.f32 %v5036_v5, %v5022_v0 }
 0x335   :  { %v2285_v30 = vpop.eup %2284  ;;  %v4478_v56 = vadd.f32 %v4363_v23, %v1516_v42  ;;  %v1712_v55 = vmul.f32 %v5036_v5, %v5036_v5  ;;  %v4486_v63 = vmul.f32 %v5038_v11, %v5037_v36  ;;  %v4493_v29 = vadd.f32 %v688_v50, %v4379_v54 }
 0x336   :  { %v1292_v9 = vmul.f32 %v1291_v21, %v4312_v24  ;;  %v1331_v45 = vmul.f32 %v1330_v35, %v4409_v28  ;;  %v4490_v32 = vmul.f32 %v2285_v30, %v1367_v19  ;;  %v4495_v23 = vadd.f32 1.0, %v1667_v27 }
 0x337   :  { %v4498_v0 = vsub.f32 %v4391_v8, %v736_v7  ;;  %v4500_v60 = vadd.f32 %v1712_v55, %v1696_v48  ;;  %v4504_v52 = vmul.f32 %v5038_v11, %v5039_v26  ;;  %vm1298_vm13 = vcmp.lt.f32.partialorder %v4174_v39, 0.0 }
 0x338   :  { %v1293_v24 = vmul.f32 %v1292_v9, %v4290_v44  ;;  %v1332_v19 = vadd.f32 0.1064488, %v1331_v45  ;;  %v4510_v54 = vmul.f32 %v4490_v32, %v4490_v32  ;;  %v4513_v15 = vand.u32 2147483647, %v4493_v29 }
 0x339   :  { %vm1301_vm9 = vcmp.lt.s32.totalorder %v4174_v39, 0  ;;  %vm1823_vm2 = vcmp.eq.f32.partialorder %v4387_v10, inf  ;;  %v4519_v8 = vand.u32 2147483647, %v4498_v0  ;;  %v4521_v14 = vpop.eup %2286  ;;  %vm1825_vm7 = vcmp.eq.f32.partialorder %v4387_v10, 0.0 }
 0x33a   :  { %v1294_v47 = vadd.f32 %v1293_v24, %v4290_v44  ;;  %v1333_v13 = vmul.f32 %v1332_v19, %v4409_v28  ;;  %v1372_v27 = vmul.f32 0.002785687, %v4510_v54  ;;  %vm1446_vm11 = vcmp.ne.f32.partialorder %v4493_v29, %v4493_v29 }
 0x33b   :  { %v2289_v61 = vpop.eup %2288  ;;  %v1414_v46 = vmin.f32 %v4513_v15, %v4519_v8  ;;  %v1415_v22 = vmax.f32 %v4513_v15, %v4519_v8  ;;  %vm1670_vm4 = vcmp.eq.f32.partialorder %v5034_v1, inf  ;;  %v1826_v35 = vand.u32 2147483648, %v4387_v10 }
 0x33c   :  { %v1296_v44 = vsub.f32 1.5707964, %v1294_v47  ;;  %v1334_v3 = vadd.f32 -0.14207031, %v1333_v13  ;;  %v1373_v42 = vadd.f32 -0.015866, %v1372_v27  ;;  %v1822_v48 = vmul.f32 %v2289_v61, %v4387_v10  ;;  %v2291_v21 = vpop.eup %2290 }
 0x33d   :  { %2294 = vrcp.f32 %v1415_v22  ;;  %vm1447_vm8 = vcmp.ne.f32.partialorder %v4498_v0, %v4498_v0  ;;  %vm1452_vm0 = vcmp.eq.s32.totalorder %v4513_v15, inf  ;;  %v1961_v30 = vmul.f32 0.6931472, %v2291_v21 }
 0x33e   :  { %v2293_v5 = vpop.eup %2292  ;;  %v1297_v50 = vsel %vm1295_vm15, %v1296_v44, %v1294_v47  ;;  %v1335_v7 = vmul.f32 %v1334_v3, %v4409_v28  ;;  %v1374_v55 = vmul.f32 %v1373_v42, %v4510_v54  ;;  %vm4549_vm1 = vmor %vm1446_vm11, %vm1447_vm8  ;;  %v1824_v38 = vsel %vm1823_vm2, %v4387_v10, %v1822_v48 }
 0x33f   :  { %v1299_v45 = vsub.f32 3.1415927, %v1297_v50  ;;  %v1934_v24 = vmul.f32 %v2293_v5, %v4458_v33  ;;  %vm1453_vm15 = vcmp.eq.s32.totalorder %v4519_v8, inf  ;;  %v1981_v12 = vand.u32 2147483647, %v1961_v30 }
 0x340   :  { %v1336_v19 = vadd.f32 0.19993454, %v1335_v7  ;;  %v1375_v47 = vadd.f32 0.04247222, %v1374_v55  ;;  %v1827_v13 = vsel %vm1825_vm7, %v1826_v35, %v1824_v38  ;;  %vm4562_vm8 = vmand %vm1452_vm0, %vm1453_vm15  ;;  %v1302_v61 = vsel %vm1301_vm9, 3.1415927, %v4887_v20 }
 0x341   :  { %v1300_v33 = vsel %vm1298_vm13, %v1299_v45, %v1297_v50  ;;  %2296 = vlog2.f32 %v1934_v24  ;;  %v1887_v22 = vadd.f32 1.0, %v1827_v13  ;;  %vm5044_vm2 = vcmp.eq.f32.partialorder %v4189_v25, 0.0 }
 0x342   :  { %v1304_v44 = vsel %vm5044_vm2, %v1302_v61, %v1300_v33  ;;  %v2012_v10 = vadd.f32 %v4447_v31, %v1981_v12  ;;  %v1337_v3 = vmul.f32 %v1336_v19, %v4409_v28  ;;  %v1376_v42 = vmul.f32 %v1375_v47, %v4510_v54 }
 0x343   :  { %v1308_v48 = vsel %vm4235_vm6, nan, %v1304_v44  ;;  %v1310_v21 = vsel %vm1298_vm13, 2.3561945, %v4906_v17  ;;  %v1903_v35 = vadd.f32 1e-08, %v1887_v22  ;;  %2298 = vrsqrt.f32 %v4500_v60 }
 0x344   :  { %v1314_v5 = vsel %vm4244_vm5, %v1310_v21, %v1308_v48  ;;  %v1338_v50 = vadd.f32 -0.33333147, %v1337_v3  ;;  %vm1348_vm9 = vcmp.lt.s32.totalorder %v4286_v57, 0  ;;  %v1377_v31 = vadd.f32 -0.074975304, %v1376_v42 }
 0x345   :  { %v1315_v30 = vand.u32 2147483647, %v1314_v5  ;;  %v1316_v7 = vand.u32 2147483648, %v4189_v25  ;;  %2300 = vrcp.f32 %v1903_v35  ;;  %v689_v55 = vmul.f32 %v5045_v43, %v5039_v26 }
 0x346   :  { %v4592_v39 = vsel %vm1670_vm4, %v5034_v1, %v4471_v53  ;;  %v1339_v4 = vmul.f32 %v1338_v50, %v4409_v28  ;;  %v1378_v45 = vmul.f32 %v1377_v31, %v4510_v54  ;;  %v737_v24 = vmul.f32 %v5045_v43, %v5037_v36 }
 0x347   :  { %v2295_v38 = vpop.eup %2294  ;;  %v1871_v25 = vadd.f32 1e-08, %v4495_v23  ;;  %v1317_v12 = vor.u32 %v1316_v7, %v1315_v30  ;;  %v1349_v19 = vsel %vm1348_vm9, 3.1415927, %v4887_v20  ;;  %v4601_v26 = vadd.f32 %v689_v55, %v4486_v63 }
 0x348   :  { %v1340_v47 = vmul.f32 %v1339_v4, %v4394_v40  ;;  %vm1345_vm6 = vcmp.lt.f32.partialorder %v4286_v57, 0.0  ;;  %v1379_v53 = vadd.f32 0.1064488, %v1378_v45  ;;  %v4605_v28 = vmul.f32 %v2295_v38, %v1414_v46 }
 0x349   :  { %v4608_v13 = vsub.f32 %v4504_v52, %v737_v24  ;;  %v1517_v36 = vand.u32 2147483647, %v1317_v12  ;;  %vm1350_vm5 = vcmp.eq.f32.partialorder %v4288_v51, 0.0  ;;  %vm1830_vm13 = vcmp.eq.f32.partialorder %v4500_v60, inf }
 0x34a   :  { %v1697_v23 = vmul.f32 %v5038_v11, %v5038_v11  ;;  %v4615_v63 = vand.u32 2147483647, %v4601_v26  ;;  %v1341_v33 = vadd.f32 %v1340_v47, %v4394_v40  ;;  %v1380_v61 = vmul.f32 %v1379_v53, %v4510_v54 }
 0x34b   :  { %v4621_v46 = vmul.f32 %v4605_v28, %v4605_v28  ;;  %v4624_v52 = vand.u32 2147483647, %v4608_v13  ;;  %v2297_v22 = vpop.eup %2296  ;;  %v1996_v44 = vadd.f32 %v4478_v56, %v1517_v36  ;;  %vm1832_vm0 = vcmp.eq.f32.partialorder %v4500_v60, 0.0 }
 0x34c   :  { %v1833_v11 = vand.u32 2147483648, %v4500_v60  ;;  %vm1493_vm7 = vcmp.ne.f32.partialorder %v4601_v26, %v4601_v26  ;;  %v1343_v40 = vsub.f32 1.5707964, %v1341_v33  ;;  %v1963_v3 = vmul.f32 0.6931472, %v2297_v22 }
 0x34d   :  { %v1381_v42 = vadd.f32 -0.14207031, %v1380_v61  ;;  %v1461_v48 = vmin.f32 %v4615_v63, %v4624_v52  ;;  %v2299_v21 = vpop.eup %2298  ;;  %v1419_v35 = vmul.f32 0.002785687, %v4621_v46  ;;  %v1462_v5 = vmax.f32 %v4615_v63, %v4624_v52 }
 0x34e   :  { %vm1483_vm11 = vcmp.gt.f32.partialorder %v4624_v52, %v4615_v63  ;;  %vm1494_vm4 = vcmp.ne.f32.partialorder %v4608_v13, %v4608_v13  ;;  %vm5046_vm15 = vcmp.gt.f32.partialorder %v4304_v34, %v4301_v2  ;;  %v1982_v50 = vand.u32 2147483647, %v1963_v3 }
 0x34f   :  { %v1344_v56 = vsel %vm5046_vm15, %v1343_v40, %v1341_v33  ;;  %v1382_v31 = vmul.f32 %v1381_v42, %v4510_v54  ;;  %v1829_v30 = vmul.f32 %v2299_v21, %v4500_v60  ;;  %vm4645_vm2 = vmor %vm1493_vm7, %vm1494_vm4  ;;  %v2301_v55 = vpop.eup %2300  ;;  %v1420_v45 = vadd.f32 -0.015866, %v1419_v35 }
 0x350   :  { %v1346_v4 = vsub.f32 3.1415927, %v1344_v56  ;;  %2302 = vrcp.f32 %v1462_v5  ;;  %v1713_v24 = vmul.f32 %v5045_v43, %v5045_v43  ;;  %v4651_v38 = vadd.f32 %v2012_v10, %v1982_v50 }
 0x351   :  { %v1383_v2 = vadd.f32 0.19993454, %v1382_v31  ;;  %v1935_v34 = vmul.f32 %v2301_v55, %v1871_v25  ;;  %v1831_v12 = vsel %vm1830_vm13, %v4500_v60, %v1829_v30  ;;  %v1421_v53 = vmul.f32 %v1420_v45, %v4621_v46 }
 0x352   :  { %v1347_v47 = vsel %vm1345_vm6, %v1346_v4, %v1344_v56  ;;  %v1834_v36 = vsel %vm1832_vm0, %v1833_v11, %v1831_v12  ;;  %vm1499_vm9 = vcmp.eq.s32.totalorder %v4615_v63, inf  ;;  %v1357_v61 = vsel %vm1345_vm6, 2.3561945, %v4906_v17 }
 0x353   :  { %v1351_v10 = vsel %vm1350_vm5, %v1349_v19, %v1347_v47  ;;  %v1384_v43 = vmul.f32 %v1383_v2, %v4510_v54  ;;  %2304 = vlog2.f32 %v1935_v34  ;;  %v1888_v25 = vadd.f32 1.0, %v1834_v36 }
 0x354   :  { %v1355_v33 = vsel %vm4341_vm10, nan, %v1351_v10  ;;  %v1422_v22 = vadd.f32 0.04247222, %v1421_v53  ;;  %vm1500_vm13 = vcmp.eq.s32.totalorder %v4624_v52, inf  ;;  %v1729_v3 = vadd.f32 %v1713_v24, %v1697_v23 }
 0x355   :  { %v1361_v60 = vsel %vm4350_vm14, %v1357_v61, %v1355_v33  ;;  %v1385_v11 = vadd.f32 -0.33333147, %v1384_v43  ;;  %v1904_v40 = vadd.f32 1e-08, %v1888_v25  ;;  %vm4673_vm5 = vmand %vm1499_vm9, %vm1500_vm13  ;;  %v1673_v37 = vand.u32 2147483648, %v5034_v1 }
 0x356   :  { %v1362_v42 = vand.u32 2147483647, %v1361_v60  ;;  %v1363_v21 = vand.u32 2147483648, %v4288_v51  ;;  %v1423_v57 = vmul.f32 %v1422_v22, %v4621_v46  ;;  %vm1672_vm10 = vcmp.eq.f32.partialorder %v5034_v1, 0.0 }
 0x357   :  { %v1386_v35 = vmul.f32 %v1385_v11, %v4510_v54  ;;  %2306 = vrcp.f32 %v1904_v40  ;;  %v1674_v6 = vsel %vm1672_vm10, %v1673_v37, %v4592_v39  ;;  %vm1395_vm14 = vcmp.lt.s32.totalorder %v4382_v41, 0 }
 0x358   :  { %v1364_v5 = vor.u32 %v1363_v21, %v1362_v42  ;;  %v1424_v56 = vadd.f32 -0.074975304, %v1423_v57  ;;  %2308 = vrsqrt.f32 %v1729_v3  ;;  %v1856_v55 = vadd.f32 1.0, %v1674_v6 }
 0x359   :  { %v1387_v50 = vmul.f32 %v1386_v35, %v4490_v32  ;;  %vm1392_vm6 = vcmp.lt.f32.partialorder %v4382_v41, 0.0  ;;  %vm5051_vm0 = vcmp.gt.f32.partialorder %v4402_v18, %v4399_v16  ;;  %v1676_v43 = vmul.f32 %v4521_v14, %v5028_v58 }
 0x35a   :  { %v2303_v23 = vpop.eup %2302  ;;  %v1518_v31 = vand.u32 2147483647, %v1364_v5  ;;  %v1425_v30 = vmul.f32 %v1424_v56, %v4621_v46  ;;  %v1872_v12 = vadd.f32 1e-08, %v1856_v55  ;;  %vm1397_vm7 = vcmp.eq.f32.partialorder %v4385_v49, 0.0 }
 0x35b   :  { %v1388_v51 = vadd.f32 %v1387_v50, %v4490_v32  ;;  %v4686_v4 = vmul.f32 %v2303_v23, %v1461_v48  ;;  %v1404_v25 = vsel %vm1392_vm6, 2.3561945, %v4906_v17  ;;  %vm1837_vm4 = vcmp.eq.f32.partialorder %v1729_v3, inf }
 0x35c   :  { %v1997_v1 = vadd.f32 %v1996_v44, %v1518_v31  ;;  %v1426_v54 = vadd.f32 0.1064488, %v1425_v30  ;;  %v1396_v44 = vsel %vm1395_vm14, 3.1415927, %v4887_v20  ;;  %v1840_v21 = vand.u32 2147483648, %v1729_v3 }
 0x35d   :  { %v2305_v45 = vpop.eup %2304  ;;  %v1390_v39 = vsub.f32 1.5707964, %v1388_v51  ;;  %v4691_v24 = vmul.f32 %v4686_v4, %v4686_v4  ;;  %vm1839_vm15 = vcmp.eq.f32.partialorder %v1729_v3, 0.0  ;;  %v1410_v6 = vand.u32 2147483648, %v4385_v49 }
 0x35e   :  { %v1965_v2 = vmul.f32 0.6931472, %v2305_v45  ;;  %v1427_v34 = vmul.f32 %v1426_v54, %v4621_v46  ;;  %v1680_v54 = vand.u32 2147483648, %v5028_v58  ;;  %vm5052_vm9 = vcmp.gt.f32.partialorder %v4519_v8, %v4513_v15 }
 0x35f   :  { %v1391_v32 = vsel %vm5051_vm0, %v1390_v39, %v1388_v51  ;;  %v1466_v48 = vmul.f32 0.002785687, %v4691_v24  ;;  %vm1442_vm13 = vcmp.lt.s32.totalorder %v4493_v29, 0  ;;  %vm1439_vm10 = vcmp.lt.f32.partialorder %v4493_v29, 0.0 }
 0x360   :  { %v1393_v47 = vsub.f32 3.1415927, %v1391_v32  ;;  %v1983_v53 = vand.u32 2147483647, %v1965_v2  ;;  %v1428_v36 = vadd.f32 -0.14207031, %v1427_v34 }
 0x361   :  { %v2307_v10 = vpop.eup %2306  ;;  %v1467_v33 = vadd.f32 -0.015866, %v1466_v48  ;;  %vm1444_vm14 = vcmp.eq.f32.partialorder %v4498_v0, 0.0  ;;  %v1451_v8 = vsel %vm1439_vm10, 2.3561945, %v4906_v17 }
 0x362   :  { %v2309_v16 = vpop.eup %2308  ;;  %v1394_v18 = vsel %vm1392_vm6, %v1393_v47, %v1391_v32  ;;  %v2014_v61 = vadd.f32 %v4651_v38, %v1983_v53  ;;  %v1429_v22 = vmul.f32 %v1428_v36, %v4621_v46  ;;  %v1936_v60 = vmul.f32 %v2307_v10, %v1872_v12 }
 0x363   :  { %v1398_v11 = vsel %vm1397_vm7, %v1396_v44, %v1394_v18  ;;  %v1468_v40 = vmul.f32 %v1467_v33, %v4691_v24  ;;  %v1836_v14 = vmul.f32 %v2309_v16, %v1729_v3  ;;  %v1443_v16 = vsel %vm1442_vm13, 3.1415927, %v4887_v20 }
 0x364   :  { %v1402_v37 = vsel %vm4431_vm12, nan, %v1398_v11  ;;  %v1430_v42 = vadd.f32 0.19993454, %v1429_v22  ;;  %2310 = vlog2.f32 %v1936_v60  ;;  %vm1677_vm12 = vcmp.eq.f32.partialorder %v5028_v58, inf }
 0x365   :  { %v1408_v41 = vsel %vm4453_vm3, %v1404_v25, %v1402_v37  ;;  %v1469_v57 = vadd.f32 0.04247222, %v1468_v40  ;;  %v1838_v35 = vsel %vm1837_vm4, %v1729_v3, %v1836_v14  ;;  %v1678_v59 = vsel %vm1677_vm12, %v5028_v58, %v1676_v43 }
 0x366   :  { %v1409_v38 = vand.u32 2147483647, %v1408_v41  ;;  %v1431_v5 = vmul.f32 %v1430_v42, %v4621_v46  ;;  %v1841_v56 = vsel %vm1839_vm15, %v1840_v21, %v1838_v35  ;;  %vm1679_vm3 = vcmp.eq.f32.partialorder %v5028_v58, 0.0 }
 0x367   :  { %v1470_v50 = vmul.f32 %v1469_v57, %v4691_v24  ;;  %v1889_v23 = vadd.f32 1.0, %v1841_v56  ;;  %v1681_v2 = vsel %vm1679_vm3, %v1680_v54, %v1678_v59  ;;  %v1457_v40 = vand.u32 2147483648, %v4498_v0 }
 0x368   :  { %v1411_v62 = vor.u32 %v1410_v6, %v1409_v38  ;;  %v1432_v31 = vadd.f32 -0.33333147, %v1431_v5  ;;  %v1857_v47 = vadd.f32 1.0, %v1681_v2  ;;  %vm1491_vm6 = vcmp.eq.f32.partialorder %v4608_v13, 0.0 }
 0x369   :  { %v1471_v30 = vadd.f32 -0.074975304, %v1470_v50  ;;  %v1905_v55 = vadd.f32 1e-08, %v1889_v23 }
 0x36a   :  { %v1519_v51 = vand.u32 2147483647, %v1411_v62  ;;  %v1433_v3 = vmul.f32 %v1432_v31, %v4621_v46  ;;  %v1873_v25 = vadd.f32 1e-08, %v1857_v47  ;;  %v1504_v62 = vand.u32 2147483648, %v4608_v13 }
 0x36b   :  { %v1472_v49 = vmul.f32 %v1471_v30, %v4691_v24  ;;  %2312 = vrcp.f32 %v1905_v55 }
 0x36c   :  { %v1998_v45 = vadd.f32 %v1997_v1, %v1519_v51  ;;  %v1434_v39 = vmul.f32 %v1433_v3, %v4605_v28 }
 0x36d   :  { %v1473_v34 = vadd.f32 0.1064488, %v1472_v49 }
 0x36e   :  { %v2311_v12 = vpop.eup %2310  ;;  %v1435_v32 = vadd.f32 %v1434_v39, %v4605_v28 }
 0x36f   :  { %v1967_v44 = vmul.f32 0.6931472, %v2311_v12  ;;  %v1474_v48 = vmul.f32 %v1473_v34, %v4691_v24 }
 0x370   :  { %v1437_v46 = vsub.f32 1.5707964, %v1435_v32 }
 0x371   :  { %v1984_v53 = vand.u32 2147483647, %v1967_v44  ;;  %v1475_v36 = vadd.f32 -0.14207031, %v1474_v48 }
 0x372   :  { %v1438_v10 = vsel %vm5052_vm9, %v1437_v46, %v1435_v32 }
 0x373   :  { %v1440_v58 = vsub.f32 3.1415927, %v1438_v10  ;;  %v2015_v1 = vadd.f32 %v2014_v61, %v1984_v53  ;;  %v1476_v43 = vmul.f32 %v1475_v36, %v4691_v24 }
 0x375   :  { %v2313_v28 = vpop.eup %2312  ;;  %v1441_v33 = vsel %vm1439_vm10, %v1440_v58, %v1438_v10  ;;  %v1477_v18 = vadd.f32 0.19993454, %v1476_v43 }
 0x376   :  { %v1445_v22 = vsel %vm1444_vm14, %v1443_v16, %v1441_v33  ;;  %v1937_v60 = vmul.f32 %v2313_v28, %v1873_v25 }
 0x377   :  { %v1449_v15 = vsel %vm4549_vm1, nan, %v1445_v22  ;;  %v1478_v61 = vmul.f32 %v1477_v18, %v4691_v24  ;;  %vm1489_vm1 = vcmp.lt.s32.totalorder %v4601_v26, 0 }
 0x378   :  { %v1455_v11 = vsel %vm4562_vm8, %v1451_v8, %v1449_v15  ;;  %2314 = vlog2.f32 %v1937_v60  ;;  %vm1486_vm8 = vcmp.lt.f32.partialorder %v4601_v26, 0.0  ;;  %v1490_v56 = vsel %vm1489_vm1, 3.1415927, %v4887_v20 }
 0x379   :  { %v1456_v29 = vand.u32 2147483647, %v1455_v11  ;;  %v1479_v14 = vadd.f32 -0.33333147, %v1478_v61  ;;  %v1498_v63 = vsel %vm1486_vm8, 2.3561945, %v4906_v17 }
 0x37b   :  { %v1458_v37 = vor.u32 %v1457_v40, %v1456_v29  ;;  %v1480_v42 = vmul.f32 %v1479_v14, %v4691_v24 }
 0x37d   :  { %v1520_v21 = vand.u32 2147483647, %v1458_v37  ;;  %v1481_v41 = vmul.f32 %v1480_v42, %v4686_v4 }
 0x37f   :  { %v1999_v9 = vadd.f32 %v1998_v45, %v1520_v21  ;;  %v1482_v57 = vadd.f32 %v1481_v41, %v4686_v4 }
 0x381   :  { %v1484_v35 = vsub.f32 1.5707964, %v1482_v57 }
 0x382   :  { %v2315_v38 = vpop.eup %2314 }
 0x383   :  { %v1485_v27 = vsel %vm1483_vm11, %v1484_v35, %v1482_v57  ;;  %v1969_v6 = vmul.f32 0.6931472, %v2315_v38 }
 0x384   :  { %v1487_v0 = vsub.f32 3.1415927, %v1485_v27 }
 0x385   :  { %v1985_v5 = vand.u32 2147483647, %v1969_v6 }
 0x386   :  { %v1488_v24 = vsel %vm1486_vm8, %v1487_v0, %v1485_v27 }
 0x387   :  { %v1492_v50 = vsel %vm1491_vm6, %v1490_v56, %v1488_v24  ;;  %v2016_v4 = vadd.f32 %v2015_v1, %v1985_v5 }
 0x388   :  { %v1496_v23 = vsel %vm4645_vm2, nan, %v1492_v50 }
 0x389   :  { %v1502_v52 = vsel %vm4673_vm5, %v1498_v63, %v1496_v23  ;;  %2017 = vst [vmem:[%s4767_s4] sm:$0xff] %v2016_v4 }
 0x38a   :  { %v1503_v26 = vand.u32 2147483647, %v1502_v52 }
 0x38c   :  { %v1505_v20 = vor.u32 %v1504_v62, %v1503_v26 }
 0x38e   :  { %v1521_v31 = vand.u32 2147483647, %v1505_v20 }
 0x390   :  { %v2000_v30 = vadd.f32 %v1999_v9, %v1521_v31 }
 0x392   :  { %2001 = vst [vmem:[%s4768_s3] sm:$0xff] %v2000_v30 }

</bundles_post_ra>
